<compile_context>
chip_gen: v7x
topology: tpu7x:2x2x1
jax: 0.10.0
libtpu: 0.0.40
codegen_flags: <defaults>
</compile_context>

<pallas_src>
import functools

import jax
import jax.numpy as jnp
from jax.experimental import pallas as pl
from jax.experimental.pallas import tpu as pltpu


# ----------------------------- Pallas kernels -----------------------------

def _deconv_bn_relu_kernel(p_ref, w_ref, g_ref, b_ref, o_ref, *, eps=1e-5):
    """Fused grouped matmul + BatchNorm(batch stats) + ReLU.

    p_ref: (Gp, K, M) bf16, Gp in {1, G}.  Gp == 1 -> the groups share one
           input; it is broadcast across groups inside the kernel (vreg-level,
           no extra HBM traffic).
    w_ref: (G, Co, K) bf16   -- per-group weight
    g_ref, b_ref: (1, Co, 1) f32
    o_ref: (G, Co, M) bf16
    """
    G = w_ref.shape[0]
    p = p_ref[...]
    if p.shape[0] == 1 and G > 1:                                # static branch
        p = jnp.broadcast_to(p, (G,) + p.shape[1:])
    s = jnp.einsum("gck,gkm->gcm", w_ref[...], p,
                   preferred_element_type=jnp.float32)           # (G, Co, M) f32
    cnt = s.shape[0] * s.shape[2]                                # = N * Ho * Wo
    inv_cnt = 1.0 / cnt
    # per-channel stats over all groups and all lanes (lane reduce -> XLU)
    ssum = jnp.sum(jnp.sum(s, axis=2, keepdims=True), axis=0, keepdims=True)
    mean = ssum * inv_cnt
    xc = s - mean
    vsum = jnp.sum(jnp.sum(xc * xc, axis=2, keepdims=True), axis=0, keepdims=True)
    var = vsum * inv_cnt
    scale = jax.lax.rsqrt(var + eps) * g_ref[...]                # (1, Co, 1), cheap
    y = xc * scale + b_ref[...]
    o_ref[...] = jnp.maximum(y, 0.0).astype(o_ref.dtype)


def _deconv_tanh_kernel(p_ref, w_ref, o_ref):
    """Fused grouped matmul + tanh epilogue (EUP slot, free under the MXU)."""
    s = jnp.einsum("gck,gkm->gcm", w_ref[...], p_ref[...],
                   preferred_element_type=jnp.float32)
    o_ref[...] = jnp.tanh(s).astype(o_ref.dtype)


# ----------------------------- pallas_call wrappers -----------------------------

def fused_deconv_bn_relu(p, w, gamma, beta):
    """p: (Gp, K, M) bf16 (Gp in {1, G}), w: (G, Co, K) bf16 -> (G, Co, M) bf16."""
    Gp, K, M = p.shape
    G, Co, _ = w.shape
    g = gamma.astype(jnp.float32).reshape(1, Co, 1)
    b = beta.astype(jnp.float32).reshape(1, Co, 1)
    return pl.pallas_call(
        _deconv_bn_relu_kernel,
        out_shape=jax.ShapeDtypeStruct((G, Co, M), jnp.bfloat16),
        in_specs=[pl.BlockSpec((Gp, K, M), lambda: (0, 0, 0)),
                  pl.BlockSpec((G, Co, K), lambda: (0, 0, 0)),
                  pl.BlockSpec((1, Co, 1), lambda: (0, 0, 0)),
                  pl.BlockSpec((1, Co, 1), lambda: (0, 0, 0))],
        out_specs=pl.BlockSpec((G, Co, M), lambda: (0, 0, 0)),
    )(p, w, g, b)


def fused_deconv_tanh(p, w, tile_m=256):
    """p: (G, K, M) bf16, w: (G, Co, K) bf16 -> (G, Co, M) f32.

    Lane-tiled with a 'parallel' grid axis (both TCs on v7x); 256-wide lane
    tiles also match the v6e/v7x 256-wide MXU.
    """
    G, K, M = p.shape
    Co = w.shape[1]
    tm = M
    for cand in (tile_m, 128):
        if M % cand == 0:
            tm = cand
            break
    return pl.pallas_call(
        _deconv_tanh_kernel,
        out_shape=jax.ShapeDtypeStruct((G, Co, M), jnp.float32),
        grid=(M // tm,),
        in_specs=[pl.BlockSpec((G, K, tm), lambda i: (0, 0, i)),
                  pl.BlockSpec((G, Co, K), lambda i: (0, 0, 0))],
        out_specs=pl.BlockSpec((G, Co, tm), lambda i: (0, 0, i)),
        compiler_params=pltpu.CompilerParams(
            dimension_semantics=("parallel",)),
    )(p, w)


# ----------------------------- JAX-side glue (cheap, fused by XLA) -----------------------------

def _patches_stride2(x):
    """x: (Ci, N, H, W) -> parity-grouped 2x2 windows (4, Ci*4, N*H*W) bf16."""
    Ci, N, H, W = x.shape
    xp = jnp.pad(x, ((0, 0), (0, 0), (1, 1), (1, 1)))
    groups = []
    for a in range(2):
        for b in range(2):
            taps = [xp[:, :, a + dh:a + dh + H, b + dw:b + dw + W]
                    for dh in range(2) for dw in range(2)]
            g = jnp.stack(taps, axis=1)                       # (Ci, 4, N, H, W)
            groups.append(g.reshape(Ci * 4, N * H * W))
    return jnp.stack(groups, axis=0).astype(jnp.bfloat16)     # (4, Ci*4, N*H*W)


def _unshuffle_stride2(o, N, H, W):
    """o: (4, Co, N*H*W) parity-grouped output -> (Co, N, 2H, 2W) (pixel shuffle)."""
    _, Co, _ = o.shape
    o6 = o.reshape(2, 2, Co, N, H, W)                  # (a, b, co, n, i, j)
    return o6.transpose(2, 3, 4, 0, 5, 1).reshape(Co, N, 2 * H, 2 * W)


def _prep_w_stride2(w):
    """torch ConvTranspose2d weight (Ci, Co, 4, 4) -> (4, Co, Ci*4) bf16."""
    Ci, Co = w.shape[0], w.shape[1]
    groups = []
    for a in range(2):
        for b in range(2):
            taps = [w[:, :, 3 - a - 2 * dh, 3 - b - 2 * dw]   # (Ci, Co)
                    for dh in range(2) for dw in range(2)]
            g = jnp.stack(taps, axis=1)                       # (Ci, 4, Co)
            groups.append(g.reshape(Ci * 4, Co).T)            # (Co, Ci*4)
    return jnp.stack(groups, axis=0).astype(jnp.bfloat16)     # (4, Co, Ci*4)


def _prep_w_first(w):
    """(z_dim, Co, 4, 4) -> (16, Co, z_dim) bf16; group = output spatial tap (kh*4+kw)."""
    zd, Co = w.shape[0], w.shape[1]
    return jnp.transpose(w, (2, 3, 1, 0)).reshape(16, Co, zd).astype(jnp.bfloat16)


# ----------------------------- Generator -----------------------------

def init_params(key, z_dim, ngf, nc):
    """Raw PyTorch-layout parameters (f32)."""
    ks = jax.random.split(key, 8)

    def wt(k, ci, co):
        return 0.02 * jax.random.normal(k, (ci, co, 4, 4), jnp.float32)

    def gm(k, c):  # BN gamma ~ N(1, 0.02), beta = 0 (DCGAN-style)
        return 1.0 + 0.02 * jax.random.normal(k, (c,), jnp.float32)

    return {
        "w1": wt(ks[0], z_dim, ngf * 4),
        "g1": gm(ks[1], ngf * 4), "b1": jnp.zeros((ngf * 4,), jnp.float32),
        "w2": wt(ks[2], ngf * 4, ngf * 2),
        "g2": gm(ks[3], ngf * 2), "b2": jnp.zeros((ngf * 2,), jnp.float32),
        "w3": wt(ks[4], ngf * 2, ngf),
        "g3": gm(ks[5], ngf), "b3": jnp.zeros((ngf,), jnp.float32),
        "w4": wt(ks[6], ngf, nc),
    }


def prep_params(raw):
    """One-time conversion to kernel layout (grouped, bf16 weights)."""
    return {
        "w1": _prep_w_first(raw["w1"]),
        "w2": _prep_w_stride2(raw["w2"]),
        "w3": _prep_w_stride2(raw["w3"]),
        "w4": _prep_w_stride2(raw["w4"]),
        "g1": raw["g1"], "b1": raw["b1"],
        "g2": raw["g2"], "b2": raw["b2"],
        "g3": raw["g3"], "b3": raw["b3"],
    }


@jax.jit
def generator_forward(z, params):
    """z: (N, z_dim, 1, 1) f32 -> (N, nc, 32, 32) f32."""
    N, zd = z.shape[0], z.shape[1]
    assert z.shape[2] == 1 and z.shape[3] == 1

    # layer 1: ConvT(z_dim, ngf*4, 4, 1, 0) + BN + ReLU ; groups = 16 spatial taps.
    # z passed once (1, z_dim, N); broadcast over the 16 groups happens in-kernel.
    z2 = z.reshape(N, zd).T.astype(jnp.bfloat16)                    # (z_dim, N)
    p1 = z2.reshape(1, zd, N)
    o1 = fused_deconv_bn_relu(p1, params["w1"], params["g1"], params["b1"])  # (16, Co, N)
    Co1 = o1.shape[1]
    x = o1.reshape(4, 4, Co1, N).transpose(2, 3, 0, 1)              # (Co1, N, 4, 4)

    # layer 2: ConvT(ngf*4, ngf*2, 4, 2, 1) + BN + ReLU
    o2 = fused_deconv_bn_relu(_patches_stride2(x), params["w2"], params["g2"], params["b2"])
    x = _unshuffle_stride2(o2, N, 4, 4)                             # (Co2, N, 8, 8)

    # layer 3: ConvT(ngf*2, ngf, 4, 2, 1) + BN + ReLU
    o3 = fused_deconv_bn_relu(_patches_stride2(x), params["w3"], params["g3"], params["b3"])
    x = _unshuffle_stride2(o3, N, 8, 8)                             # (Co3, N, 16, 16)

    # layer 4: ConvT(ngf, nc, 4, 2, 1) + Tanh (fused epilogue, lane-tiled parallel grid)
    o4 = fused_deconv_tanh(_patches_stride2(x), params["w4"])       # (4, nc, N*16*16) f32
    y = _unshuffle_stride2(o4, N, 16, 16)                           # (nc, N, 32, 32)
    return y.transpose(1, 0, 2, 3)                                  # (N, nc, 32, 32)


# ----------------------------- pure-JAX reference (correctness check) -----------------------------

def _ref_deconv(x, w, stride, pad):
    k = w.shape[2]
    w_oihw = jnp.transpose(w[:, :, ::-1, ::-1], (1, 0, 2, 3))       # (Co, Ci, k, k)
    return jax.lax.conv_general_dilated(
        x, w_oihw, window_strides=(1, 1),
        padding=[(k - 1 - pad, k - 1 - pad)] * 2,
        lhs_dilation=(stride, stride),
        dimension_numbers=("NCHW", "OIHW", "NCHW"))


def _ref_bn_relu(x, g, b, eps=1e-5):
    mean = x.mean(axis=(0, 2, 3), keepdims=True)
    var = ((x - mean) ** 2).mean(axis=(0, 2, 3), keepdims=True)
    y = (x - mean) * jax.lax.rsqrt(var + eps)
    return jnp.maximum(y * g.reshape(1, -1, 1, 1) + b.reshape(1, -1, 1, 1), 0.0)


@jax.jit
def reference_forward(z, raw):
    x = _ref_bn_relu(_ref_deconv(z, raw["w1"], 1, 0), raw["g1"], raw["b1"])
    x = _ref_bn_relu(_ref_deconv(x, raw["w2"], 2, 1), raw["g2"], raw["b2"])
    x = _ref_bn_relu(_ref_deconv(x, raw["w3"], 2, 1), raw["g3"], raw["b3"])
    return jnp.tanh(_ref_deconv(x, raw["w4"], 2, 1))


if __name__ == "__main__":
    z_dim, ngf, nc, batch = 16, 8, 3, 2
    key = jax.random.PRNGKey(0)
    kz, kp = jax.random.split(key)
    z = jax.random.normal(kz, (batch, z_dim, 1, 1), jnp.float32)
    raw = init_params(kp, z_dim, ngf, nc)
    params = prep_params(raw)

    out = jax.block_until_ready(generator_forward(z, params))
    assert out.shape == (batch, nc, 32, 32), out.shape
    assert bool(jnp.all(jnp.isfinite(out)))

    ref = jax.block_until_ready(reference_forward(z, raw))
    max_err = float(jnp.max(jnp.abs(out - ref)))
    # bf16 matmul operands + bf16 inter-layer activations vs f32 reference
    assert max_err < 0.1, f"max abs err vs reference: {max_err}"

    print("KERNEL_OK")
</pallas_src>

<mosaic_0001>
module attributes {stable_mosaic.version = 11 : i64} {
  func.func @_deconv_bn_relu_kernel(%arg0: memref<1x16x2xbf16, #tpu.memory_space<vmem>>, %arg1: memref<16x32x16xbf16, #tpu.memory_space<vmem>>, %arg2: memref<1x32x1xf32, #tpu.memory_space<vmem>>, %arg3: memref<1x32x1xf32, #tpu.memory_space<vmem>>, %arg4: memref<16x32x2xbf16, #tpu.memory_space<vmem>>) attributes {dimension_semantics = [], scalar_prefetch = 0 : i64, scratch_operands = 0 : i64, tpu.core_type = #tpu.core_type<tc>} {
    %c0 = arith.constant 0 : index
    %c0_0 = arith.constant 0 : index
    %c0_1 = arith.constant 0 : index
    %0 = vector.load %arg0[%c0, %c0_0, %c0_1] : memref<1x16x2xbf16, #tpu.memory_space<vmem>>, vector<1x16x2xbf16>
    %1 = vector.shape_cast %0 : vector<1x16x2xbf16> to vector<1x16x2xbf16>
    %2 = vector.broadcast %1 : vector<1x16x2xbf16> to vector<16x16x2xbf16>
    %c0_2 = arith.constant 0 : index
    %c0_3 = arith.constant 0 : index
    %c0_4 = arith.constant 0 : index
    %3 = vector.load %arg1[%c0_2, %c0_3, %c0_4] : memref<16x32x16xbf16, #tpu.memory_space<vmem>>, vector<16x32x16xbf16>
    "tpu.trace_start"() <{level = 10 : i32, message = "gck,gkm->gcm"}> : () -> ()
    %cst = arith.constant dense<0.000000e+00> : vector<16x32x2xf32>
    %4 = tpu.matmul %3, %2, %cst {dimension_numbers = #tpu.dot_dimension_numbers<[2], [1], [1], [2], [0, 0, 0, 1, 1, 2], [0], [0]>} : vector<16x32x16xbf16>, vector<16x16x2xbf16>, vector<16x32x2xf32> -> vector<16x32x2xf32>
    "tpu.trace_stop"() : () -> ()
    %cst_5 = arith.constant dense<0.000000e+00> : vector<16x32xf32>
    %5 = vector.multi_reduction <add>, %4, %cst_5 [2] : vector<16x32x2xf32> to vector<16x32xf32>
    %6 = vector.shape_cast %5 : vector<16x32xf32> to vector<16x32x1xf32>
    %cst_6 = arith.constant dense<0.000000e+00> : vector<32x1xf32>
    %7 = vector.multi_reduction <add>, %6, %cst_6 [0] : vector<16x32x1xf32> to vector<32x1xf32>
    %8 = vector.shape_cast %7 : vector<32x1xf32> to vector<1x32x1xf32>
    %cst_7 = arith.constant 3.125000e-02 : f32
    %9 = vector.broadcast %cst_7 : f32 to vector<1x32x1xf32>
    %10 = arith.mulf %8, %9 : vector<1x32x1xf32>
    %11 = vector.broadcast %10 : vector<1x32x1xf32> to vector<16x32x2xf32>
    %12 = arith.subf %4, %11 : vector<16x32x2xf32>
    %13 = arith.mulf %12, %12 : vector<16x32x2xf32>
    %cst_8 = arith.constant dense<0.000000e+00> : vector<16x32xf32>
    %14 = vector.multi_reduction <add>, %13, %cst_8 [2] : vector<16x32x2xf32> to vector<16x32xf32>
    %15 = vector.shape_cast %14 : vector<16x32xf32> to vector<16x32x1xf32>
    %cst_9 = arith.constant dense<0.000000e+00> : vector<32x1xf32>
    %16 = vector.multi_reduction <add>, %15, %cst_9 [0] : vector<16x32x1xf32> to vector<32x1xf32>
    %17 = vector.shape_cast %16 : vector<32x1xf32> to vector<1x32x1xf32>
    %cst_10 = arith.constant 3.125000e-02 : f32
    %18 = vector.broadcast %cst_10 : f32 to vector<1x32x1xf32>
    %19 = arith.mulf %17, %18 : vector<1x32x1xf32>
    %cst_11 = arith.constant 9.99999974E-6 : f32
    %20 = vector.broadcast %cst_11 : f32 to vector<1x32x1xf32>
    %21 = arith.addf %19, %20 : vector<1x32x1xf32>
    %22 = math.rsqrt %21 : vector<1x32x1xf32>
    %c0_12 = arith.constant 0 : index
    %c0_13 = arith.constant 0 : index
    %c0_14 = arith.constant 0 : index
    %23 = vector.load %arg2[%c0_12, %c0_13, %c0_14] : memref<1x32x1xf32, #tpu.memory_space<vmem>>, vector<1x32x1xf32>
    %24 = arith.mulf %22, %23 : vector<1x32x1xf32>
    %25 = vector.broadcast %24 : vector<1x32x1xf32> to vector<16x32x2xf32>
    %26 = arith.mulf %12, %25 : vector<16x32x2xf32>
    %c0_15 = arith.constant 0 : index
    %c0_16 = arith.constant 0 : index
    %c0_17 = arith.constant 0 : index
    %27 = vector.load %arg3[%c0_15, %c0_16, %c0_17] : memref<1x32x1xf32, #tpu.memory_space<vmem>>, vector<1x32x1xf32>
    %28 = vector.broadcast %27 : vector<1x32x1xf32> to vector<16x32x2xf32>
    %29 = arith.addf %26, %28 : vector<16x32x2xf32>
    %cst_18 = arith.constant 0.000000e+00 : f32
    %30 = vector.broadcast %cst_18 : f32 to vector<16x32x2xf32>
    %31 = arith.maximumf %29, %30 : vector<16x32x2xf32>
    %32 = arith.truncf %31 : vector<16x32x2xf32> to vector<16x32x2xbf16>
    %c0_19 = arith.constant 0 : index
    %c0_20 = arith.constant 0 : index
    %c0_21 = arith.constant 0 : index
    %33 = vector.load %arg4[%c0_19, %c0_20, %c0_21] : memref<16x32x2xbf16, #tpu.memory_space<vmem>>, vector<16x32x2xbf16>
    tpu.vector_store %arg4[%c0_19, %c0_20, %c0_21], %32 {strides = array<i32>} : memref<16x32x2xbf16, #tpu.memory_space<vmem>>, vector<16x32x2xbf16>,
    return
  }
}

module attributes {stable_mosaic.version = 11 : i64} {
  func.func @_deconv_bn_relu_kernel(%arg0: memref<4x128x32xbf16, #tpu.memory_space<vmem>>, %arg1: memref<4x16x128xbf16, #tpu.memory_space<vmem>>, %arg2: memref<1x16x1xf32, #tpu.memory_space<vmem>>, %arg3: memref<1x16x1xf32, #tpu.memory_space<vmem>>, %arg4: memref<4x16x32xbf16, #tpu.memory_space<vmem>>) attributes {dimension_semantics = [], scalar_prefetch = 0 : i64, scratch_operands = 0 : i64, tpu.core_type = #tpu.core_type<tc>} {
    %c0 = arith.constant 0 : index
    %c0_0 = arith.constant 0 : index
    %c0_1 = arith.constant 0 : index
    %0 = vector.load %arg0[%c0, %c0_0, %c0_1] : memref<4x128x32xbf16, #tpu.memory_space<vmem>>, vector<4x128x32xbf16>
    %c0_2 = arith.constant 0 : index
    %c0_3 = arith.constant 0 : index
    %c0_4 = arith.constant 0 : index
    %1 = vector.load %arg1[%c0_2, %c0_3, %c0_4] : memref<4x16x128xbf16, #tpu.memory_space<vmem>>, vector<4x16x128xbf16>
    "tpu.trace_start"() <{level = 10 : i32, message = "gck,gkm->gcm"}> : () -> ()
    %cst = arith.constant dense<0.000000e+00> : vector<4x16x32xf32>
    %2 = tpu.matmul %1, %0, %cst {dimension_numbers = #tpu.dot_dimension_numbers<[2], [1], [1], [2], [0, 0, 0, 1, 1, 2], [0], [0]>} : vector<4x16x128xbf16>, vector<4x128x32xbf16>, vector<4x16x32xf32> -> vector<4x16x32xf32>
    "tpu.trace_stop"() : () -> ()
    %cst_5 = arith.constant dense<0.000000e+00> : vector<4x16xf32>
    %3 = vector.multi_reduction <add>, %2, %cst_5 [2] : vector<4x16x32xf32> to vector<4x16xf32>
    %4 = vector.shape_cast %3 : vector<4x16xf32> to vector<4x16x1xf32>
    %cst_6 = arith.constant dense<0.000000e+00> : vector<16x1xf32>
    %5 = vector.multi_reduction <add>, %4, %cst_6 [0] : vector<4x16x1xf32> to vector<16x1xf32>
    %6 = vector.shape_cast %5 : vector<16x1xf32> to vector<1x16x1xf32>
    %cst_7 = arith.constant 7.812500e-03 : f32
    %7 = vector.broadcast %cst_7 : f32 to vector<1x16x1xf32>
    %8 = arith.mulf %6, %7 : vector<1x16x1xf32>
    %9 = vector.broadcast %8 : vector<1x16x1xf32> to vector<4x16x32xf32>
    %10 = arith.subf %2, %9 : vector<4x16x32xf32>
    %11 = arith.mulf %10, %10 : vector<4x16x32xf32>
    %cst_8 = arith.constant dense<0.000000e+00> : vector<4x16xf32>
    %12 = vector.multi_reduction <add>, %11, %cst_8 [2] : vector<4x16x32xf32> to vector<4x16xf32>
    %13 = vector.shape_cast %12 : vector<4x16xf32> to vector<4x16x1xf32>
    %cst_9 = arith.constant dense<0.000000e+00> : vector<16x1xf32>
    %14 = vector.multi_reduction <add>, %13, %cst_9 [0] : vector<4x16x1xf32> to vector<16x1xf32>
    %15 = vector.shape_cast %14 : vector<16x1xf32> to vector<1x16x1xf32>
    %cst_10 = arith.constant 7.812500e-03 : f32
    %16 = vector.broadcast %cst_10 : f32 to vector<1x16x1xf32>
    %17 = arith.mulf %15, %16 : vector<1x16x1xf32>
    %cst_11 = arith.constant 9.99999974E-6 : f32
    %18 = vector.broadcast %cst_11 : f32 to vector<1x16x1xf32>
    %19 = arith.addf %17, %18 : vector<1x16x1xf32>
    %20 = math.rsqrt %19 : vector<1x16x1xf32>
    %c0_12 = arith.constant 0 : index
    %c0_13 = arith.constant 0 : index
    %c0_14 = arith.constant 0 : index
    %21 = vector.load %arg2[%c0_12, %c0_13, %c0_14] : memref<1x16x1xf32, #tpu.memory_space<vmem>>, vector<1x16x1xf32>
    %22 = arith.mulf %20, %21 : vector<1x16x1xf32>
    %23 = vector.broadcast %22 : vector<1x16x1xf32> to vector<4x16x32xf32>
    %24 = arith.mulf %10, %23 : vector<4x16x32xf32>
    %c0_15 = arith.constant 0 : index
    %c0_16 = arith.constant 0 : index
    %c0_17 = arith.constant 0 : index
    %25 = vector.load %arg3[%c0_15, %c0_16, %c0_17] : memref<1x16x1xf32, #tpu.memory_space<vmem>>, vector<1x16x1xf32>
    %26 = vector.broadcast %25 : vector<1x16x1xf32> to vector<4x16x32xf32>
    %27 = arith.addf %24, %26 : vector<4x16x32xf32>
    %cst_18 = arith.constant 0.000000e+00 : f32
    %28 = vector.broadcast %cst_18 : f32 to vector<4x16x32xf32>
    %29 = arith.maximumf %27, %28 : vector<4x16x32xf32>
    %30 = arith.truncf %29 : vector<4x16x32xf32> to vector<4x16x32xbf16>
    %c0_19 = arith.constant 0 : index
    %c0_20 = arith.constant 0 : index
    %c0_21 = arith.constant 0 : index
    %31 = vector.load %arg4[%c0_19, %c0_20, %c0_21] : memref<4x16x32xbf16, #tpu.memory_space<vmem>>, vector<4x16x32xbf16>
    tpu.vector_store %arg4[%c0_19, %c0_20, %c0_21], %30 {strides = array<i32>} : memref<4x16x32xbf16, #tpu.memory_space<vmem>>, vector<4x16x32xbf16>,
    return
  }
}

module attributes {stable_mosaic.version = 11 : i64} {
  func.func @_deconv_bn_relu_kernel(%arg0: memref<4x64x128xbf16, #tpu.memory_space<vmem>>, %arg1: memref<4x8x64xbf16, #tpu.memory_space<vmem>>, %arg2: memref<1x8x1xf32, #tpu.memory_space<vmem>>, %arg3: memref<1x8x1xf32, #tpu.memory_space<vmem>>, %arg4: memref<4x8x128xbf16, #tpu.memory_space<vmem>>) attributes {dimension_semantics = [], scalar_prefetch = 0 : i64, scratch_operands = 0 : i64, tpu.core_type = #tpu.core_type<tc>} {
    %c0 = arith.constant 0 : index
    %c0_0 = arith.constant 0 : index
    %c0_1 = arith.constant 0 : index
    %0 = vector.load %arg0[%c0, %c0_0, %c0_1] : memref<4x64x128xbf16, #tpu.memory_space<vmem>>, vector<4x64x128xbf16>
    %c0_2 = arith.constant 0 : index
    %c0_3 = arith.constant 0 : index
    %c0_4 = arith.constant 0 : index
    %1 = vector.load %arg1[%c0_2, %c0_3, %c0_4] : memref<4x8x64xbf16, #tpu.memory_space<vmem>>, vector<4x8x64xbf16>
    "tpu.trace_start"() <{level = 10 : i32, message = "gck,gkm->gcm"}> : () -> ()
    %cst = arith.constant dense<0.000000e+00> : vector<4x8x128xf32>
    %2 = tpu.matmul %1, %0, %cst {dimension_numbers = #tpu.dot_dimension_numbers<[2], [1], [1], [2], [0, 0, 0, 1, 1, 2], [0], [0]>} : vector<4x8x64xbf16>, vector<4x64x128xbf16>, vector<4x8x128xf32> -> vector<4x8x128xf32>
    "tpu.trace_stop"() : () -> ()
    %cst_5 = arith.constant dense<0.000000e+00> : vector<4x8xf32>
    %3 = vector.multi_reduction <add>, %2, %cst_5 [2] : vector<4x8x128xf32> to vector<4x8xf32>
    %4 = vector.shape_cast %3 : vector<4x8xf32> to vector<4x8x1xf32>
    %cst_6 = arith.constant dense<0.000000e+00> : vector<8x1xf32>
    %5 = vector.multi_reduction <add>, %4, %cst_6 [0] : vector<4x8x1xf32> to vector<8x1xf32>
    %6 = vector.shape_cast %5 : vector<8x1xf32> to vector<1x8x1xf32>
    %cst_7 = arith.constant 0.001953125 : f32
    %7 = vector.broadcast %cst_7 : f32 to vector<1x8x1xf32>
    %8 = arith.mulf %6, %7 : vector<1x8x1xf32>
    %9 = vector.broadcast %8 : vector<1x8x1xf32> to vector<4x8x128xf32>
    %10 = arith.subf %2, %9 : vector<4x8x128xf32>
    %11 = arith.mulf %10, %10 : vector<4x8x128xf32>
    %cst_8 = arith.constant dense<0.000000e+00> : vector<4x8xf32>
    %12 = vector.multi_reduction <add>, %11, %cst_8 [2] : vector<4x8x128xf32> to vector<4x8xf32>
    %13 = vector.shape_cast %12 : vector<4x8xf32> to vector<4x8x1xf32>
    %cst_9 = arith.constant dense<0.000000e+00> : vector<8x1xf32>
    %14 = vector.multi_reduction <add>, %13, %cst_9 [0] : vector<4x8x1xf32> to vector<8x1xf32>
    %15 = vector.shape_cast %14 : vector<8x1xf32> to vector<1x8x1xf32>
    %cst_10 = arith.constant 0.001953125 : f32
    %16 = vector.broadcast %cst_10 : f32 to vector<1x8x1xf32>
    %17 = arith.mulf %15, %16 : vector<1x8x1xf32>
    %cst_11 = arith.constant 9.99999974E-6 : f32
    %18 = vector.broadcast %cst_11 : f32 to vector<1x8x1xf32>
    %19 = arith.addf %17, %18 : vector<1x8x1xf32>
    %20 = math.rsqrt %19 : vector<1x8x1xf32>
    %c0_12 = arith.constant 0 : index
    %c0_13 = arith.constant 0 : index
    %c0_14 = arith.constant 0 : index
    %21 = vector.load %arg2[%c0_12, %c0_13, %c0_14] : memref<1x8x1xf32, #tpu.memory_space<vmem>>, vector<1x8x1xf32>
    %22 = arith.mulf %20, %21 : vector<1x8x1xf32>
    %23 = vector.broadcast %22 : vector<1x8x1xf32> to vector<4x8x128xf32>
    %24 = arith.mulf %10, %23 : vector<4x8x128xf32>
    %c0_15 = arith.constant 0 : index
    %c0_16 = arith.constant 0 : index
    %c0_17 = arith.constant 0 : index
    %25 = vector.load %arg3[%c0_15, %c0_16, %c0_17] : memref<1x8x1xf32, #tpu.memory_space<vmem>>, vector<1x8x1xf32>
    %26 = vector.broadcast %25 : vector<1x8x1xf32> to vector<4x8x128xf32>
    %27 = arith.addf %24, %26 : vector<4x8x128xf32>
    %cst_18 = arith.constant 0.000000e+00 : f32
    %28 = vector.broadcast %cst_18 : f32 to vector<4x8x128xf32>
    %29 = arith.maximumf %27, %28 : vector<4x8x128xf32>
    %30 = arith.truncf %29 : vector<4x8x128xf32> to vector<4x8x128xbf16>
    %c0_19 = arith.constant 0 : index
    %c0_20 = arith.constant 0 : index
    %c0_21 = arith.constant 0 : index
    %31 = vector.load %arg4[%c0_19, %c0_20, %c0_21] : memref<4x8x128xbf16, #tpu.memory_space<vmem>>, vector<4x8x128xbf16>
    tpu.vector_store %arg4[%c0_19, %c0_20, %c0_21], %30 {strides = array<i32>} : memref<4x8x128xbf16, #tpu.memory_space<vmem>>, vector<4x8x128xbf16>,
    return
  }
}

module attributes {stable_mosaic.version = 11 : i64} {
  func.func @_deconv_tanh_kernel(%arg0: i32, %arg1: memref<4x32x256xbf16, #tpu.memory_space<vmem>>, %arg2: memref<4x3x32xbf16, #tpu.memory_space<vmem>>, %arg3: memref<4x3x256xf32, #tpu.memory_space<vmem>>) attributes {dimension_semantics = [#tpu.dimension_semantics<parallel>], iteration_bounds = array<i64: 2>, scalar_prefetch = 0 : i64, scratch_operands = 0 : i64, tpu.core_type = #tpu.core_type<tc>, window_params = [{transform_indices = @transform_0, window_bounds = array<i64: 4, 32, 256>}, {pipeline_mode = #tpu.pipeline_mode<synchronous>, transform_indices = @transform_1, window_bounds = array<i64: 4, 3, 32>}, {transform_indices = @transform_2, window_bounds = array<i64: 4, 3, 256>}]} {
    %c0 = arith.constant 0 : index
    %c0_0 = arith.constant 0 : index
    %c0_1 = arith.constant 0 : index
    %0 = vector.load %arg2[%c0, %c0_0, %c0_1] : memref<4x3x32xbf16, #tpu.memory_space<vmem>>, vector<4x3x32xbf16>
    %c0_2 = arith.constant 0 : index
    %c0_3 = arith.constant 0 : index
    %c0_4 = arith.constant 0 : index
    %1 = vector.load %arg1[%c0_2, %c0_3, %c0_4] : memref<4x32x256xbf16, #tpu.memory_space<vmem>>, vector<4x32x256xbf16>
    "tpu.trace_start"() <{level = 10 : i32, message = "gck,gkm->gcm"}> : () -> ()
    %cst = arith.constant dense<0.000000e+00> : vector<4x3x256xf32>
    %2 = tpu.matmul %0, %1, %cst {dimension_numbers = #tpu.dot_dimension_numbers<[2], [1], [1], [2], [0, 0, 0, 1, 1, 2], [0], [0]>} : vector<4x3x32xbf16>, vector<4x32x256xbf16>, vector<4x3x256xf32> -> vector<4x3x256xf32>
    "tpu.trace_stop"() : () -> ()
    %3 = math.tanh %2 : vector<4x3x256xf32>
    %c0_5 = arith.constant 0 : index
    %c0_6 = arith.constant 0 : index
    %c0_7 = arith.constant 0 : index
    %4 = vector.load %arg3[%c0_5, %c0_6, %c0_7] : memref<4x3x256xf32, #tpu.memory_space<vmem>>, vector<4x3x256xf32>
    tpu.vector_store %arg3[%c0_5, %c0_6, %c0_7], %3 {strides = array<i32>} : memref<4x3x256xf32, #tpu.memory_space<vmem>>, vector<4x3x256xf32>,
    return
  }
  func.func @transform_0(%arg0: i32) -> (i32, i32, i32) {
    %c0_i32 = arith.constant 0 : i32
    %c0_i32_0 = arith.constant 0 : i32
    %c0_i32_1 = arith.constant 0 : i32
    return %c0_i32, %c0_i32_0, %arg0 : i32, i32, i32
  }
  func.func @transform_1(%arg0: i32) -> (i32, i32, i32) {
    %c0_i32 = arith.constant 0 : i32
    %c0_i32_0 = arith.constant 0 : i32
    %c0_i32_1 = arith.constant 0 : i32
    %c0_i32_2 = arith.constant 0 : i32
    return %c0_i32, %c0_i32_0, %c0_i32_1 : i32, i32, i32
  }
  func.func @transform_2(%arg0: i32) -> (i32, i32, i32) {
    %c0_i32 = arith.constant 0 : i32
    %c0_i32_0 = arith.constant 0 : i32
    %c0_i32_1 = arith.constant 0 : i32
    return %c0_i32, %c0_i32_0, %arg0 : i32, i32, i32
  }
}

</mosaic_0001>

<bundles_post_ra>
// kernel: generator_forward.4
= control target key start
LH: loop header
LB: loop body
LE: loop exit
PB: predicated region body
PF: predicated region fallthrough
CT: control target
= control target key end

     0   :  { %vm100_vm0 = vcmask 130048   ;;  %vm1131_vm1 = vcmask 15360   ;;  %vm2280_vm2 = vcmask 11264   ;;  %s4067_s0 = inlined_call_operand.vmem [shape: bf16[1,16,2], index: 0, kind: input, shape index: {}]   ;;  %s4068_s1 = inlined_call_operand.vmem [shape: bf16[16,32,16], index: 1, kind: input, shape index: {}]   ;;  %s4069_s2 = inlined_call_operand.vmem [shape: f32[1,32,1], index: 2, kind: input, shape index: {}]   ;;  %s4070_s3 = inlined_call_operand.vmem [shape: f32[1,32,1], index: 3, kind: input, shape index: {}]   ;;  %s4071_s4 = inlined_call_operand.vmem [shape: bf16[16,32,2], index: 4, kind: output, shape index: {}]  }
   0x1   :  { %v2759_v0 = vld [vmem:[%s4067_s0] sm:$0xff]   ;;  %v2691_v2 = vld [vmem:[%s4068_s1 + $0x10] sm:$0xff]   ;;  %v2692_v3 = vld [vmem:[%s4068_s1 + $0x8] sm:$0xff]  }
   0x2   :  { %v2690_v1 = vld [vmem:[%s4068_s1] sm:$0xff]   ;;  %2590 = vmatprep.subr.bf16.mxu0 %v2759_v0  ;;  %2596 = vmatprep.subr.bf16.mxu1 %v2759_v0  ;;  %v2693_v4 = vld [vmem:[%s4068_s1 + $0x18] sm:$0xff]   ;;  %v2696_v6 = vld [vmem:[%s4068_s1 + $0x30] sm:$0xff]  }
   0x3   :  { %2591 = vmatpush3.bf16.msra.mxu0 %v2759_v0  ;;  %2597 = vmatpush3.bf16.msra.mxu1 %v2759_v0  ;;  %v2694_v5 = vld [vmem:[%s4068_s1 + $0x20] sm:$0xff]   ;;  %v2695_v7 = vld [vmem:[%s4068_s1 + $0x28] sm:$0xff]   ;;  %v2697_v8 = vld [vmem:[%s4068_s1 + $0x38] sm:$0xff]  }
   0x4   :  { %2592 = vmatprep.mubr.msk.bf16.mxu0 %vm100_vm0, %v2690_v1  ;;  %2598 = vmatprep.mubr.msk.bf16.mxu1 %vm100_vm0, %v2691_v2  ;;  %v2698_v9 = vld [vmem:[%s4068_s1 + $0x40] sm:$0xff]   ;;  %v2700_v10 = vld [vmem:[%s4068_s1 + $0x50] sm:$0xff]   ;;  %v2699_v11 = vld [vmem:[%s4068_s1 + $0x48] sm:$0xff]  }
   0x5   :  { %2602 = vmatprep.subr.bf16.mxu0 %v2759_v0  ;;  %2608 = vmatprep.subr.bf16.mxu1 %v2759_v0  ;;  %v2701_v12 = vld [vmem:[%s4068_s1 + $0x58] sm:$0xff]   ;;  %v2702_v13 = vld [vmem:[%s4068_s1 + $0x60] sm:$0xff]   ;;  %v2704_v14 = vld [vmem:[%s4068_s1 + $0x70] sm:$0xff]  }
   0x6   :  { %2593 = vmatmul.mubr.msk.bf16.vlgmr.msra.gmra.mrb[0].mxu0 %vm100_vm0, %v2692_v3  ;;  %2599 = vmatmul.mubr.msk.bf16.vlgmr.msra.gmra.mrb[0].mxu1 %vm100_vm0, %v2693_v4  ;;  %v2703_v15 = vld [vmem:[%s4068_s1 + $0x68] sm:$0xff]   ;;  %v2705_v16 = vld [vmem:[%s4068_s1 + $0x78] sm:$0xff]   ;;  %v2706_v17 = vld [vmem:[%s4068_s1 + $0x80] sm:$0xff]  }
   0x7   :  { %2603 = vmatpush3.bf16.msra.mxu0 %v2759_v0  ;;  %2604 = vmatprep.mubr.msk.bf16.mxu0 %vm100_vm0, %v2694_v5  ;;  %v2708_v18 = vld [vmem:[%s4068_s1 + $0x90] sm:$0xff]   ;;  %v2707_v19 = vld [vmem:[%s4068_s1 + $0x88] sm:$0xff]   ;;  %v2709_v20 = vld [vmem:[%s4068_s1 + $0x98] sm:$0xff]  }
   0x8   :  { %2609 = vmatpush3.bf16.msra.mxu1 %v2759_v0  ;;  %2614 = vmatprep.subr.bf16.mxu0 %v2759_v0  ;;  %v2710_v21 = vld [vmem:[%s4068_s1 + $0xa0] sm:$0xff]   ;;  %v2712_v22 = vld [vmem:[%s4068_s1 + $0xb0] sm:$0xff]   ;;  %v2711_v23 = vld [vmem:[%s4068_s1 + $0xa8] sm:$0xff]  }
   0x9   :  { %2610 = vmatprep.mubr.msk.bf16.mxu1 %vm100_vm0, %v2696_v6  ;;  %2620 = vmatprep.subr.bf16.mxu1 %v2759_v0  ;;  %v2713_v24 = vld [vmem:[%s4068_s1 + $0xb8] sm:$0xff]   ;;  %v2714_v25 = vld [vmem:[%s4068_s1 + $0xc0] sm:$0xff]   ;;  %v2716_v26 = vld [vmem:[%s4068_s1 + $0xd0] sm:$0xff]  }
   0xa   :  { %v2715_v27 = vld [vmem:[%s4068_s1 + $0xc8] sm:$0xff]   ;;  %v2717_v28 = vld [vmem:[%s4068_s1 + $0xd8] sm:$0xff]   ;;  %v2718_v29 = vld [vmem:[%s4068_s1 + $0xe0] sm:$0xff]  }
   0xb   :  { %v2720_v30 = vld [vmem:[%s4068_s1 + $0xf0] sm:$0xff]   ;;  %v2719_v31 = vld [vmem:[%s4068_s1 + $0xe8] sm:$0xff]   ;;  %v2721_v32 = vld [vmem:[%s4068_s1 + $0xf8] sm:$0xff]  }
   0xe   :  { %2605 = vmatmul.mubr.msk.bf16.vlgmr.msra.gmra.mrb[4].mxu0 %vm100_vm0, %v2695_v7  ;;  %2611 = vmatmul.mubr.msk.bf16.vlgmr.msra.gmra.mrb[4].mxu1 %vm100_vm0, %v2697_v8 }
   0xf   :  { %2615 = vmatpush3.bf16.msra.mxu0 %v2759_v0  ;;  %2616 = vmatprep.mubr.msk.bf16.mxu0 %vm100_vm0, %v2698_v9 }
  0x10   :  { %2621 = vmatpush3.bf16.msra.mxu1 %v2759_v0  ;;  %2622 = vmatprep.mubr.msk.bf16.mxu1 %vm100_vm0, %v2700_v10 }
  0x11   :  { %2626 = vmatprep.subr.bf16.mxu0 %v2759_v0  ;;  %2632 = vmatprep.subr.bf16.mxu1 %v2759_v0 }
  0x16   :  { %2617 = vmatmul.mubr.msk.bf16.vlgmr.msra.gmra.mrb[8].mxu0 %vm100_vm0, %v2699_v11  ;;  %2623 = vmatmul.mubr.msk.bf16.vlgmr.msra.gmra.mrb[8].mxu1 %vm100_vm0, %v2701_v12 }
  0x17   :  { %2627 = vmatpush3.bf16.msra.mxu0 %v2759_v0  ;;  %2628 = vmatprep.mubr.msk.bf16.mxu0 %vm100_vm0, %v2702_v13 }
  0x18   :  { %2633 = vmatpush3.bf16.msra.mxu1 %v2759_v0  ;;  %2634 = vmatprep.mubr.msk.bf16.mxu1 %vm100_vm0, %v2704_v14 }
  0x19   :  { %2638 = vmatprep.subr.bf16.mxu0 %v2759_v0  ;;  %2644 = vmatprep.subr.bf16.mxu1 %v2759_v0 }
  0x1e   :  { %2629 = vmatmul.mubr.msk.bf16.vlgmr.msra.gmra.mrb[12].mxu0 %vm100_vm0, %v2703_v15  ;;  %2635 = vmatmul.mubr.msk.bf16.vlgmr.msra.gmra.mrb[12].mxu1 %vm100_vm0, %v2705_v16 }
  0x1f   :  { %2639 = vmatpush3.bf16.msra.mxu0 %v2759_v0  ;;  %2640 = vmatprep.mubr.msk.bf16.mxu0 %vm100_vm0, %v2706_v17 }
  0x20   :  { %2645 = vmatpush3.bf16.msra.mxu1 %v2759_v0  ;;  %2646 = vmatprep.mubr.msk.bf16.mxu1 %vm100_vm0, %v2708_v18 }
  0x21   :  { %2650 = vmatprep.subr.bf16.mxu0 %v2759_v0  ;;  %2656 = vmatprep.subr.bf16.mxu1 %v2759_v0 }
  0x26   :  { %2641 = vmatmul.mubr.msk.bf16.vlgmr.msra.gmra.mrb[16].mxu0 %vm100_vm0, %v2707_v19  ;;  %2647 = vmatmul.mubr.msk.bf16.vlgmr.msra.gmra.mrb[16].mxu1 %vm100_vm0, %v2709_v20 }
  0x27   :  { %2651 = vmatpush3.bf16.msra.mxu0 %v2759_v0  ;;  %2652 = vmatprep.mubr.msk.bf16.mxu0 %vm100_vm0, %v2710_v21 }
  0x28   :  { %2657 = vmatpush3.bf16.msra.mxu1 %v2759_v0  ;;  %2658 = vmatprep.mubr.msk.bf16.mxu1 %vm100_vm0, %v2712_v22 }
  0x29   :  { %2662 = vmatprep.subr.bf16.mxu0 %v2759_v0  ;;  %2668 = vmatprep.subr.bf16.mxu1 %v2759_v0 }
  0x2e   :  { %2653 = vmatmul.mubr.msk.bf16.vlgmr.msra.gmra.mrb[20].mxu0 %vm100_vm0, %v2711_v23  ;;  %2659 = vmatmul.mubr.msk.bf16.vlgmr.msra.gmra.mrb[20].mxu1 %vm100_vm0, %v2713_v24 }
  0x2f   :  { %2663 = vmatpush3.bf16.msra.mxu0 %v2759_v0  ;;  %2664 = vmatprep.mubr.msk.bf16.mxu0 %vm100_vm0, %v2714_v25 }
  0x30   :  { %2669 = vmatpush3.bf16.msra.mxu1 %v2759_v0  ;;  %2670 = vmatprep.mubr.msk.bf16.mxu1 %vm100_vm0, %v2716_v26 }
  0x31   :  { %2674 = vmatprep.subr.bf16.mxu0 %v2759_v0  ;;  %2680 = vmatprep.subr.bf16.mxu1 %v2759_v0 }
  0x36   :  { %2665 = vmatmul.mubr.msk.bf16.vlgmr.msra.gmra.mrb[24].mxu0 %vm100_vm0, %v2715_v27  ;;  %2671 = vmatmul.mubr.msk.bf16.vlgmr.msra.gmra.mrb[24].mxu1 %vm100_vm0, %v2717_v28 }
  0x37   :  { %2675 = vmatpush3.bf16.msra.mxu0 %v2759_v0  ;;  %2676 = vmatprep.mubr.msk.bf16.mxu0 %vm100_vm0, %v2718_v29 }
  0x38   :  { %2681 = vmatpush3.bf16.msra.mxu1 %v2759_v0  ;;  %2682 = vmatprep.mubr.msk.bf16.mxu1 %vm100_vm0, %v2720_v30 }
  0x3e   :  { %2677 = vmatmul.mubr.msk.bf16.vlgmr.msra.gmra.mrb[28].mxu0 %vm100_vm0, %v2719_v31  ;;  %2683 = vmatmul.mubr.msk.bf16.vlgmr.msra.gmra.mrb[28].mxu1 %vm100_vm0, %v2721_v32 }
  0xd9   :  { %v2921_v33 = vpop.f32.mrb[0].mxu0  ;;  %v2923_v34 = vpop.f32.mrb[0].mxu1 }
  0xda   :  { %v2925_v35 = vpop.f32.mrb[1].mxu0  ;;  %v2927_v36 = vpop.f32.mrb[1].mxu1  ;;  %v1150_v37 = vsel %vm1131_vm1, %v2923_v34, 0.0  ;;  %v1138_v38 = vsel %vm1131_vm1, %v2921_v33, 0.0 }
  0xdb   :  { %4164 = vst [vmem:[#allocation2_spill] sm:$0xff] %v2925_v35  ;;  %4165 = vst [vmem:[#allocation3_spill] sm:$0xff] %v2927_v36  ;;  %1151 = vadd.xlane.f32.xlu0 %v1150_v37  ;;  %v2933_v39 = vpop.f32.mrb[2].mxu1  ;;  %1139 = vadd.xlane.f32.xlu1 %v1138_v38  ;;  %v2935_v40 = vpop.f32.mrb[2].mxu0  ;;  %v1132_v43 = vsel %vm1131_vm1, %v2925_v35, 0.0  ;;  %v1144_v47 = vsel %vm1131_vm1, %v2927_v36, 0.0 }
  0xdc   :  { %v2937_v41 = vpop.f32.mrb[3].mxu0  ;;  %v2939_v42 = vpop.f32.mrb[3].mxu1  ;;  %v1141_v44 = vsel %vm1131_vm1, %v2935_v40, 0.0  ;;  %v1153_v48 = vsel %vm1131_vm1, %v2933_v39, 0.0 }
  0xdd   :  { %4166 = vst [vmem:[#allocation4_spill] sm:$0xff] %v2937_v41  ;;  %4167 = vst [vmem:[#allocation5_spill] sm:$0xff] %v2939_v42  ;;  %v1147_v55 = vsel %vm1131_vm1, %v2939_v42, 0.0  ;;  %v1135_v56 = vsel %vm1131_vm1, %v2937_v41, 0.0 }
  0xdf   :  { %1133 = vadd.xlane.f32.xlu0 %v1132_v43  ;;  %1142 = vadd.xlane.f32.xlu1 %v1141_v44 }
  0xe1   :  { %v2945_v45 = vpop.f32.mrb[4].mxu0  ;;  %v2947_v46 = vpop.f32.mrb[4].mxu1 }
  0xe2   :  { %v2953_v49 = vpop.f32.mrb[5].mxu0  ;;  %v2955_v50 = vpop.f32.mrb[5].mxu1  ;;  %v1162_v57 = vsel %vm1131_vm1, %v2945_v45, 0.0  ;;  %v1174_v1 = vsel %vm1131_vm1, %v2947_v46, 0.0 }
  0xe3   :  { %4168 = vst [vmem:[#allocation6_spill] sm:$0xff] %v2953_v49  ;;  %4169 = vst [vmem:[#allocation7_spill] sm:$0xff] %v2955_v50  ;;  %1145 = vadd.xlane.f32.xlu0 %v1144_v47  ;;  %1154 = vadd.xlane.f32.xlu1 %v1153_v48  ;;  %v2957_v51 = vpop.f32.mrb[6].mxu0  ;;  %v2959_v52 = vpop.f32.mrb[6].mxu1  ;;  %v1156_v7 = vsel %vm1131_vm1, %v2953_v49, 0.0  ;;  %v1168_v15 = vsel %vm1131_vm1, %v2955_v50, 0.0 }
  0xe4   :  { %v2961_v53 = vpop.f32.mrb[7].mxu0  ;;  %v2963_v54 = vpop.f32.mrb[7].mxu1  ;;  %v1165_v58 = vsel %vm1131_vm1, %v2957_v51, 0.0  ;;  %v1177_v2 = vsel %vm1131_vm1, %v2959_v52, 0.0 }
  0xe5   :  { %4170 = vst [vmem:[#allocation8_spill] sm:$0xff] %v2961_v53  ;;  %4171 = vst [vmem:[#allocation9_spill] sm:$0xff] %v2963_v54  ;;  %v1159_v8 = vsel %vm1131_vm1, %v2961_v53, 0.0  ;;  %v1171_v16 = vsel %vm1131_vm1, %v2963_v54, 0.0 }
  0xe7   :  { %1148 = vadd.xlane.f32.xlu1 %v1147_v55  ;;  %1136 = vadd.xlane.f32.xlu0 %v1135_v56 }
  0xe9   :  { %v2973_v59 = vpop.f32.mrb[8].mxu0  ;;  %v2975_v60 = vpop.f32.mrb[8].mxu1 }
  0xea   :  { %v2977_v61 = vpop.f32.mrb[9].mxu0  ;;  %v2979_v62 = vpop.f32.mrb[9].mxu1  ;;  %v1186_v17 = vsel %vm1131_vm1, %v2973_v59, 0.0  ;;  %v1198_v25 = vsel %vm1131_vm1, %v2975_v60, 0.0 }
  0xeb   :  { %4172 = vst [vmem:[#allocation10_spill] sm:$0xff] %v2977_v61  ;;  %4173 = vst [vmem:[#allocation11_spill] sm:$0xff] %v2979_v62  ;;  %1163 = vadd.xlane.f32.xlu0 %v1162_v57  ;;  %1166 = vadd.xlane.f32.xlu1 %v1165_v58  ;;  %v2981_v63 = vpop.f32.mrb[10].mxu0  ;;  %v2983_v0 = vpop.f32.mrb[10].mxu1  ;;  %v1180_v31 = vsel %vm1131_vm1, %v2977_v61, 0.0  ;;  %v1192_v55 = vsel %vm1131_vm1, %v2979_v62, 0.0 }
  0xec   :  { %v2989_v3 = vpop.f32.mrb[11].mxu0  ;;  %v2991_v4 = vpop.f32.mrb[11].mxu1  ;;  %v1189_v18 = vsel %vm1131_vm1, %v2981_v63, 0.0  ;;  %v1201_v26 = vsel %vm1131_vm1, %v2983_v0, 0.0 }
  0xed   :  { %4174 = vst [vmem:[#allocation12_spill] sm:$0xff] %v2989_v3  ;;  %4175 = vst [vmem:[#allocation13_spill] sm:$0xff] %v2991_v4  ;;  %v1183_v32 = vsel %vm1131_vm1, %v2989_v3, 0.0  ;;  %v1195_v56 = vsel %vm1131_vm1, %v2991_v4, 0.0 }
  0xef   :  { %1175 = vadd.xlane.f32.xlu0 %v1174_v1  ;;  %1178 = vadd.xlane.f32.xlu1 %v1177_v2 }
  0xf1   :  { %v2993_v5 = vpop.f32.mrb[12].mxu0  ;;  %v2995_v6 = vpop.f32.mrb[12].mxu1 }
  0xf2   :  { %4176 = vst [vmem:[#allocation14_spill] sm:$0xff] %v2993_v5  ;;  %4177 = vst [vmem:[#allocation15_spill] sm:$0xff] %v2995_v6  ;;  %v3001_v9 = vpop.f32.mrb[13].mxu0  ;;  %v3003_v10 = vpop.f32.mrb[13].mxu1  ;;  %v1210_v57 = vsel %vm1131_vm1, %v2993_v5, 0.0 }
  0xf3   :  { %4178 = vst [vmem:[#allocation16_spill] sm:$0xff] %v3001_v9  ;;  %4179 = vst [vmem:[#allocation17_spill] sm:$0xff] %v3003_v10  ;;  %1157 = vadd.xlane.f32.xlu0 %v1156_v7  ;;  %1160 = vadd.xlane.f32.xlu1 %v1159_v8  ;;  %v3005_v11 = vpop.f32.mrb[14].mxu0  ;;  %v3007_v12 = vpop.f32.mrb[14].mxu1 }
  0xf4   :  { %4180 = vst [vmem:[#allocation18_spill] sm:$0xff] %v3005_v11  ;;  %4181 = vst [vmem:[#allocation19_spill] sm:$0xff] %v3007_v12  ;;  %v3009_v13 = vpop.f32.mrb[15].mxu0  ;;  %v3011_v14 = vpop.f32.mrb[15].mxu1  ;;  %v1213_v58 = vsel %vm1131_vm1, %v3005_v11, 0.0 }
  0xf5   :  { %4182 = vst [vmem:[#allocation20_spill] sm:$0xff] %v3009_v13  ;;  %4183 = vst [vmem:[#allocation21_spill] sm:$0xff] %v3011_v14 }
  0xf7   :  { %1169 = vadd.xlane.f32.xlu0 %v1168_v15  ;;  %1172 = vadd.xlane.f32.xlu1 %v1171_v16 }
  0xf9   :  { %v3021_v19 = vpop.f32.mrb[16].mxu0  ;;  %v3023_v20 = vpop.f32.mrb[16].mxu1 }
  0xfa   :  { %4184 = vst [vmem:[#allocation22_spill] sm:$0xff] %v3021_v19  ;;  %4185 = vst [vmem:[#allocation23_spill] sm:$0xff] %v3023_v20  ;;  %v3025_v21 = vpop.f32.mrb[17].mxu0  ;;  %v3027_v22 = vpop.f32.mrb[17].mxu1  ;;  %v1246_v3 = vsel %vm1131_vm1, %v3023_v20, 0.0 }
  0xfb   :  { %4186 = vst [vmem:[#allocation24_spill] sm:$0xff] %v3025_v21  ;;  %4187 = vst [vmem:[#allocation25_spill] sm:$0xff] %v3027_v22  ;;  %1187 = vadd.xlane.f32.xlu0 %v1186_v17  ;;  %1190 = vadd.xlane.f32.xlu1 %v1189_v18  ;;  %v3029_v23 = vpop.f32.mrb[18].mxu0  ;;  %v3031_v24 = vpop.f32.mrb[18].mxu1  ;;  %v1222_v17 = vsel %vm1131_vm1, %v2995_v6, 0.0  ;;  %v1225_v18 = vsel %vm1131_vm1, %v3007_v12, 0.0 }
  0xfc   :  { %4188 = vst [vmem:[#allocation26_spill] sm:$0xff] %v3029_v23  ;;  %4189 = vst [vmem:[#allocation27_spill] sm:$0xff] %v3031_v24  ;;  %v3037_v27 = vpop.f32.mrb[19].mxu0  ;;  %v3039_v28 = vpop.f32.mrb[19].mxu1  ;;  %v1249_v61 = vsel %vm1131_vm1, %v3031_v24, 0.0 }
  0xfd   :  { %4190 = vst [vmem:[#allocation28_spill] sm:$0xff] %v3037_v27  ;;  %4191 = vst [vmem:[#allocation29_spill] sm:$0xff] %v3039_v28 }
  0xff   :  { %1199 = vadd.xlane.f32.xlu0 %v1198_v25  ;;  %1202 = vadd.xlane.f32.xlu1 %v1201_v26 }
 0x101   :  { %v3041_v29 = vpop.f32.mrb[20].mxu0  ;;  %v3043_v30 = vpop.f32.mrb[20].mxu1 }
 0x102   :  { %4192 = vst [vmem:[#allocation30_spill] sm:$0xff] %v3041_v29  ;;  %4193 = vst [vmem:[#allocation31_spill] sm:$0xff] %v3043_v30  ;;  %v3049_v37 = vpop.f32.mrb[21].mxu0  ;;  %v3051_v38 = vpop.f32.mrb[21].mxu1 }
 0x103   :  { %4194 = vst [vmem:[#allocation32_spill] sm:$0xff] %v3049_v37  ;;  %4195 = vst [vmem:[#allocation33_spill] sm:$0xff] %v3051_v38  ;;  %1181 = vadd.xlane.f32.xlu0 %v1180_v31  ;;  %1184 = vadd.xlane.f32.xlu1 %v1183_v32  ;;  %v3053_v43 = vpop.f32.mrb[22].mxu0  ;;  %v3055_v44 = vpop.f32.mrb[22].mxu1 }
 0x104   :  { %4196 = vst [vmem:[#allocation34_spill] sm:$0xff] %v3053_v43  ;;  %4197 = vst [vmem:[#allocation35_spill] sm:$0xff] %v3055_v44  ;;  %v3057_v47 = vpop.f32.mrb[23].mxu0  ;;  %v3059_v48 = vpop.f32.mrb[23].mxu1 }
 0x105   :  { %4198 = vst [vmem:[#allocation36_spill] sm:$0xff] %v3057_v47  ;;  %4199 = vst [vmem:[#allocation37_spill] sm:$0xff] %v3059_v48 }
 0x107   :  { %1193 = vadd.xlane.f32.xlu0 %v1192_v55  ;;  %1196 = vadd.xlane.f32.xlu1 %v1195_v56  ;;  %v1204_v55 = vsel %vm1131_vm1, %v3001_v9, 0.0  ;;  %v1207_v56 = vsel %vm1131_vm1, %v3009_v13, 0.0  ;;  %v1216_v9 = vsel %vm1131_vm1, %v3003_v10, 0.0  ;;  %v1219_v13 = vsel %vm1131_vm1, %v3011_v14, 0.0 }
 0x109   :  { %v3069_v1 = vpop.f32.mrb[24].mxu0  ;;  %v3071_v2 = vpop.f32.mrb[24].mxu1 }
 0x10a   :  { %4200 = vst [vmem:[#allocation38_spill] sm:$0xff] %v3069_v1  ;;  %4201 = vst [vmem:[#allocation39_spill] sm:$0xff] %v3071_v2  ;;  %v3073_v7 = vpop.f32.mrb[25].mxu0  ;;  %v3075_v8 = vpop.f32.mrb[25].mxu1 }
 0x10b   :  { %4202 = vst [vmem:[#allocation40_spill] sm:$0xff] %v3073_v7  ;;  %4203 = vst [vmem:[#allocation41_spill] sm:$0xff] %v3075_v8  ;;  %1211 = vadd.xlane.f32.xlu0 %v1210_v57  ;;  %1214 = vadd.xlane.f32.xlu1 %v1213_v58  ;;  %v3077_v15 = vpop.f32.mrb[26].mxu0  ;;  %v3079_v16 = vpop.f32.mrb[26].mxu1 }
 0x10c   :  { %4204 = vst [vmem:[#allocation42_spill] sm:$0xff] %v3077_v15  ;;  %4205 = vst [vmem:[#allocation43_spill] sm:$0xff] %v3079_v16  ;;  %v3085_v25 = vpop.f32.mrb[27].mxu0  ;;  %v3087_v26 = vpop.f32.mrb[27].mxu1 }
 0x10d   :  { %4206 = vst [vmem:[#allocation44_spill] sm:$0xff] %v3085_v25  ;;  %4207 = vst [vmem:[#allocation45_spill] sm:$0xff] %v3087_v26 }
 0x10f   :  { %1223 = vadd.xlane.f32.xlu0 %v1222_v17  ;;  %1226 = vadd.xlane.f32.xlu1 %v1225_v18 }
 0x111   :  { %v3089_v31 = vpop.f32.mrb[28].mxu0  ;;  %v3091_v32 = vpop.f32.mrb[28].mxu1 }
 0x112   :  { %4208 = vst [vmem:[#allocation46_spill] sm:$0xff] %v3089_v31  ;;  %4209 = vst [vmem:[#allocation47_spill] sm:$0xff] %v3091_v32  ;;  %v3097_v57 = vpop.f32.mrb[29].mxu0  ;;  %v3099_v58 = vpop.f32.mrb[29].mxu1 }
 0x113   :  { %4210 = vst [vmem:[#allocation48_spill] sm:$0xff] %v3097_v57  ;;  %4211 = vst [vmem:[#allocation49_spill] sm:$0xff] %v3099_v58  ;;  %1205 = vadd.xlane.f32.xlu0 %v1204_v55  ;;  %1208 = vadd.xlane.f32.xlu1 %v1207_v56  ;;  %v3101_v4 = vpop.f32.mrb[30].mxu0  ;;  %v3103_v17 = vpop.f32.mrb[30].mxu1  ;;  %v1234_v55 = vsel %vm1131_vm1, %v3021_v19, 0.0  ;;  %v1237_v56 = vsel %vm1131_vm1, %v3029_v23, 0.0 }
 0x114   :  { %4212 = vst [vmem:[#allocation50_spill] sm:$0xff] %v3101_v4  ;;  %4213 = vst [vmem:[#allocation51_spill] sm:$0xff] %v3103_v17  ;;  %v3105_v18 = vpop.f32.mrb[31].mxu0  ;;  %v3107_v62 = vpop.f32.mrb[31].mxu1 }
 0x115   :  { %4214 = vst [vmem:[#allocation52_spill] sm:$0xff] %v3105_v18  ;;  %4215 = vst [vmem:[#allocation53_spill] sm:$0xff] %v3107_v62 }
 0x117   :  { %1217 = vadd.xlane.f32.xlu0 %v1216_v9  ;;  %1220 = vadd.xlane.f32.xlu1 %v1219_v13  ;;  %v1228_v9 = vsel %vm1131_vm1, %v3025_v21, 0.0  ;;  %v1231_v13 = vsel %vm1131_vm1, %v3037_v27, 0.0 }
 0x11b   :  { %1235 = vadd.xlane.f32.xlu0 %v1234_v55  ;;  %1238 = vadd.xlane.f32.xlu1 %v1237_v56  ;;  %v1240_v55 = vsel %vm1131_vm1, %v3027_v22, 0.0  ;;  %v1243_v56 = vsel %vm1131_vm1, %v3039_v28, 0.0 }
 0x11f   :  { %1247 = vadd.xlane.f32.xlu0 %v1246_v3  ;;  %1250 = vadd.xlane.f32.xlu1 %v1249_v61  ;;  %v1258_v3 = vsel %vm1131_vm1, %v3041_v29, 0.0  ;;  %v1261_v61 = vsel %vm1131_vm1, %v3053_v43, 0.0 }
 0x123   :  { %1229 = vadd.xlane.f32.xlu0 %v1228_v9  ;;  %1232 = vadd.xlane.f32.xlu1 %v1231_v13  ;;  %v1270_v9 = vsel %vm1131_vm1, %v3043_v30, 0.0  ;;  %v1273_v13 = vsel %vm1131_vm1, %v3055_v44, 0.0 }
 0x127   :  { %1241 = vadd.xlane.f32.xlu0 %v1240_v55  ;;  %1244 = vadd.xlane.f32.xlu1 %v1243_v56  ;;  %v1252_v55 = vsel %vm1131_vm1, %v3049_v37, 0.0  ;;  %v1255_v56 = vsel %vm1131_vm1, %v3057_v47, 0.0 }
 0x12b   :  { %1259 = vadd.xlane.f32.xlu0 %v1258_v3  ;;  %1262 = vadd.xlane.f32.xlu1 %v1261_v61  ;;  %v1264_v3 = vsel %vm1131_vm1, %v3051_v38, 0.0  ;;  %v1267_v61 = vsel %vm1131_vm1, %v3059_v48, 0.0 }
 0x12f   :  { %1271 = vadd.xlane.f32.xlu0 %v1270_v9  ;;  %1274 = vadd.xlane.f32.xlu1 %v1273_v13  ;;  %v1282_v9 = vsel %vm1131_vm1, %v3069_v1, 0.0  ;;  %v1285_v13 = vsel %vm1131_vm1, %v3077_v15, 0.0 }
 0x133   :  { %1253 = vadd.xlane.f32.xlu0 %v1252_v55  ;;  %1256 = vadd.xlane.f32.xlu1 %v1255_v56  ;;  %v1294_v55 = vsel %vm1131_vm1, %v3071_v2, 0.0  ;;  %v1297_v56 = vsel %vm1131_vm1, %v3079_v16, 0.0 }
 0x137   :  { %1265 = vadd.xlane.f32.xlu0 %v1264_v3  ;;  %1268 = vadd.xlane.f32.xlu1 %v1267_v61  ;;  %v1276_v3 = vsel %vm1131_vm1, %v3073_v7, 0.0  ;;  %v1279_v61 = vsel %vm1131_vm1, %v3085_v25, 0.0 }
 0x13b   :  { %1283 = vadd.xlane.f32.xlu0 %v1282_v9  ;;  %1286 = vadd.xlane.f32.xlu1 %v1285_v13  ;;  %v1288_v9 = vsel %vm1131_vm1, %v3075_v8, 0.0  ;;  %v1291_v13 = vsel %vm1131_vm1, %v3087_v26, 0.0 }
 0x13f   :  { %1295 = vadd.xlane.f32.xlu0 %v1294_v55  ;;  %1298 = vadd.xlane.f32.xlu1 %v1297_v56  ;;  %v1306_v55 = vsel %vm1131_vm1, %v3089_v31, 0.0  ;;  %v1309_v56 = vsel %vm1131_vm1, %v3101_v4, 0.0 }
 0x143   :  { %1277 = vadd.xlane.f32.xlu0 %v1276_v3  ;;  %1280 = vadd.xlane.f32.xlu1 %v1279_v61  ;;  %v1318_v3 = vsel %vm1131_vm1, %v3091_v32, 0.0  ;;  %v1321_v61 = vsel %vm1131_vm1, %v3103_v17, 0.0 }
 0x147   :  { %1289 = vadd.xlane.f32.xlu0 %v1288_v9  ;;  %1292 = vadd.xlane.f32.xlu1 %v1291_v13  ;;  %v1300_v9 = vsel %vm1131_vm1, %v3097_v57, 0.0  ;;  %v1303_v13 = vsel %vm1131_vm1, %v3105_v18, 0.0 }
 0x14b   :  { %1307 = vadd.xlane.f32.xlu0 %v1306_v55  ;;  %1310 = vadd.xlane.f32.xlu1 %v1309_v56  ;;  %v1312_v55 = vsel %vm1131_vm1, %v3099_v58, 0.0  ;;  %v1315_v56 = vsel %vm1131_vm1, %v3107_v62, 0.0 }
 0x14f   :  { %1319 = vadd.xlane.f32.xlu0 %v1318_v3  ;;  %1322 = vadd.xlane.f32.xlu1 %v1321_v61 }
 0x153   :  { %1301 = vadd.xlane.f32.xlu0 %v1300_v9  ;;  %1304 = vadd.xlane.f32.xlu1 %v1303_v13 }
 0x157   :  { %1313 = vadd.xlane.f32.xlu0 %v1312_v55  ;;  %1316 = vadd.xlane.f32.xlu1 %v1315_v56 }
 0x168   :  { %v3177_v4 = vpop.xlane.xlu0 %1151  ;;  %v1140_v3 = vpop.xlane.xlu1 %1139 }
 0x16c   :  { %v1134_v61 = vpop.xlane.xlu0 %1133  ;;  %v1143_v31 = vpop.xlane.xlu1 %1142 }
 0x170   :  { %v1146_v16 = vpop.xlane.xlu0 %1145  ;;  %v1155_v17 = vpop.xlane.xlu1 %1154 }
 0x171   :  { %v1324_v43 = vadd.f32 %v1146_v16, %v1134_v61 }
 0x174   :  { %v1149_v2 = vpop.xlane.xlu1 %1148  ;;  %v1137_v32 = vpop.xlane.xlu0 %1136 }
 0x175   :  { %v1339_v42 = vadd.f32 %v1149_v2, %v1137_v32 }
 0x178   :  { %v1164_v18 = vpop.xlane.xlu0 %1163  ;;  %v1167_v9 = vpop.xlane.xlu1 %1166 }
 0x17c   :  { %v1176_v13 = vpop.xlane.xlu0 %1175  ;;  %v1179_v57 = vpop.xlane.xlu1 %1178 }
 0x180   :  { %v1158_v15 = vpop.xlane.xlu0 %1157  ;;  %v1161_v58 = vpop.xlane.xlu1 %1160 }
 0x181   :  { %v1325_v14 = vadd.f32 %v1324_v43, %v1158_v15  ;;  %v1340_v41 = vadd.f32 %v1339_v42, %v1161_v58 }
 0x184   :  { %v1170_v26 = vpop.xlane.xlu0 %1169  ;;  %v1173_v8 = vpop.xlane.xlu1 %1172 }
 0x185   :  { %v1326_v24 = vadd.f32 %v1325_v14, %v1170_v26  ;;  %v1341_v11 = vadd.f32 %v1340_v41, %v1173_v8 }
 0x188   :  { %v1188_v62 = vpop.xlane.xlu0 %1187  ;;  %v1191_v55 = vpop.xlane.xlu1 %1190 }
 0x18c   :  { %v1200_v56 = vpop.xlane.xlu0 %1199  ;;  %v1203_v1 = vpop.xlane.xlu1 %1202 }
 0x190   :  { %v1182_v25 = vpop.xlane.xlu0 %1181  ;;  %v1185_v7 = vpop.xlane.xlu1 %1184 }
 0x191   :  { %v1327_v20 = vadd.f32 %v1326_v24, %v1182_v25  ;;  %v1342_v16 = vadd.f32 %v1341_v11, %v1185_v7 }
 0x194   :  { %v1194_v48 = vpop.xlane.xlu0 %1193  ;;  %v1197_v44 = vpop.xlane.xlu1 %1196 }
 0x195   :  { %v1328_v19 = vadd.f32 %v1327_v20, %v1194_v48  ;;  %v1343_v61 = vadd.f32 %v1342_v16, %v1197_v44  ;;  %v1354_v48 = vadd.f32 %v3177_v4, %v1140_v3 }
 0x198   :  { %v1212_v38 = vpop.xlane.xlu0 %1211  ;;  %v1215_v47 = vpop.xlane.xlu1 %1214 }
 0x19c   :  { %v1224_v37 = vpop.xlane.xlu0 %1223  ;;  %v1227_v28 = vpop.xlane.xlu1 %1226 }
 0x1a0   :  { %v1206_v22 = vpop.xlane.xlu0 %1205  ;;  %v1209_v30 = vpop.xlane.xlu1 %1208 }
 0x1a1   :  { %v1329_v50 = vadd.f32 %v1328_v19, %v1206_v22  ;;  %v1344_v14 = vadd.f32 %v1343_v61, %v1209_v30 }
 0x1a4   :  { %v1218_v27 = vpop.xlane.xlu0 %1217  ;;  %v1221_v21 = vpop.xlane.xlu1 %1220 }
 0x1a5   :  { %v1330_v36 = vadd.f32 %v1329_v50, %v1218_v27  ;;  %v1345_v26 = vadd.f32 %v1344_v14, %v1221_v21  ;;  %v1369_v50 = vadd.f32 %v1155_v17, %v1143_v31 }
 0x1a7   :  { %v1370_v27 = vadd.f32 %v1369_v50, %v1167_v9 }
 0x1a8   :  { %v1236_v10 = vpop.xlane.xlu0 %1235  ;;  %v1239_v29 = vpop.xlane.xlu1 %1238 }
 0x1a9   :  { %v1371_v2 = vadd.f32 %v1370_v27, %v1179_v57 }
 0x1ab   :  { %v1372_v8 = vadd.f32 %v1371_v2, %v1191_v55 }
 0x1ac   :  { %v1248_v23 = vpop.xlane.xlu0 %1247  ;;  %v1251_v54 = vpop.xlane.xlu1 %1250 }
 0x1ad   :  { %v1373_v58 = vadd.f32 %v1372_v8, %v1203_v1 }
 0x1af   :  { %v1374_v4 = vadd.f32 %v1373_v58, %v1215_v47 }
 0x1b0   :  { %v1230_v53 = vpop.xlane.xlu0 %1229  ;;  %v1233_v49 = vpop.xlane.xlu1 %1232 }
 0x1b1   :  { %v1331_v12 = vadd.f32 %v1330_v36, %v1230_v53  ;;  %v1346_v20 = vadd.f32 %v1345_v26, %v1233_v49  ;;  %v1355_v53 = vadd.f32 %v1354_v48, %v1164_v18  ;;  %v1375_v17 = vadd.f32 %v1374_v4, %v1227_v28 }
 0x1b3   :  { %v1376_v3 = vadd.f32 %v1375_v17, %v1239_v29 }
 0x1b4   :  { %v1242_v35 = vpop.xlane.xlu0 %1241  ;;  %v1245_v6 = vpop.xlane.xlu1 %1244 }
 0x1b5   :  { %v1332_v5 = vadd.f32 %v1331_v12, %v1242_v35  ;;  %v1347_v42 = vadd.f32 %v1346_v20, %v1245_v6  ;;  %v1356_v12 = vadd.f32 %v1355_v53, %v1176_v13  ;;  %v1377_v57 = vadd.f32 %v1376_v3, %v1251_v54 }
 0x1b7   :  { %v1357_v7 = vadd.f32 %v1356_v12, %v1188_v62 }
 0x1b8   :  { %v1260_v43 = vpop.xlane.xlu0 %1259  ;;  %v1263_v15 = vpop.xlane.xlu1 %1262 }
 0x1b9   :  { %v1358_v32 = vadd.f32 %v1357_v7, %v1200_v56  ;;  %v1378_v55 = vadd.f32 %v1377_v57, %v1263_v15 }
 0x1bb   :  { %v1359_v16 = vadd.f32 %v1358_v32, %v1212_v38 }
 0x1bc   :  { %v1272_v24 = vpop.xlane.xlu0 %1271  ;;  %v1275_v25 = vpop.xlane.xlu1 %1274 }
 0x1bd   :  { %v1379_v1 = vadd.f32 %v1378_v55, %v1275_v25 }
 0x1c0   :  { %v1254_v19 = vpop.xlane.xlu0 %1253  ;;  %v1257_v22 = vpop.xlane.xlu1 %1256 }
 0x1c1   :  { %v1333_v36 = vadd.f32 %v1332_v5, %v1254_v19  ;;  %v1348_v41 = vadd.f32 %v1347_v42, %v1257_v22  ;;  %v1360_v5 = vadd.f32 %v1359_v16, %v1224_v37 }
 0x1c3   :  { %v1361_v18 = vadd.f32 %v1360_v5, %v1236_v10 }
 0x1c4   :  { %v1266_v35 = vpop.xlane.xlu0 %1265  ;;  %v1269_v11 = vpop.xlane.xlu1 %1268 }
 0x1c5   :  { %v1334_v44 = vadd.f32 %v1333_v36, %v1266_v35  ;;  %v1349_v30 = vadd.f32 %v1348_v41, %v1269_v11  ;;  %v1362_v13 = vadd.f32 %v1361_v18, %v1248_v23 }
 0x1c7   :  { %v1363_v62 = vadd.f32 %v1362_v13, %v1260_v43 }
 0x1c8   :  { %v1284_v21 = vpop.xlane.xlu0 %1283  ;;  %v1287_v49 = vpop.xlane.xlu1 %1286 }
 0x1c9   :  { %v1364_v56 = vadd.f32 %v1363_v62, %v1272_v24  ;;  %v1380_v48 = vadd.f32 %v1379_v1, %v1287_v49  ;;  %v4223_v62 = vld [vmem:[#allocation18_spill] sm:$0xff] }
 0x1cb   :  { %v1365_v22 = vadd.f32 %v1364_v56, %v1284_v21 }
 0x1cc   :  { %v1296_v31 = vpop.xlane.xlu0 %1295  ;;  %v1299_v6 = vpop.xlane.xlu1 %1298 }
 0x1cd   :  { %v1366_v10 = vadd.f32 %v1365_v22, %v1296_v31  ;;  %v1381_v29 = vadd.f32 %v1380_v48, %v1299_v6  ;;  %v4226_v22 = vld [vmem:[#allocation2_spill] sm:$0xff] }
 0x1d0   :  { %v1278_v9 = vpop.xlane.xlu0 %1277  ;;  %v1281_v61 = vpop.xlane.xlu1 %1280 }
 0x1d1   :  { %v1335_v14 = vadd.f32 %v1334_v44, %v1278_v9  ;;  %v1350_v26 = vadd.f32 %v1349_v30, %v1281_v61 }
 0x1d4   :  { %v1290_v20 = vpop.xlane.xlu0 %1289  ;;  %v1293_v19 = vpop.xlane.xlu1 %1292 }
 0x1d5   :  { %v1336_v38 = vadd.f32 %v1335_v14, %v1290_v20  ;;  %v1351_v47 = vadd.f32 %v1350_v26, %v1293_v19  ;;  %v4222_v26 = vld [vmem:[#allocation14_spill] sm:$0xff] }
 0x1d8   :  { %v1308_v37 = vpop.xlane.xlu0 %1307  ;;  %v1311_v28 = vpop.xlane.xlu1 %1310 }
 0x1d9   :  { %v1367_v50 = vadd.f32 %v1366_v10, %v1308_v37  ;;  %v1382_v42 = vadd.f32 %v1381_v29, %v1311_v28  ;;  %v4227_v37 = vld [vmem:[#allocation19_spill] sm:$0xff]  ;;  %v4229_v10 = vld [vmem:[#allocation4_spill] sm:$0xff] }
 0x1dc   :  { %v1320_v23 = vpop.xlane.xlu0 %1319  ;;  %v1323_v54 = vpop.xlane.xlu1 %1322 }
 0x1dd   :  { %v1368_v36 = vadd.f32 %v1367_v50, %v1320_v23  ;;  %v1383_v53 = vadd.f32 %v1382_v42, %v1323_v54 }
 0x1df   :  { %v3180_v43 = vmul.f32 0.03125, %v1368_v36  ;;  %v3182_v15 = vmul.f32 0.03125, %v1383_v53  ;;  %v4231_v36 = vld [vmem:[#allocation3_spill] sm:$0xff] }
 0x1e0   :  { %v1302_v44 = vpop.xlane.xlu0 %1301  ;;  %v1305_v30 = vpop.xlane.xlu1 %1304 }
 0x1e1   :  { %v3186_v24 = vsub.f32 %v2921_v33, %v3180_v43  ;;  %v3190_v25 = vsub.f32 %v2935_v40, %v3182_v15  ;;  %v3194_v27 = vsub.f32 %v2923_v34, %v3180_v43  ;;  %v3198_v41 = vsub.f32 %v2933_v39, %v3182_v15 }
 0x1e2   :  { %v3206_v33 = vsub.f32 %v2945_v45, %v3180_v43  ;;  %v3210_v40 = vsub.f32 %v2957_v51, %v3182_v15  ;;  %v3226_v21 = vsub.f32 %v2947_v46, %v3180_v43  ;;  %v3230_v49 = vsub.f32 %v2959_v52, %v3182_v15 }
 0x1e3   :  { %4216 = vst [vmem:[#allocation54_spill] sm:$0xff] %v3190_v25  ;;  %4217 = vst [vmem:[#allocation55_spill] sm:$0xff] %v3198_v41  ;;  %v1454_v35 = vmul.f32 %v3186_v24, %v3186_v24  ;;  %v1455_v11 = vmul.f32 %v3190_v25, %v3190_v25  ;;  %v1458_v39 = vmul.f32 %v3194_v27, %v3194_v27 }
 0x1e4   :  { %4218 = vst [vmem:[#allocation56_spill] sm:$0xff] %v3210_v40  ;;  %v1459_v2 = vmul.f32 %v3198_v41, %v3198_v41  ;;  %v1462_v45 = vmul.f32 %v3206_v33, %v3206_v33  ;;  %v1463_v51 = vmul.f32 %v3210_v40, %v3210_v40  ;;  %4219 = vst [vmem:[#allocation57_spill] sm:$0xff] %v3230_v49  ;;  %v1314_v58 = vpop.xlane.xlu0 %1313  ;;  %v1317_v31 = vpop.xlane.xlu1 %1316  ;;  %v4300_v40 = vld [vmem:[#allocation51_spill] sm:$0xff] }
 0x1e5   :  { %v1522_v34 = vsel %vm1131_vm1, %v1454_v35, 0.0  ;;  %v1525_v12 = vsel %vm1131_vm1, %v1455_v11, 0.0  ;;  %v1534_v7 = vsel %vm1131_vm1, %v1458_v39, 0.0  ;;  %v1337_v32 = vadd.f32 %v1336_v38, %v1302_v44  ;;  %v4225_v38 = vld [vmem:[#allocation15_spill] sm:$0xff]  ;;  %v4232_v35 = vld [vmem:[#allocation5_spill] sm:$0xff] }
 0x1e6   :  { %1523 = vadd.xlane.f32.xlu0 %v1522_v34  ;;  %1526 = vadd.xlane.f32.xlu1 %v1525_v12  ;;  %v1537_v8 = vsel %vm1131_vm1, %v1459_v2, 0.0  ;;  %v1546_v16 = vsel %vm1131_vm1, %v1462_v45, 0.0  ;;  %v1549_v4 = vsel %vm1131_vm1, %v1463_v51, 0.0  ;;  %v1466_v6 = vmul.f32 %v3226_v21, %v3226_v21  ;;  %v4234_v12 = vld [vmem:[#allocation6_spill] sm:$0xff]  ;;  %v4235_v2 = vld [vmem:[#allocation8_spill] sm:$0xff] }
 0x1e7   :  { %v1467_v46 = vmul.f32 %v3230_v49, %v3230_v49  ;;  %v3240_v5 = vsub.f32 %v2973_v59, %v3180_v43  ;;  %v3244_v52 = vsub.f32 %v2981_v63, %v3182_v15  ;;  %v1352_v17 = vadd.f32 %v1351_v47, %v1305_v30  ;;  %v4237_v30 = vld [vmem:[#allocation7_spill] sm:$0xff] }
 0x1e8   :  { %v1338_v18 = vadd.f32 %v1337_v32, %v1314_v58  ;;  %v3248_v9 = vsub.f32 %v2975_v60, %v3180_v43  ;;  %v3252_v61 = vsub.f32 %v2983_v0, %v3182_v15  ;;  %v1558_v59 = vsel %vm1131_vm1, %v1466_v6, 0.0  ;;  %v4240_v32 = vld [vmem:[#allocation9_spill] sm:$0xff]  ;;  %v4298_v49 = vld [vmem:[#allocation39_spill] sm:$0xff] }
 0x1e9   :  { %4220 = vst [vmem:[#allocation58_spill] sm:$0xff] %v3244_v52  ;;  %v1353_v3 = vadd.f32 %v1352_v17, %v1317_v31  ;;  %v1561_v13 = vsel %vm1131_vm1, %v1467_v46, 0.0  ;;  %v1470_v63 = vmul.f32 %v3240_v5, %v3240_v5  ;;  %v1471_v57 = vmul.f32 %v3244_v52, %v3244_v52  ;;  %v4242_v31 = vld [vmem:[#allocation26_spill] sm:$0xff] }
 0x1ea   :  { %1535 = vadd.xlane.f32.xlu0 %v1534_v7  ;;  %1538 = vadd.xlane.f32.xlu1 %v1537_v8  ;;  %4221 = vst [vmem:[#allocation59_spill] sm:$0xff] %v3252_v61  ;;  %v3260_v14 = vmul.f32 0.03125, %v1338_v18  ;;  %v3266_v0 = vsub.f32 %v4222_v26, %v3180_v43  ;;  %v3270_v55 = vsub.f32 %v4223_v62, %v3182_v15  ;;  %v4238_v7 = vld [vmem:[#allocation22_spill] sm:$0xff]  ;;  %v4245_v18 = vld [vmem:[#allocation12_spill] sm:$0xff] }
 0x1eb   :  { %v3262_v60 = vmul.f32 0.03125, %v1353_v3  ;;  %v1570_v20 = vsel %vm1131_vm1, %v1470_v63, 0.0  ;;  %v1573_v19 = vsel %vm1131_vm1, %v1471_v57, 0.0  ;;  %v1474_v56 = vmul.f32 %v3248_v9, %v3248_v9  ;;  %v4244_v46 = vld [vmem:[#allocation10_spill] sm:$0xff]  ;;  %v4249_v57 = vld [vmem:[#allocation27_spill] sm:$0xff] }
 0x1ec   :  { %4224 = vst [vmem:[#allocation14_spill] sm:$0xff] %v3270_v55  ;;  %v1475_v1 = vmul.f32 %v3252_v61, %v3252_v61  ;;  %v3280_v47 = vsub.f32 %v4225_v38, %v3180_v43  ;;  %v3284_v48 = vsub.f32 %v4226_v22, %v3260_v14  ;;  %v3288_v28 = vsub.f32 %v4227_v37, %v3182_v15  ;;  %v4251_v62 = vld [vmem:[#allocation30_spill] sm:$0xff]  ;;  %v4254_v22 = vld [vmem:[#allocation13_spill] sm:$0xff] }
 0x1ed   :  { %v3292_v29 = vsub.f32 %v4229_v10, %v3262_v60  ;;  %v1582_v50 = vsel %vm1131_vm1, %v1474_v56, 0.0  ;;  %v1478_v23 = vmul.f32 %v3266_v0, %v3266_v0  ;;  %v1479_v54 = vmul.f32 %v3270_v55, %v3270_v55  ;;  %v4293_v55 = vld [vmem:[#allocation49_spill] sm:$0xff] }
 0x1ee   :  { %1547 = vadd.xlane.f32.xlu0 %v1546_v16  ;;  %1550 = vadd.xlane.f32.xlu1 %v1549_v4  ;;  %4228 = vst [vmem:[#allocation18_spill] sm:$0xff] %v3288_v28  ;;  %v1585_v42 = vsel %vm1131_vm1, %v1475_v1, 0.0  ;;  %v3302_v53 = vsub.f32 %v4231_v36, %v3260_v14  ;;  %v3306_v11 = vsub.f32 %v4232_v35, %v3262_v60  ;;  %v4253_v1 = vld [vmem:[#allocation11_spill] sm:$0xff]  ;;  %v4259_v36 = vld [vmem:[#allocation17_spill] sm:$0xff] }
 0x1ef   :  { %4230 = vst [vmem:[#allocation15_spill] sm:$0xff] %v3292_v29  ;;  %v1482_v34 = vmul.f32 %v3280_v47, %v3280_v47  ;;  %v3312_v39 = vsub.f32 %v4234_v12, %v3260_v14  ;;  %v3316_v44 = vsub.f32 %v4235_v2, %v3262_v60  ;;  %v3320_v45 = vsub.f32 %v4237_v30, %v3260_v14  ;;  %v4262_v2 = vld [vmem:[#allocation34_spill] sm:$0xff] }
 0x1f0   :  { %4233 = vst [vmem:[#allocation2_spill] sm:$0xff] %v3306_v11  ;;  %v1483_v51 = vmul.f32 %v3288_v28, %v3288_v28  ;;  %v3326_v8 = vsub.f32 %v4238_v7, %v3180_v43  ;;  %v3330_v58 = vsub.f32 %v4240_v32, %v3262_v60  ;;  %v1594_v16 = vsel %vm1131_vm1, %v1478_v23, 0.0  ;;  %v4257_v23 = vld [vmem:[#allocation20_spill] sm:$0xff] }
 0x1f1   :  { %4236 = vst [vmem:[#allocation19_spill] sm:$0xff] %v3316_v44  ;;  %v1597_v4 = vsel %vm1131_vm1, %v1479_v54, 0.0  ;;  %v3336_v6 = vsub.f32 %v4242_v31, %v3182_v15  ;;  %v3340_v17 = vsub.f32 %v4244_v46, %v3260_v14  ;;  %v3344_v3 = vsub.f32 %v4245_v18, %v3262_v60 }
 0x1f2   :  { %1559 = vadd.xlane.f32.xlu0 %v1558_v59  ;;  %1562 = vadd.xlane.f32.xlu1 %v1561_v13  ;;  %4239 = vst [vmem:[#allocation4_spill] sm:$0xff] %v3326_v8  ;;  %4241 = vst [vmem:[#allocation3_spill] sm:$0xff] %v3330_v58  ;;  %v1606_v59 = vsel %vm1131_vm1, %v1482_v34, 0.0  ;;  %v4247_v13 = vld [vmem:[#allocation23_spill] sm:$0xff]  ;;  %v3353_v26 = vsub.f32 %v4249_v57, %v3182_v15  ;;  %v1486_v56 = vmul.f32 %v3326_v8, %v3326_v8  ;;  %v4260_v34 = vld [vmem:[#allocation21_spill] sm:$0xff] }
 0x1f3   :  { %4243 = vst [vmem:[#allocation5_spill] sm:$0xff] %v3336_v6  ;;  %4246 = vst [vmem:[#allocation6_spill] sm:$0xff] %v3344_v3  ;;  %v3349_v63 = vsub.f32 %v4247_v13, %v3180_v43  ;;  %v3364_v38 = vsub.f32 %v4253_v1, %v3260_v14  ;;  %v3368_v37 = vsub.f32 %v4254_v22, %v3262_v60  ;;  %v4267_v13 = vld [vmem:[#allocation31_spill] sm:$0xff] }
 0x1f4   :  { %4250 = vst [vmem:[#allocation7_spill] sm:$0xff] %v3353_v26  ;;  %v1487_v10 = vmul.f32 %v3336_v6, %v3336_v6  ;;  %v3378_v54 = vsub.f32 %v4257_v23, %v3262_v60  ;;  %v3382_v35 = vsub.f32 %v4259_v36, %v3260_v14  ;;  %v3386_v12 = vsub.f32 %v4260_v34, %v3262_v60  ;;  %v4273_v23 = vld [vmem:[#allocation36_spill] sm:$0xff]  ;;  %v4275_v34 = vld [vmem:[#allocation33_spill] sm:$0xff] }
 0x1f5   :  { %4248 = vst [vmem:[#allocation8_spill] sm:$0xff] %v3349_v63  ;;  %4255 = vst [vmem:[#allocation9_spill] sm:$0xff] %v3368_v37  ;;  %v3390_v30 = vsub.f32 %v4262_v2, %v3182_v15  ;;  %v1490_v32 = vmul.f32 %v3349_v63, %v3349_v63  ;;  %v1618_v31 = vsel %vm1131_vm1, %v1486_v56, 0.0  ;;  %v1491_v18 = vmul.f32 %v3353_v26, %v3353_v26  ;;  %v4270_v56 = vld [vmem:[#allocation29_spill] sm:$0xff]  ;;  %v4290_v6 = vld [vmem:[#allocation48_spill] sm:$0xff] }
 0x1f6   :  { %1571 = vadd.xlane.f32.xlu0 %v1570_v20  ;;  %1574 = vadd.xlane.f32.xlu1 %v1573_v19  ;;  %v3357_v20 = vsub.f32 %v4251_v62, %v3180_v43  ;;  %v1609_v19 = vsel %vm1131_vm1, %v1483_v51, 0.0  ;;  %4258 = vst [vmem:[#allocation26_spill] sm:$0xff] %v3378_v54  ;;  %4261 = vst [vmem:[#allocation10_spill] sm:$0xff] %v3386_v12  ;;  %v4264_v51 = vld [vmem:[#allocation24_spill] sm:$0xff]  ;;  %v1621_v46 = vsel %vm1131_vm1, %v1487_v10, 0.0  ;;  %v4269_v62 = vld [vmem:[#allocation25_spill] sm:$0xff] }
 0x1f7   :  { %4263 = vst [vmem:[#allocation12_spill] sm:$0xff] %v3390_v30  ;;  %v3394_v7 = vsub.f32 %v4264_v51, %v3260_v14  ;;  %v3410_v57 = vsub.f32 %v4267_v13, %v3180_v43  ;;  %v3418_v1 = vsub.f32 %v4270_v56, %v3262_v60  ;;  %v1495_v22 = vmul.f32 %v3390_v30, %v3390_v30  ;;  %v4272_v10 = vld [vmem:[#allocation32_spill] sm:$0xff]  ;;  %v4276_v51 = vld [vmem:[#allocation35_spill] sm:$0xff] }
 0x1f8   :  { %4252 = vst [vmem:[#allocation22_spill] sm:$0xff] %v3357_v20  ;;  %v3428_v36 = vsub.f32 %v4273_v23, %v3262_v60  ;;  %v3432_v2 = vsub.f32 %v4275_v34, %v3260_v14  ;;  %v1630_v13 = vsel %vm1131_vm1, %v1490_v32, 0.0  ;;  %v4280_v56 = vld [vmem:[#allocation40_spill] sm:$0xff]  ;;  %v3476_v28 = vsub.f32 %v4290_v6, %v3260_v14 }
 0x1f9   :  { %4268 = vst [vmem:[#allocation27_spill] sm:$0xff] %v3410_v57  ;;  %4271 = vst [vmem:[#allocation30_spill] sm:$0xff] %v3418_v1  ;;  %v4281_v23 = vld [vmem:[#allocation44_spill] sm:$0xff]  ;;  %v1645_v30 = vsel %vm1131_vm1, %v1495_v22, 0.0 }
 0x1fa   :  { %1583 = vadd.xlane.f32.xlu0 %v1582_v50  ;;  %1586 = vadd.xlane.f32.xlu1 %v1585_v42  ;;  %v4256_v50 = vld [vmem:[#allocation16_spill] sm:$0xff]  ;;  %4274 = vst [vmem:[#allocation11_spill] sm:$0xff] %v3428_v36  ;;  %v3450_v34 = vsub.f32 %v4281_v23, %v3262_v60  ;;  %v4286_v23 = vld [vmem:[#allocation45_spill] sm:$0xff] }
 0x1fb   :  { %v3374_v42 = vsub.f32 %v4256_v50, %v3260_v14  ;;  %v3424_v50 = vsub.f32 %v4272_v10, %v3260_v14  ;;  %v3446_v10 = vsub.f32 %v4280_v56, %v3260_v14  ;;  %v3468_v26 = vsub.f32 %v4286_v23, %v3262_v60  ;;  %v4294_v23 = vld [vmem:[#allocation53_spill] sm:$0xff] }
 0x1fc   :  { %4282 = vst [vmem:[#allocation20_spill] sm:$0xff] %v3450_v34  ;;  %v3488_v61 = vsub.f32 %v4294_v23, %v3262_v60 }
 0x1fd   :  { %4287 = vst [vmem:[#allocation21_spill] sm:$0xff] %v3468_v26 }
 0x1fe   :  { %1595 = vadd.xlane.f32.xlu0 %v1594_v16  ;;  %1598 = vadd.xlane.f32.xlu1 %v1597_v4  ;;  %v4265_v16 = vld [vmem:[#allocation28_spill] sm:$0xff] }
 0x1ff   :  { %v3400_v4 = vsub.f32 %v4265_v16, %v3262_v60  ;;  %v3436_v16 = vsub.f32 %v4276_v51, %v3182_v15  ;;  %4295 = vst [vmem:[#allocation28_spill] sm:$0xff] %v3488_v61 }
 0x201   :  { %4266 = vst [vmem:[#allocation23_spill] sm:$0xff] %v3400_v4  ;;  %4277 = vst [vmem:[#allocation13_spill] sm:$0xff] %v3436_v16  ;;  %v1499_v32 = vmul.f32 %v3436_v16, %v3436_v16  ;;  %v4291_v16 = vld [vmem:[#allocation52_spill] sm:$0xff] }
 0x202   :  { %1607 = vadd.xlane.f32.xlu0 %v1606_v59  ;;  %1610 = vadd.xlane.f32.xlu1 %v1609_v19  ;;  %v1494_v59 = vmul.f32 %v3357_v20, %v3357_v20  ;;  %v3414_v19 = vsub.f32 %v4269_v62, %v3260_v14  ;;  %v1633_v62 = vsel %vm1131_vm1, %v1491_v18, 0.0  ;;  %v4283_v18 = vld [vmem:[#allocation38_spill] sm:$0xff] }
 0x203   :  { %v3460_v56 = vsub.f32 %v4283_v18, %v3180_v43  ;;  %v3480_v18 = vsub.f32 %v4291_v16, %v3262_v60  ;;  %v3497_v16 = vsub.f32 %v4298_v49, %v3180_v43  ;;  %v4304_v49 = vld [vmem:[#allocation46_spill] sm:$0xff] }
 0x204   :  { %v1642_v51 = vsel %vm1131_vm1, %v1494_v59, 0.0  ;;  %v4288_v59 = vld [vmem:[#allocation42_spill] sm:$0xff] }
 0x205   :  { %4284 = vst [vmem:[#allocation17_spill] sm:$0xff] %v3460_v56  ;;  %v3472_v22 = vsub.f32 %v4288_v59, %v3182_v15  ;;  %4292 = vst [vmem:[#allocation24_spill] sm:$0xff] %v3480_v18  ;;  %v4296_v59 = vld [vmem:[#allocation47_spill] sm:$0xff] }
 0x206   :  { %1619 = vadd.xlane.f32.xlu0 %v1618_v31  ;;  %1622 = vadd.xlane.f32.xlu1 %v1621_v46  ;;  %v4278_v31 = vld [vmem:[#allocation37_spill] sm:$0xff]  ;;  %v3492_v52 = vsub.f32 %v4296_v59, %v3180_v43  ;;  %4299 = vst [vmem:[#allocation25_spill] sm:$0xff] %v3497_v16 }
 0x207   :  { %v3440_v46 = vsub.f32 %v4278_v31, %v3262_v60  ;;  %v1498_v31 = vmul.f32 %v3410_v57, %v3410_v57  ;;  %4289 = vst [vmem:[#allocation34_spill] sm:$0xff] %v3472_v22  ;;  %v1502_v60 = vmul.f32 %v3460_v56, %v3460_v56 }
 0x208   :  { %4297 = vst [vmem:[#allocation31_spill] sm:$0xff] %v3492_v52 }
 0x209   :  { %4279 = vst [vmem:[#allocation16_spill] sm:$0xff] %v3440_v46  ;;  %v1654_v6 = vsel %vm1131_vm1, %v1498_v31, 0.0  ;;  %v3514_v31 = vsub.f32 %v4304_v49, %v3180_v43  ;;  %v1452_v49 = vmul.f32 %v3284_v48, %v3284_v48 }
 0x20a   :  { %1631 = vadd.xlane.f32.xlu0 %v1630_v13  ;;  %1634 = vadd.xlane.f32.xlu1 %v1633_v62  ;;  %v4285_v13 = vld [vmem:[#allocation41_spill] sm:$0xff] }
 0x20b   :  { %v3464_v62 = vsub.f32 %v4285_v13, %v3260_v14  ;;  %v3484_v13 = vsub.f32 %v4293_v55, %v3260_v14  ;;  %v3501_v14 = vsub.f32 %v4300_v40, %v3182_v15  ;;  %v1657_v55 = vsel %vm1131_vm1, %v1499_v32, 0.0  ;;  %4305 = vst [vmem:[#allocation36_spill] sm:$0xff] %v3514_v31  ;;  %v4306_v40 = vld [vmem:[#allocation50_spill] sm:$0xff] }
 0x20c   :  { %v3518_v59 = vsub.f32 %v4306_v40, %v3182_v15  ;;  %v1666_v32 = vsel %vm1131_vm1, %v1502_v60, 0.0 }
 0x20d   :  { %4301 = vst [vmem:[#allocation29_spill] sm:$0xff] %v3501_v14 }
 0x20e   :  { %1643 = vadd.xlane.f32.xlu0 %v1642_v51  ;;  %1646 = vadd.xlane.f32.xlu1 %v1645_v30  ;;  %v1503_v30 = vmul.f32 %v3472_v22, %v3472_v22  ;;  %v4302_v51 = vld [vmem:[#allocation43_spill] sm:$0xff]  ;;  %4307 = vst [vmem:[#allocation33_spill] sm:$0xff] %v3518_v59  ;;  %v1506_v22 = vmul.f32 %v3497_v16, %v3497_v16 }
 0x20f   :  { %v3510_v23 = vsub.f32 %v4302_v51, %v3182_v15  ;;  %v1510_v15 = vmul.f32 %v3514_v31, %v3514_v31 }
 0x210   :  { %v1669_v41 = vsel %vm1131_vm1, %v1503_v30, 0.0 }
 0x211   :  { %4303 = vst [vmem:[#allocation32_spill] sm:$0xff] %v3510_v23  ;;  %v1507_v51 = vmul.f32 %v3510_v23, %v3510_v23  ;;  %v1690_v60 = vsel %vm1131_vm1, %v1510_v15, 0.0  ;;  %v1460_v15 = vmul.f32 %v3312_v39, %v3312_v39 }
 0x212   :  { %1655 = vadd.xlane.f32.xlu0 %v1654_v6  ;;  %1658 = vadd.xlane.f32.xlu1 %v1657_v55  ;;  %v1678_v6 = vsel %vm1131_vm1, %v1506_v22, 0.0  ;;  %v1511_v55 = vmul.f32 %v3518_v59, %v3518_v59  ;;  %v1516_v22 = vsel %vm1131_vm1, %v1452_v49, 0.0  ;;  %v1464_v49 = vmul.f32 %v3320_v45, %v3320_v45 }
 0x213   :  { %v1681_v43 = vsel %vm1131_vm1, %v1507_v51, 0.0  ;;  %v1457_v51 = vmul.f32 %v3306_v11, %v3306_v11  ;;  %v2730_v59 = vmov 0  }
 0x214   :  { %v1693_v30 = vsel %vm1131_vm1, %v1511_v55, 0.0  ;;  %v1461_v55 = vmul.f32 %v3316_v44, %v3316_v44  ;;  %2687 = vset.pattern.permute.xlu0 %v2730_v59  ;;  %2688 = vset.pattern.permute.xlu1 %v2730_v59 }
 0x216   :  { %1667 = vadd.xlane.f32.xlu0 %v1666_v32  ;;  %1670 = vadd.xlane.f32.xlu1 %v1669_v41  ;;  %v1453_v41 = vmul.f32 %v3292_v29, %v3292_v29  ;;  %v1456_v32 = vmul.f32 %v3302_v53, %v3302_v53 }
 0x218   :  { %v1519_v40 = vsel %vm1131_vm1, %v1453_v41, 0.0  ;;  %v1465_v41 = vmul.f32 %v3330_v58, %v3330_v58 }
 0x21a   :  { %1679 = vadd.xlane.f32.xlu0 %v1678_v6  ;;  %1682 = vadd.xlane.f32.xlu1 %v1681_v43  ;;  %v1528_v6 = vsel %vm1131_vm1, %v1456_v32, 0.0  ;;  %v1531_v43 = vsel %vm1131_vm1, %v1457_v51, 0.0  ;;  %v1468_v32 = vmul.f32 %v3340_v17, %v3340_v17  ;;  %v1469_v51 = vmul.f32 %v3344_v3, %v3344_v3 }
 0x21e   :  { %1691 = vadd.xlane.f32.xlu0 %v1690_v60  ;;  %1694 = vadd.xlane.f32.xlu1 %v1693_v30  ;;  %v1540_v60 = vsel %vm1131_vm1, %v1460_v15, 0.0  ;;  %v1543_v30 = vsel %vm1131_vm1, %v1461_v55, 0.0  ;;  %v1472_v15 = vmul.f32 %v3364_v38, %v3364_v38  ;;  %v1473_v55 = vmul.f32 %v3368_v37, %v3368_v37 }
 0x222   :  { %1517 = vadd.xlane.f32.xlu0 %v1516_v22  ;;  %1520 = vadd.xlane.f32.xlu1 %v1519_v40  ;;  %v1552_v22 = vsel %vm1131_vm1, %v1464_v49, 0.0  ;;  %v1555_v40 = vsel %vm1131_vm1, %v1465_v41, 0.0  ;;  %v1476_v49 = vmul.f32 %v3374_v42, %v3374_v42  ;;  %v1477_v41 = vmul.f32 %v3378_v54, %v3378_v54 }
 0x226   :  { %1529 = vadd.xlane.f32.xlu0 %v1528_v6  ;;  %1532 = vadd.xlane.f32.xlu1 %v1531_v43  ;;  %v1564_v6 = vsel %vm1131_vm1, %v1468_v32, 0.0  ;;  %v1567_v43 = vsel %vm1131_vm1, %v1469_v51, 0.0  ;;  %v1480_v32 = vmul.f32 %v3382_v35, %v3382_v35  ;;  %v1481_v51 = vmul.f32 %v3386_v12, %v3386_v12 }
 0x22a   :  { %1541 = vadd.xlane.f32.xlu0 %v1540_v60  ;;  %1544 = vadd.xlane.f32.xlu1 %v1543_v30  ;;  %v1576_v60 = vsel %vm1131_vm1, %v1472_v15, 0.0  ;;  %v1579_v30 = vsel %vm1131_vm1, %v1473_v55, 0.0  ;;  %v1484_v15 = vmul.f32 %v3394_v7, %v3394_v7  ;;  %v1485_v55 = vmul.f32 %v3400_v4, %v3400_v4 }
 0x22e   :  { %1553 = vadd.xlane.f32.xlu0 %v1552_v22  ;;  %1556 = vadd.xlane.f32.xlu1 %v1555_v40  ;;  %v1588_v22 = vsel %vm1131_vm1, %v1476_v49, 0.0  ;;  %v1591_v40 = vsel %vm1131_vm1, %v1477_v41, 0.0  ;;  %v1488_v49 = vmul.f32 %v3414_v19, %v3414_v19  ;;  %v1489_v41 = vmul.f32 %v3418_v1, %v3418_v1 }
 0x232   :  { %1565 = vadd.xlane.f32.xlu0 %v1564_v6  ;;  %1568 = vadd.xlane.f32.xlu1 %v1567_v43  ;;  %v1600_v6 = vsel %vm1131_vm1, %v1480_v32, 0.0  ;;  %v1603_v43 = vsel %vm1131_vm1, %v1481_v51, 0.0  ;;  %v1492_v32 = vmul.f32 %v3424_v50, %v3424_v50  ;;  %v1493_v51 = vmul.f32 %v3428_v36, %v3428_v36 }
 0x236   :  { %1577 = vadd.xlane.f32.xlu0 %v1576_v60  ;;  %1580 = vadd.xlane.f32.xlu1 %v1579_v30  ;;  %v1612_v60 = vsel %vm1131_vm1, %v1484_v15, 0.0  ;;  %v1615_v30 = vsel %vm1131_vm1, %v1485_v55, 0.0  ;;  %v1496_v15 = vmul.f32 %v3432_v2, %v3432_v2  ;;  %v1497_v55 = vmul.f32 %v3440_v46, %v3440_v46 }
 0x23a   :  { %1589 = vadd.xlane.f32.xlu0 %v1588_v22  ;;  %1592 = vadd.xlane.f32.xlu1 %v1591_v40  ;;  %v1624_v22 = vsel %vm1131_vm1, %v1488_v49, 0.0  ;;  %v1627_v40 = vsel %vm1131_vm1, %v1489_v41, 0.0  ;;  %v1500_v49 = vmul.f32 %v3446_v10, %v3446_v10  ;;  %v1501_v41 = vmul.f32 %v3450_v34, %v3450_v34 }
 0x23e   :  { %1601 = vadd.xlane.f32.xlu0 %v1600_v6  ;;  %1604 = vadd.xlane.f32.xlu1 %v1603_v43  ;;  %v1636_v6 = vsel %vm1131_vm1, %v1492_v32, 0.0  ;;  %v1639_v43 = vsel %vm1131_vm1, %v1493_v51, 0.0  ;;  %v1504_v32 = vmul.f32 %v3464_v62, %v3464_v62  ;;  %v1505_v51 = vmul.f32 %v3468_v26, %v3468_v26 }
 0x242   :  { %1613 = vadd.xlane.f32.xlu0 %v1612_v60  ;;  %1616 = vadd.xlane.f32.xlu1 %v1615_v30  ;;  %v1648_v60 = vsel %vm1131_vm1, %v1496_v15, 0.0  ;;  %v1651_v30 = vsel %vm1131_vm1, %v1497_v55, 0.0  ;;  %v1508_v15 = vmul.f32 %v3476_v28, %v3476_v28  ;;  %v1509_v55 = vmul.f32 %v3480_v18, %v3480_v18 }
 0x246   :  { %1625 = vadd.xlane.f32.xlu0 %v1624_v22  ;;  %1628 = vadd.xlane.f32.xlu1 %v1627_v40  ;;  %v1660_v22 = vsel %vm1131_vm1, %v1500_v49, 0.0  ;;  %v1663_v40 = vsel %vm1131_vm1, %v1501_v41, 0.0  ;;  %v1512_v49 = vmul.f32 %v3484_v13, %v3484_v13  ;;  %v1513_v41 = vmul.f32 %v3488_v61, %v3488_v61 }
 0x24a   :  { %1637 = vadd.xlane.f32.xlu0 %v1636_v6  ;;  %1640 = vadd.xlane.f32.xlu1 %v1639_v43  ;;  %v1672_v6 = vsel %vm1131_vm1, %v1504_v32, 0.0  ;;  %v1675_v43 = vsel %vm1131_vm1, %v1505_v51, 0.0  ;;  %v1514_v32 = vmul.f32 %v3492_v52, %v3492_v52  ;;  %v1515_v51 = vmul.f32 %v3501_v14, %v3501_v14 }
 0x24e   :  { %1649 = vadd.xlane.f32.xlu0 %v1648_v60  ;;  %1652 = vadd.xlane.f32.xlu1 %v1651_v30  ;;  %v1684_v60 = vsel %vm1131_vm1, %v1508_v15, 0.0  ;;  %v1687_v30 = vsel %vm1131_vm1, %v1509_v55, 0.0 }
 0x252   :  { %1661 = vadd.xlane.f32.xlu0 %v1660_v22  ;;  %1664 = vadd.xlane.f32.xlu1 %v1663_v40  ;;  %v1696_v22 = vsel %vm1131_vm1, %v1512_v49, 0.0  ;;  %v1699_v40 = vsel %vm1131_vm1, %v1513_v41, 0.0 }
 0x256   :  { %1673 = vadd.xlane.f32.xlu0 %v1672_v6  ;;  %1676 = vadd.xlane.f32.xlu1 %v1675_v43  ;;  %v1702_v6 = vsel %vm1131_vm1, %v1514_v32, 0.0  ;;  %v1705_v43 = vsel %vm1131_vm1, %v1515_v51, 0.0 }
 0x25a   :  { %1685 = vadd.xlane.f32.xlu0 %v1684_v60  ;;  %1688 = vadd.xlane.f32.xlu1 %v1687_v30 }
 0x25e   :  { %1697 = vadd.xlane.f32.xlu0 %v1696_v22  ;;  %1700 = vadd.xlane.f32.xlu1 %v1699_v40 }
 0x262   :  { %1703 = vadd.xlane.f32.xlu0 %v1702_v6  ;;  %1706 = vadd.xlane.f32.xlu1 %v1705_v43 }
 0x273   :  { %v1524_v15 = vpop.xlane.xlu0 %1523  ;;  %v1527_v55 = vpop.xlane.xlu1 %1526 }
 0x277   :  { %v1536_v60 = vpop.xlane.xlu0 %1535  ;;  %v1539_v30 = vpop.xlane.xlu1 %1538 }
 0x278   :  { %v1738_v49 = vadd.f32 %v1536_v60, %v1524_v15  ;;  %v1753_v41 = vadd.f32 %v1539_v30, %v1527_v55 }
 0x27b   :  { %v1548_v23 = vpop.xlane.xlu0 %1547  ;;  %v1551_v25 = vpop.xlane.xlu1 %1550 }
 0x27c   :  { %v1739_v14 = vadd.f32 %v1738_v49, %v1548_v23  ;;  %v1754_v22 = vadd.f32 %v1753_v41, %v1551_v25 }
 0x27f   :  { %v1560_v40 = vpop.xlane.xlu0 %1559  ;;  %v1563_v61 = vpop.xlane.xlu1 %1562 }
 0x280   :  { %v1740_v32 = vadd.f32 %v1739_v14, %v1560_v40  ;;  %v1755_v18 = vadd.f32 %v1754_v22, %v1563_v61 }
 0x283   :  { %v1572_v51 = vpop.xlane.xlu0 %1571  ;;  %v1575_v6 = vpop.xlane.xlu1 %1574 }
 0x284   :  { %v1741_v43 = vadd.f32 %v1740_v32, %v1572_v51  ;;  %v1756_v26 = vadd.f32 %v1755_v18, %v1575_v6 }
 0x287   :  { %v1584_v34 = vpop.xlane.xlu0 %1583  ;;  %v1587_v46 = vpop.xlane.xlu1 %1586 }
 0x288   :  { %v1742_v36 = vadd.f32 %v1741_v43, %v1584_v34  ;;  %v1757_v15 = vadd.f32 %v1756_v26, %v1587_v46 }
 0x28b   :  { %v1596_v55 = vpop.xlane.xlu0 %1595  ;;  %v1599_v60 = vpop.xlane.xlu1 %1598 }
 0x28c   :  { %v1743_v30 = vadd.f32 %v1742_v36, %v1596_v55  ;;  %v1758_v59 = vadd.f32 %v1757_v15, %v1599_v60 }
 0x28f   :  { %v1608_v1 = vpop.xlane.xlu0 %1607  ;;  %v1611_v4 = vpop.xlane.xlu1 %1610 }
 0x290   :  { %v1744_v23 = vadd.f32 %v1743_v30, %v1608_v1  ;;  %v1759_v25 = vadd.f32 %v1758_v59, %v1611_v4 }
 0x293   :  { %v1620_v49 = vpop.xlane.xlu0 %1619  ;;  %v1623_v41 = vpop.xlane.xlu1 %1622 }
 0x294   :  { %v1745_v14 = vadd.f32 %v1744_v23, %v1620_v49  ;;  %v1760_v61 = vadd.f32 %v1759_v25, %v1623_v41 }
 0x297   :  { %v1632_v22 = vpop.xlane.xlu0 %1631  ;;  %v1635_v40 = vpop.xlane.xlu1 %1634 }
 0x298   :  { %v1746_v32 = vadd.f32 %v1745_v14, %v1632_v22  ;;  %v1761_v18 = vadd.f32 %v1760_v61, %v1635_v40 }
 0x29b   :  { %v1644_v51 = vpop.xlane.xlu0 %1643  ;;  %v1647_v6 = vpop.xlane.xlu1 %1646 }
 0x29c   :  { %v1747_v34 = vadd.f32 %v1746_v32, %v1644_v51  ;;  %v1762_v26 = vadd.f32 %v1761_v18, %v1647_v6 }
 0x29f   :  { %v1656_v46 = vpop.xlane.xlu0 %1655  ;;  %v1659_v43 = vpop.xlane.xlu1 %1658 }
 0x2a0   :  { %v1748_v36 = vadd.f32 %v1747_v34, %v1656_v46  ;;  %v1763_v15 = vadd.f32 %v1762_v26, %v1659_v43 }
 0x2a3   :  { %v1668_v55 = vpop.xlane.xlu0 %1667  ;;  %v1671_v60 = vpop.xlane.xlu1 %1670 }
 0x2a4   :  { %v1749_v1 = vadd.f32 %v1748_v36, %v1668_v55  ;;  %v1764_v4 = vadd.f32 %v1763_v15, %v1671_v60 }
 0x2a7   :  { %v1680_v30 = vpop.xlane.xlu0 %1679  ;;  %v1683_v59 = vpop.xlane.xlu1 %1682 }
 0x2a8   :  { %v1750_v23 = vadd.f32 %v1749_v1, %v1680_v30  ;;  %v1765_v25 = vadd.f32 %v1764_v4, %v1683_v59 }
 0x2ab   :  { %v1692_v49 = vpop.xlane.xlu0 %1691  ;;  %v1695_v41 = vpop.xlane.xlu1 %1694 }
 0x2ac   :  { %v1751_v14 = vadd.f32 %v1750_v23, %v1692_v49  ;;  %v3636_v61 = vadd.f32 %v1765_v25, %v1695_v41 }
 0x2af   :  { %v1518_v22 = vpop.xlane.xlu0 %1517  ;;  %v1521_v40 = vpop.xlane.xlu1 %1520 }
 0x2b3   :  { %v1530_v32 = vpop.xlane.xlu0 %1529  ;;  %v1533_v18 = vpop.xlane.xlu1 %1532 }
 0x2b4   :  { %v1708_v23 = vadd.f32 %v1530_v32, %v1518_v22  ;;  %v1723_v57 = vadd.f32 %v1533_v18, %v1521_v40 }
 0x2b7   :  { %v1542_v51 = vpop.xlane.xlu0 %1541  ;;  %v1545_v6 = vpop.xlane.xlu1 %1544 }
 0x2b8   :  { %v1709_v25 = vadd.f32 %v1708_v23, %v1542_v51  ;;  %v1724_v63 = vadd.f32 %v1723_v57, %v1545_v6 }
 0x2bb   :  { %v1554_v34 = vpop.xlane.xlu0 %1553  ;;  %v1557_v26 = vpop.xlane.xlu1 %1556 }
 0x2bc   :  { %v1710_v12 = vadd.f32 %v1709_v25, %v1554_v34  ;;  %v1725_v51 = vadd.f32 %v1724_v63, %v1557_v26 }
 0x2bf   :  { %v1566_v46 = vpop.xlane.xlu0 %1565  ;;  %v1569_v43 = vpop.xlane.xlu1 %1568 }
 0x2c0   :  { %v1711_v54 = vadd.f32 %v1710_v12, %v1566_v46  ;;  %v1726_v34 = vadd.f32 %v1725_v51, %v1569_v43  ;;  %v1872_v51 = vld [vmem:[%s4070_s3] sm:$0xff] }
 0x2c3   :  { %v1578_v36 = vpop.xlane.xlu0 %1577  ;;  %v1581_v15 = vpop.xlane.xlu1 %1580 }
 0x2c4   :  { %v1712_v58 = vadd.f32 %v1711_v54, %v1578_v36  ;;  %v1727_v25 = vadd.f32 %v1726_v34, %v1581_v15  ;;  %v1874_v34 = vld [vmem:[%s4070_s3 + $0x10] sm:$0xff] }
 0x2c7   :  { %v1590_v55 = vpop.xlane.xlu0 %1589  ;;  %v1593_v60 = vpop.xlane.xlu1 %1592 }
 0x2c8   :  { %v1713_v44 = vadd.f32 %v1712_v58, %v1590_v55  ;;  %v1728_v36 = vadd.f32 %v1727_v25, %v1593_v60 }
 0x2cb   :  { %v1602_v1 = vpop.xlane.xlu0 %1601  ;;  %v1605_v4 = vpop.xlane.xlu1 %1604 }
 0x2cc   :  { %v1714_v52 = vadd.f32 %v1713_v44, %v1602_v1 }
 0x2cf   :  { %v1614_v30 = vpop.xlane.xlu0 %1613  ;;  %v1617_v59 = vpop.xlane.xlu1 %1616 }
 0x2d0   :  { %v1715_v31 = vadd.f32 %v1714_v52, %v1614_v30  ;;  %v1729_v52 = vadd.f32 %v1728_v36, %v1605_v4  ;;  %v1780_v4 = vld [vmem:[%s4069_s2] sm:$0xff] }
 0x2d2   :  { %v1730_v30 = vadd.f32 %v1729_v52, %v1617_v59 }
 0x2d3   :  { %v1626_v49 = vpop.xlane.xlu0 %1625  ;;  %v1629_v41 = vpop.xlane.xlu1 %1628 }
 0x2d4   :  { %v1716_v20 = vadd.f32 %v1715_v31, %v1626_v49 }
 0x2d7   :  { %v1638_v37 = vpop.xlane.xlu0 %1637  ;;  %v1641_v3 = vpop.xlane.xlu1 %1640 }
 0x2d8   :  { %v1717_v8 = vadd.f32 %v1716_v20, %v1638_v37  ;;  %v1731_v20 = vadd.f32 %v1730_v30, %v1629_v41 }
 0x2da   :  { %v1732_v63 = vadd.f32 %v1731_v20, %v1641_v3 }
 0x2db   :  { %v1650_v11 = vpop.xlane.xlu0 %1649  ;;  %v1653_v29 = vpop.xlane.xlu1 %1652 }
 0x2dc   :  { %v1718_v23 = vadd.f32 %v1717_v8, %v1650_v11  ;;  %v1733_v8 = vadd.f32 %v1732_v63, %v1653_v29  ;;  %v1782_v29 = vld [vmem:[%s4069_s2 + $0x10] sm:$0xff] }
 0x2df   :  { %v1662_v16 = vpop.xlane.xlu0 %1661  ;;  %v1665_v56 = vpop.xlane.xlu1 %1664 }
 0x2e0   :  { %v1719_v12 = vadd.f32 %v1718_v23, %v1662_v16  ;;  %v1734_v26 = vadd.f32 %v1733_v8, %v1665_v56  ;;  %v1873_v23 = vld [vmem:[%s4070_s3 + $0x8] sm:$0xff] }
 0x2e3   :  { %v1674_v22 = vpop.xlane.xlu0 %1673  ;;  %v1677_v32 = vpop.xlane.xlu1 %1676 }
 0x2e4   :  { %v1720_v54 = vadd.f32 %v1719_v12, %v1674_v22  ;;  %v1735_v43 = vadd.f32 %v1734_v26, %v1677_v32 }
 0x2e7   :  { %v1686_v46 = vpop.xlane.xlu0 %1685  ;;  %v1689_v58 = vpop.xlane.xlu1 %1688 }
 0x2e8   :  { %v1721_v55 = vadd.f32 %v1720_v54, %v1686_v46  ;;  %v1736_v60 = vadd.f32 %v1735_v43, %v1689_v58  ;;  %v1783_v46 = vld [vmem:[%s4069_s2 + $0x18] sm:$0xff]  ;;  %v1781_v58 = vld [vmem:[%s4069_s2 + $0x8] sm:$0xff] }
 0x2e9   :  { %v4315_v43 = vld [vmem:[#allocation31_spill] sm:$0xff] }
 0x2eb   :  { %v1698_v44 = vpop.xlane.xlu0 %1697  ;;  %v1701_v31 = vpop.xlane.xlu1 %1700 }
 0x2ec   :  { %v1722_v1 = vadd.f32 %v1721_v55, %v1698_v44  ;;  %v1737_v49 = vadd.f32 %v1736_v60, %v1701_v31  ;;  %v1875_v55 = vld [vmem:[%s4070_s3 + $0x18] sm:$0xff] }
 0x2ee   :  { %v1768_v40 = vmul.f32 0.03125, %v1722_v1  ;;  %v1769_v56 = vmul.f32 0.03125, %v1737_v49 }
 0x2ef   :  { %v1704_v57 = vpop.xlane.xlu0 %1703  ;;  %v1707_v6 = vpop.xlane.xlu1 %1706 }
 0x2f0   :  { %v1772_v37 = vadd.f32 1e-05, %v1768_v40  ;;  %v1752_v18 = vadd.f32 %v1751_v14, %v1704_v57  ;;  %v1767_v15 = vadd.f32 %v3636_v61, %v1707_v6  ;;  %v1773_v61 = vadd.f32 1e-05, %v1769_v56 }
 0x2f2   :  { %2722 = vrsqrt.f32 %v1772_v37  ;;  %v1770_v11 = vmul.f32 0.03125, %v1752_v18  ;;  %v1771_v41 = vmul.f32 0.03125, %v1767_v15 }
 0x2f4   :  { %v1774_v16 = vadd.f32 1e-05, %v1770_v11  ;;  %v1775_v22 = vadd.f32 1e-05, %v1771_v41 }
 0x2f6   :  { %2724 = vrsqrt.f32 %v1774_v16 }
 0x2f7   :  { %2726 = vrsqrt.f32 %v1775_v22 }
 0x2f8   :  { %2728 = vrsqrt.f32 %v1773_v61 }
 0x2fc   :  { %v2723_v59 = vpop.eup %2722 }
 0x2fd   :  { %v1784_v14 = vmul.f32 %v2723_v59, %v1780_v4 }
 0x2ff   :  { %1790 = vperm.xlu0 %2687, %v1784_v14  }
 0x300   :  { %v2725_v3 = vpop.eup %2724 }
 0x301   :  { %v1786_v32 = vmul.f32 %v2725_v3, %v1782_v29  ;;  %v2727_v12 = vpop.eup %2726 }
 0x302   :  { %v1787_v25 = vmul.f32 %v2727_v12, %v1783_v46  ;;  %v2729_v54 = vpop.eup %2728 }
 0x303   :  { %1800 = vperm.xlu1 %2688, %v1786_v32   ;;  %v1785_v36 = vmul.f32 %v2729_v54, %v1781_v58 }
 0x307   :  { %1878 = vperm.xlu1 %2688, %v1872_v51  }
 0x30b   :  { %1883 = vperm.xlu1 %2688, %v1873_v23  }
 0x30f   :  { %1888 = vperm.xlu1 %2688, %v1874_v34  }
 0x313   :  { %1805 = vperm.xlu1 %2688, %v1787_v25  }
 0x317   :  { %1795 = vperm.xlu1 %2688, %v1785_v36  }
 0x31b   :  { %1893 = vperm.xlu1 %2688, %v1875_v55  }
 0x37e   :  { %v1791_v44 = vpop.permute.xlu0 %1790 }
 0x37f   :  { %v1808_v52 = vmul.f32 %v1791_v44, %v3284_v48  ;;  %v1812_v1 = vmul.f32 %v1791_v44, %v3302_v53  ;;  %v1816_v30 = vmul.f32 %v1791_v44, %v3312_v39  ;;  %v1820_v40 = vmul.f32 %v1791_v44, %v3320_v45 }
 0x380   :  { %v1824_v31 = vmul.f32 %v1791_v44, %v3340_v17  ;;  %v1828_v57 = vmul.f32 %v1791_v44, %v3364_v38  ;;  %v1832_v20 = vmul.f32 %v1791_v44, %v3374_v42  ;;  %v1836_v37 = vmul.f32 %v1791_v44, %v3382_v35 }
 0x381   :  { %v1840_v18 = vmul.f32 %v1791_v44, %v3394_v7  ;;  %v1844_v63 = vmul.f32 %v1791_v44, %v3414_v19  ;;  %v1848_v48 = vmul.f32 %v1791_v44, %v3424_v50  ;;  %v1852_v53 = vmul.f32 %v1791_v44, %v3432_v2 }
 0x382   :  { %v1856_v39 = vmul.f32 %v1791_v44, %v3446_v10  ;;  %v1860_v45 = vmul.f32 %v1791_v44, %v3464_v62  ;;  %v1864_v17 = vmul.f32 %v1791_v44, %v3476_v28  ;;  %v1868_v38 = vmul.f32 %v1791_v44, %v3484_v13  ;;  %v1801_v11 = vpop.permute.xlu1 %1800 }
 0x383   :  { %v3680_v42 = vmul.f32 %v1801_v11, %v3186_v24  ;;  %v3683_v35 = vmul.f32 %v1801_v11, %v3194_v27  ;;  %v3686_v7 = vmul.f32 %v1801_v11, %v3206_v33  ;;  %v3689_v19 = vmul.f32 %v1801_v11, %v3226_v21  ;;  %v4308_v27 = vld [vmem:[#allocation4_spill] sm:$0xff]  ;;  %v4310_v21 = vld [vmem:[#allocation22_spill] sm:$0xff] }
 0x384   :  { %v3692_v50 = vmul.f32 %v1801_v11, %v3240_v5  ;;  %v3695_v28 = vmul.f32 %v1801_v11, %v3248_v9  ;;  %v3698_v2 = vmul.f32 %v1801_v11, %v3266_v0  ;;  %v3701_v24 = vmul.f32 %v1801_v11, %v3280_v47  ;;  %v4309_v33 = vld [vmem:[#allocation8_spill] sm:$0xff]  ;;  %v4311_v5 = vld [vmem:[#allocation27_spill] sm:$0xff]  ;;  %v4312_v9 = vld [vmem:[#allocation17_spill] sm:$0xff] }
 0x385   :  { %v3704_v10 = vmul.f32 %v1801_v11, %v4308_v27  ;;  %v3707_v62 = vmul.f32 %v1801_v11, %v4309_v33  ;;  %v3710_v13 = vmul.f32 %v1801_v11, %v4310_v21  ;;  %v3713_v8 = vmul.f32 %v1801_v11, %v4311_v5  ;;  %v4313_v0 = vld [vmem:[#allocation25_spill] sm:$0xff]  ;;  %v4314_v47 = vld [vmem:[#allocation36_spill] sm:$0xff] }
 0x386   :  { %v3716_v16 = vmul.f32 %v1801_v11, %v4312_v9  ;;  %v3719_v6 = vmul.f32 %v1801_v11, %v4313_v0  ;;  %v3722_v26 = vmul.f32 %v1801_v11, %v4314_v47  ;;  %v3725_v15 = vmul.f32 %v1801_v11, %v4315_v43  ;;  %v1879_v60 = vpop.permute.xlu1 %1878 }
 0x387   :  { %v1896_v4 = vadd.f32 %v1879_v60, %v1808_v52  ;;  %v1900_v59 = vadd.f32 %v1879_v60, %v1812_v1  ;;  %v1904_v49 = vadd.f32 %v1879_v60, %v1816_v30  ;;  %v1908_v41 = vadd.f32 %v1879_v60, %v1820_v40 }
 0x388   :  { %v1912_v14 = vadd.f32 %v1879_v60, %v1824_v31  ;;  %v1916_v29 = vadd.f32 %v1879_v60, %v1828_v57  ;;  %v1920_v3 = vadd.f32 %v1879_v60, %v1832_v20  ;;  %v1924_v56 = vadd.f32 %v1879_v60, %v1836_v37 }
 0x389   :  { %v1928_v22 = vadd.f32 %v1879_v60, %v1840_v18  ;;  %v1932_v32 = vadd.f32 %v1879_v60, %v1844_v63  ;;  %v1936_v61 = vadd.f32 %v1879_v60, %v1848_v48  ;;  %v1940_v51 = vadd.f32 %v1879_v60, %v1852_v53 }
 0x38a   :  { %v1944_v23 = vadd.f32 %v1879_v60, %v1856_v39  ;;  %v1948_v34 = vadd.f32 %v1879_v60, %v1860_v45  ;;  %v1952_v12 = vadd.f32 %v1879_v60, %v1864_v17  ;;  %v1956_v46 = vadd.f32 %v1879_v60, %v1868_v38  ;;  %v3727_v25 = vpop.permute.xlu1 %1883 }
 0x38b   :  { %v1960_v54 = vmax.f32 %v1896_v4, 0.0  ;;  %v1964_v58 = vmax.f32 %v1900_v59, 0.0  ;;  %v1968_v36 = vmax.f32 %v1904_v49, 0.0  ;;  %v1972_v55 = vmax.f32 %v1908_v41, 0.0 }
 0x38c   :  { %v1976_v44 = vmax.f32 %v1912_v14, 0.0  ;;  %v1980_v52 = vmax.f32 %v1916_v29, 0.0  ;;  %v1984_v1 = vmax.f32 %v1920_v3, 0.0  ;;  %v1988_v30 = vmax.f32 %v1924_v56, 0.0 }
 0x38d   :  { %v1992_v40 = vmax.f32 %v1928_v22, 0.0  ;;  %v1996_v31 = vmax.f32 %v1932_v32, 0.0  ;;  %v2000_v57 = vmax.f32 %v1936_v61, 0.0  ;;  %v2004_v20 = vmax.f32 %v1940_v51, 0.0 }
 0x38e   :  { %v2008_v37 = vmax.f32 %v1944_v23, 0.0  ;;  %v2012_v18 = vmax.f32 %v1948_v34, 0.0  ;;  %v2016_v63 = vmax.f32 %v1952_v12, 0.0  ;;  %v2020_v48 = vmax.f32 %v1956_v46, 0.0  ;;  %v1889_v21 = vpop.permute.xlu1 %1888 }
 0x38f   :  { %v2478_v53 = vpack.c.bf16 %v1960_v54, %v1960_v54  ;;  %v2482_v39 = vpack.c.bf16 %v1964_v58, %v1964_v58  ;;  %v2486_v45 = vpack.c.bf16 %v1968_v36, %v1968_v36  ;;  %v2490_v17 = vpack.c.bf16 %v1972_v55, %v1972_v55 }
 0x390   :  { %v2494_v38 = vpack.c.bf16 %v1976_v44, %v1976_v44  ;;  %v2498_v11 = vpack.c.bf16 %v1980_v52, %v1980_v52  ;;  %v2502_v27 = vpack.c.bf16 %v1984_v1, %v1984_v1  ;;  %v2506_v33 = vpack.c.bf16 %v1988_v30, %v1988_v30 }
 0x391   :  { %v2510_v5 = vpack.c.bf16 %v1992_v40, %v1992_v40  ;;  %v2514_v9 = vpack.c.bf16 %v1996_v31, %v1996_v31  ;;  %v2518_v0 = vpack.c.bf16 %v2000_v57, %v2000_v57  ;;  %v2522_v47 = vpack.c.bf16 %v2004_v20, %v2004_v20  ;;  %2281 = vst.msk [vmem:[%s4071_s4] sm:$0xf] %vm2280_vm2, %v2478_v53 }
 0x392   :  { %2285 = vst.msk [vmem:[%s4071_s4 + $0x10] sm:$0xf] %vm2280_vm2, %v2482_v39  ;;  %2289 = vst.msk [vmem:[%s4071_s4 + $0x20] sm:$0xf] %vm2280_vm2, %v2486_v45  ;;  %v2526_v43 = vpack.c.bf16 %v2008_v37, %v2008_v37  ;;  %v2530_v60 = vpack.c.bf16 %v2012_v18, %v2012_v18  ;;  %v2534_v4 = vpack.c.bf16 %v2016_v63, %v2016_v63  ;;  %v3809_v23 = vpop.permute.xlu1 %1805 }
 0x393   :  { %2293 = vst.msk [vmem:[%s4071_s4 + $0x30] sm:$0xf] %vm2280_vm2, %v2490_v17  ;;  %v2538_v59 = vpack.c.bf16 %v2020_v48, %v2020_v48  ;;  %2297 = vst.msk [vmem:[%s4071_s4 + $0x40] sm:$0xf] %vm2280_vm2, %v2494_v38  ;;  %v1898_v49 = vadd.f32 %v1889_v21, %v3680_v42  ;;  %v1902_v41 = vadd.f32 %v1889_v21, %v3683_v35  ;;  %v4316_v38 = vld [vmem:[#allocation15_spill] sm:$0xff] }
 0x394   :  { %2301 = vst.msk [vmem:[%s4071_s4 + $0x50] sm:$0xf] %vm2280_vm2, %v2498_v11  ;;  %2305 = vst.msk [vmem:[%s4071_s4 + $0x60] sm:$0xf] %vm2280_vm2, %v2502_v27  ;;  %v1906_v14 = vadd.f32 %v1889_v21, %v3686_v7  ;;  %v1910_v29 = vadd.f32 %v1889_v21, %v3689_v19  ;;  %v1914_v42 = vadd.f32 %v1889_v21, %v3692_v50  ;;  %v4317_v27 = vld [vmem:[#allocation2_spill] sm:$0xff] }
 0x395   :  { %2309 = vst.msk [vmem:[%s4071_s4 + $0x70] sm:$0xf] %vm2280_vm2, %v2506_v33  ;;  %2313 = vst.msk [vmem:[%s4071_s4 + $0x80] sm:$0xf] %vm2280_vm2, %v2510_v5  ;;  %v1918_v35 = vadd.f32 %v1889_v21, %v3695_v28  ;;  %v1922_v7 = vadd.f32 %v1889_v21, %v3698_v2  ;;  %v1926_v19 = vadd.f32 %v1889_v21, %v3701_v24  ;;  %v1962_v2 = vmax.f32 %v1898_v49, 0.0 }
 0x396   :  { %2317 = vst.msk [vmem:[%s4071_s4 + $0x90] sm:$0xf] %vm2280_vm2, %v2514_v9  ;;  %2321 = vst.msk [vmem:[%s4071_s4 + $0xa0] sm:$0xf] %vm2280_vm2, %v2518_v0  ;;  %v1930_v3 = vadd.f32 %v1889_v21, %v3704_v10  ;;  %v1934_v56 = vadd.f32 %v1889_v21, %v3707_v62  ;;  %v1938_v22 = vadd.f32 %v1889_v21, %v3710_v13  ;;  %v1966_v24 = vmax.f32 %v1902_v41, 0.0  ;;  %v1796_v20 = vpop.permute.xlu1 %1795  ;;  %v4319_v9 = vld [vmem:[#allocation3_spill] sm:$0xff] }
 0x397   :  { %2325 = vst.msk [vmem:[%s4071_s4 + $0xb0] sm:$0xf] %vm2280_vm2, %v2522_v47  ;;  %2329 = vst.msk [vmem:[%s4071_s4 + $0xc0] sm:$0xf] %vm2280_vm2, %v2526_v43  ;;  %v1942_v32 = vadd.f32 %v1889_v21, %v3713_v8  ;;  %v1946_v61 = vadd.f32 %v1889_v21, %v3716_v16  ;;  %v1950_v51 = vadd.f32 %v1889_v21, %v3719_v6  ;;  %v1970_v34 = vmax.f32 %v1906_v14, 0.0  ;;  %v4320_v47 = vld [vmem:[#allocation6_spill] sm:$0xff] }
 0x398   :  { %2333 = vst.msk [vmem:[%s4071_s4 + $0xd0] sm:$0xf] %vm2280_vm2, %v2530_v60  ;;  %2337 = vst.msk [vmem:[%s4071_s4 + $0xe0] sm:$0xf] %vm2280_vm2, %v2534_v4  ;;  %v1954_v50 = vadd.f32 %v1889_v21, %v3722_v26  ;;  %v1958_v28 = vadd.f32 %v1889_v21, %v3725_v15  ;;  %v1974_v10 = vmax.f32 %v1910_v29, 0.0  ;;  %v1978_v12 = vmax.f32 %v1914_v42, 0.0 }
 0x399   :  { %2341 = vst.msk [vmem:[%s4071_s4 + $0xf0] sm:$0xf] %vm2280_vm2, %v2538_v59  ;;  %v1982_v62 = vmax.f32 %v1918_v35, 0.0  ;;  %v1986_v46 = vmax.f32 %v1922_v7, 0.0  ;;  %v1990_v13 = vmax.f32 %v1926_v19, 0.0  ;;  %v1994_v54 = vmax.f32 %v1930_v3, 0.0 }
 0x39a   :  { %v1998_v8 = vmax.f32 %v1934_v56, 0.0  ;;  %v2002_v58 = vmax.f32 %v1938_v22, 0.0  ;;  %v2006_v16 = vmax.f32 %v1942_v32, 0.0  ;;  %v2010_v36 = vmax.f32 %v1946_v61, 0.0  ;;  %v4318_v21 = vld [vmem:[#allocation19_spill] sm:$0xff]  ;;  %v4321_v60 = vld [vmem:[#allocation9_spill] sm:$0xff] }
 0x39b   :  { %v2014_v6 = vmax.f32 %v1950_v51, 0.0  ;;  %v2018_v55 = vmax.f32 %v1954_v50, 0.0  ;;  %v2022_v26 = vmax.f32 %v1958_v28, 0.0  ;;  %v2480_v44 = vpack.c.bf16 %v1962_v2, %v1962_v2  ;;  %v4322_v59 = vld [vmem:[#allocation26_spill] sm:$0xff]  ;;  %v4324_v29 = vld [vmem:[#allocation23_spill] sm:$0xff]  ;;  %v4327_v56 = vld [vmem:[#allocation16_spill] sm:$0xff] }
 0x39c   :  { %v2484_v15 = vpack.c.bf16 %v1966_v24, %v1966_v24  ;;  %v2488_v52 = vpack.c.bf16 %v1970_v34, %v1970_v34  ;;  %v2492_v1 = vpack.c.bf16 %v1974_v10, %v1974_v10  ;;  %v2496_v30 = vpack.c.bf16 %v1978_v12, %v1978_v12  ;;  %v4323_v41 = vld [vmem:[#allocation10_spill] sm:$0xff]  ;;  %v4326_v19 = vld [vmem:[#allocation11_spill] sm:$0xff]  ;;  %v4328_v32 = vld [vmem:[#allocation20_spill] sm:$0xff] }
 0x39d   :  { %v2500_v40 = vpack.c.bf16 %v1982_v62, %v1982_v62  ;;  %v2504_v31 = vpack.c.bf16 %v1986_v46, %v1986_v46  ;;  %v2508_v57 = vpack.c.bf16 %v1990_v13, %v1990_v13  ;;  %v2512_v37 = vpack.c.bf16 %v1994_v54, %v1994_v54  ;;  %2283 = vst.msk [vmem:[%s4071_s4 + $0x8] sm:$0xf] %vm2280_vm2, %v2480_v44  ;;  %v4325_v35 = vld [vmem:[#allocation30_spill] sm:$0xff]  ;;  %v4329_v51 = vld [vmem:[#allocation21_spill] sm:$0xff]  ;;  %v4330_v28 = vld [vmem:[#allocation24_spill] sm:$0xff] }
 0x39e   :  { %v2516_v18 = vpack.c.bf16 %v1998_v8, %v1998_v8  ;;  %v2520_v63 = vpack.c.bf16 %v2002_v58, %v2002_v58  ;;  %v2524_v48 = vpack.c.bf16 %v2006_v16, %v2006_v16  ;;  %2287 = vst.msk [vmem:[%s4071_s4 + $0x18] sm:$0xf] %vm2280_vm2, %v2484_v15  ;;  %2291 = vst.msk [vmem:[%s4071_s4 + $0x28] sm:$0xf] %vm2280_vm2, %v2488_v52  ;;  %v4331_v24 = vld [vmem:[#allocation28_spill] sm:$0xff] }
 0x39f   :  { %2295 = vst.msk [vmem:[%s4071_s4 + $0x38] sm:$0xf] %vm2280_vm2, %v2492_v1  ;;  %v2528_v53 = vpack.c.bf16 %v2010_v36, %v2010_v36  ;;  %v2532_v39 = vpack.c.bf16 %v2014_v6, %v2014_v6  ;;  %v2536_v45 = vpack.c.bf16 %v2018_v55, %v2018_v55  ;;  %v2540_v17 = vpack.c.bf16 %v2022_v26, %v2022_v26 }
 0x3a0   :  { %2299 = vst.msk [vmem:[%s4071_s4 + $0x48] sm:$0xf] %vm2280_vm2, %v2496_v30  ;;  %2303 = vst.msk [vmem:[%s4071_s4 + $0x58] sm:$0xf] %vm2280_vm2, %v2500_v40  ;;  %v1809_v11 = vmul.f32 %v1796_v20, %v4316_v38  ;;  %v1813_v33 = vmul.f32 %v1796_v20, %v4317_v27  ;;  %v1817_v5 = vmul.f32 %v1796_v20, %v4318_v21 }
 0x3a1   :  { %2307 = vst.msk [vmem:[%s4071_s4 + $0x68] sm:$0xf] %vm2280_vm2, %v2504_v31  ;;  %2311 = vst.msk [vmem:[%s4071_s4 + $0x78] sm:$0xf] %vm2280_vm2, %v2508_v57  ;;  %v1821_v0 = vmul.f32 %v1796_v20, %v4319_v9  ;;  %v1825_v43 = vmul.f32 %v1796_v20, %v4320_v47  ;;  %v1829_v4 = vmul.f32 %v1796_v20, %v4321_v60 }
 0x3a2   :  { %2315 = vst.msk [vmem:[%s4071_s4 + $0x88] sm:$0xf] %vm2280_vm2, %v2512_v37  ;;  %2319 = vst.msk [vmem:[%s4071_s4 + $0x98] sm:$0xf] %vm2280_vm2, %v2516_v18  ;;  %v1833_v49 = vmul.f32 %v1796_v20, %v4322_v59  ;;  %v1837_v14 = vmul.f32 %v1796_v20, %v4323_v41  ;;  %v1841_v42 = vmul.f32 %v1796_v20, %v4324_v29 }
 0x3a3   :  { %2323 = vst.msk [vmem:[%s4071_s4 + $0xa8] sm:$0xf] %vm2280_vm2, %v2520_v63  ;;  %2327 = vst.msk [vmem:[%s4071_s4 + $0xb8] sm:$0xf] %vm2280_vm2, %v2524_v48  ;;  %v1845_v7 = vmul.f32 %v1796_v20, %v4325_v35  ;;  %v1849_v3 = vmul.f32 %v1796_v20, %v4326_v19  ;;  %v1853_v22 = vmul.f32 %v1796_v20, %v4327_v56 }
 0x3a4   :  { %2331 = vst.msk [vmem:[%s4071_s4 + $0xc8] sm:$0xf] %vm2280_vm2, %v2528_v53  ;;  %2335 = vst.msk [vmem:[%s4071_s4 + $0xd8] sm:$0xf] %vm2280_vm2, %v2532_v39  ;;  %v1857_v61 = vmul.f32 %v1796_v20, %v4328_v32  ;;  %v1861_v50 = vmul.f32 %v1796_v20, %v4329_v51  ;;  %v1865_v2 = vmul.f32 %v1796_v20, %v4330_v28 }
 0x3a5   :  { %2339 = vst.msk [vmem:[%s4071_s4 + $0xe8] sm:$0xf] %vm2280_vm2, %v2536_v45  ;;  %2343 = vst.msk [vmem:[%s4071_s4 + $0xf8] sm:$0xf] %vm2280_vm2, %v2540_v17  ;;  %v1869_v34 = vmul.f32 %v1796_v20, %v4331_v24  ;;  %v1897_v10 = vadd.f32 %v3727_v25, %v1809_v11  ;;  %v1901_v12 = vadd.f32 %v3727_v25, %v1813_v33 }
 0x3a6   :  { %v1905_v62 = vadd.f32 %v3727_v25, %v1817_v5  ;;  %v1909_v46 = vadd.f32 %v3727_v25, %v1821_v0  ;;  %v1913_v13 = vadd.f32 %v3727_v25, %v1825_v43  ;;  %v1917_v54 = vadd.f32 %v3727_v25, %v1829_v4 }
 0x3a7   :  { %v1921_v8 = vadd.f32 %v3727_v25, %v1833_v49  ;;  %v1925_v58 = vadd.f32 %v3727_v25, %v1837_v14  ;;  %v1929_v16 = vadd.f32 %v3727_v25, %v1841_v42  ;;  %v1933_v36 = vadd.f32 %v3727_v25, %v1845_v7  ;;  %v4332_v42 = vld [vmem:[#allocation54_spill] sm:$0xff]  ;;  %v4333_v7 = vld [vmem:[#allocation55_spill] sm:$0xff] }
 0x3a8   :  { %v1937_v6 = vadd.f32 %v3727_v25, %v1849_v3  ;;  %v1941_v55 = vadd.f32 %v3727_v25, %v1853_v22  ;;  %v1945_v26 = vadd.f32 %v3727_v25, %v1857_v61  ;;  %v1949_v44 = vadd.f32 %v3727_v25, %v1861_v50  ;;  %v4334_v3 = vld [vmem:[#allocation56_spill] sm:$0xff]  ;;  %v4335_v22 = vld [vmem:[#allocation57_spill] sm:$0xff]  ;;  %v4336_v61 = vld [vmem:[#allocation58_spill] sm:$0xff] }
 0x3a9   :  { %v1953_v15 = vadd.f32 %v3727_v25, %v1865_v2  ;;  %v1957_v52 = vadd.f32 %v3727_v25, %v1869_v34  ;;  %v1961_v1 = vmax.f32 %v1897_v10, 0.0  ;;  %v1965_v30 = vmax.f32 %v1901_v12, 0.0  ;;  %v4337_v50 = vld [vmem:[#allocation59_spill] sm:$0xff]  ;;  %v4338_v2 = vld [vmem:[#allocation14_spill] sm:$0xff]  ;;  %v1894_v12 = vpop.permute.xlu1 %1893 }
 0x3aa   :  { %v1969_v40 = vmax.f32 %v1905_v62, 0.0  ;;  %v1973_v31 = vmax.f32 %v1909_v46, 0.0  ;;  %v1977_v57 = vmax.f32 %v1913_v13, 0.0  ;;  %v1981_v20 = vmax.f32 %v1917_v54, 0.0  ;;  %v4339_v34 = vld [vmem:[#allocation18_spill] sm:$0xff]  ;;  %v4340_v62 = vld [vmem:[#allocation5_spill] sm:$0xff] }
 0x3ab   :  { %v1985_v37 = vmax.f32 %v1921_v8, 0.0  ;;  %v1989_v18 = vmax.f32 %v1925_v58, 0.0  ;;  %v1993_v63 = vmax.f32 %v1929_v16, 0.0  ;;  %v1997_v48 = vmax.f32 %v1933_v36, 0.0  ;;  %v4341_v13 = vld [vmem:[#allocation7_spill] sm:$0xff]  ;;  %v4342_v8 = vld [vmem:[#allocation12_spill] sm:$0xff] }
 0x3ac   :  { %v2001_v53 = vmax.f32 %v1937_v6, 0.0  ;;  %v2005_v39 = vmax.f32 %v1941_v55, 0.0  ;;  %v2009_v45 = vmax.f32 %v1945_v26, 0.0  ;;  %v2013_v17 = vmax.f32 %v1949_v44, 0.0  ;;  %v4343_v16 = vld [vmem:[#allocation13_spill] sm:$0xff]  ;;  %v4344_v6 = vld [vmem:[#allocation34_spill] sm:$0xff] }
 0x3ad   :  { %v2017_v38 = vmax.f32 %v1953_v15, 0.0  ;;  %v2021_v11 = vmax.f32 %v1957_v52, 0.0  ;;  %v2479_v27 = vpack.c.bf16 %v1961_v1, %v1961_v1  ;;  %v2483_v33 = vpack.c.bf16 %v1965_v30, %v1965_v30  ;;  %v4345_v26 = vld [vmem:[#allocation32_spill] sm:$0xff]  ;;  %v4346_v15 = vld [vmem:[#allocation33_spill] sm:$0xff] }
 0x3ae   :  { %v2487_v21 = vpack.c.bf16 %v1969_v40, %v1969_v40  ;;  %v2491_v25 = vpack.c.bf16 %v1973_v31, %v1973_v31  ;;  %v2495_v5 = vpack.c.bf16 %v1977_v57, %v1977_v57  ;;  %v2499_v9 = vpack.c.bf16 %v1981_v20, %v1981_v20  ;;  %v4347_v1 = vld [vmem:[#allocation29_spill] sm:$0xff] }
 0x3af   :  { %v2503_v0 = vpack.c.bf16 %v1985_v37, %v1985_v37  ;;  %v2507_v47 = vpack.c.bf16 %v1989_v18, %v1989_v18  ;;  %v2511_v43 = vpack.c.bf16 %v1993_v63, %v1993_v63  ;;  %v2515_v60 = vpack.c.bf16 %v1997_v48, %v1997_v48  ;;  %2282 = vst.msk [vmem:[%s4071_s4 + $0x4] sm:$0xf] %vm2280_vm2, %v2479_v27 }
 0x3b0   :  { %v2519_v4 = vpack.c.bf16 %v2001_v53, %v2001_v53  ;;  %v2523_v59 = vpack.c.bf16 %v2005_v39, %v2005_v39  ;;  %2286 = vst.msk [vmem:[%s4071_s4 + $0x14] sm:$0xf] %vm2280_vm2, %v2483_v33  ;;  %2290 = vst.msk [vmem:[%s4071_s4 + $0x24] sm:$0xf] %vm2280_vm2, %v2487_v21  ;;  %v2527_v49 = vpack.c.bf16 %v2009_v45, %v2009_v45 }
 0x3b1   :  { %2294 = vst.msk [vmem:[%s4071_s4 + $0x34] sm:$0xf] %vm2280_vm2, %v2491_v25  ;;  %v2531_v41 = vpack.c.bf16 %v2013_v17, %v2013_v17  ;;  %v2535_v14 = vpack.c.bf16 %v2017_v38, %v2017_v38  ;;  %v2539_v29 = vpack.c.bf16 %v2021_v11, %v2021_v11  ;;  %2298 = vst.msk [vmem:[%s4071_s4 + $0x44] sm:$0xf] %vm2280_vm2, %v2495_v5 }
 0x3b2   :  { %2302 = vst.msk [vmem:[%s4071_s4 + $0x54] sm:$0xf] %vm2280_vm2, %v2499_v9  ;;  %2306 = vst.msk [vmem:[%s4071_s4 + $0x64] sm:$0xf] %vm2280_vm2, %v2503_v0  ;;  %v1811_v35 = vmul.f32 %v3809_v23, %v4332_v42  ;;  %v1815_v19 = vmul.f32 %v3809_v23, %v4333_v7  ;;  %v1819_v56 = vmul.f32 %v3809_v23, %v4334_v3 }
 0x3b3   :  { %2310 = vst.msk [vmem:[%s4071_s4 + $0x74] sm:$0xf] %vm2280_vm2, %v2507_v47  ;;  %2314 = vst.msk [vmem:[%s4071_s4 + $0x84] sm:$0xf] %vm2280_vm2, %v2511_v43  ;;  %v1823_v32 = vmul.f32 %v3809_v23, %v4335_v22  ;;  %v1827_v51 = vmul.f32 %v3809_v23, %v4336_v61  ;;  %v1831_v28 = vmul.f32 %v3809_v23, %v4337_v50 }
 0x3b4   :  { %2318 = vst.msk [vmem:[%s4071_s4 + $0x94] sm:$0xf] %vm2280_vm2, %v2515_v60  ;;  %2322 = vst.msk [vmem:[%s4071_s4 + $0xa4] sm:$0xf] %vm2280_vm2, %v2519_v4  ;;  %v1835_v24 = vmul.f32 %v3809_v23, %v4338_v2  ;;  %v1839_v10 = vmul.f32 %v3809_v23, %v4339_v34  ;;  %v1843_v46 = vmul.f32 %v3809_v23, %v4340_v62 }
 0x3b5   :  { %2326 = vst.msk [vmem:[%s4071_s4 + $0xb4] sm:$0xf] %vm2280_vm2, %v2523_v59  ;;  %2330 = vst.msk [vmem:[%s4071_s4 + $0xc4] sm:$0xf] %vm2280_vm2, %v2527_v49  ;;  %v1847_v54 = vmul.f32 %v3809_v23, %v4341_v13  ;;  %v1851_v58 = vmul.f32 %v3809_v23, %v4342_v8  ;;  %v1855_v36 = vmul.f32 %v3809_v23, %v4343_v16 }
 0x3b6   :  { %2334 = vst.msk [vmem:[%s4071_s4 + $0xd4] sm:$0xf] %vm2280_vm2, %v2531_v41  ;;  %2338 = vst.msk [vmem:[%s4071_s4 + $0xe4] sm:$0xf] %vm2280_vm2, %v2535_v14  ;;  %v1859_v55 = vmul.f32 %v3809_v23, %v4344_v6  ;;  %v1863_v44 = vmul.f32 %v3809_v23, %v4345_v26  ;;  %v1867_v52 = vmul.f32 %v3809_v23, %v4346_v15 }
 0x3b7   :  { %2342 = vst.msk [vmem:[%s4071_s4 + $0xf4] sm:$0xf] %vm2280_vm2, %v2539_v29  ;;  %v1871_v30 = vmul.f32 %v3809_v23, %v4347_v1  ;;  %v1899_v40 = vadd.f32 %v1894_v12, %v1811_v35  ;;  %v1903_v31 = vadd.f32 %v1894_v12, %v1815_v19  ;;  %v1907_v57 = vadd.f32 %v1894_v12, %v1819_v56 }
 0x3b8   :  { %v1911_v20 = vadd.f32 %v1894_v12, %v1823_v32  ;;  %v1915_v37 = vadd.f32 %v1894_v12, %v1827_v51  ;;  %v1919_v18 = vadd.f32 %v1894_v12, %v1831_v28  ;;  %v1923_v63 = vadd.f32 %v1894_v12, %v1835_v24 }
 0x3b9   :  { %v1927_v48 = vadd.f32 %v1894_v12, %v1839_v10  ;;  %v1931_v53 = vadd.f32 %v1894_v12, %v1843_v46  ;;  %v1935_v39 = vadd.f32 %v1894_v12, %v1847_v54  ;;  %v1939_v45 = vadd.f32 %v1894_v12, %v1851_v58 }
 0x3ba   :  { %v1943_v17 = vadd.f32 %v1894_v12, %v1855_v36  ;;  %v1947_v38 = vadd.f32 %v1894_v12, %v1859_v55  ;;  %v1951_v11 = vadd.f32 %v1894_v12, %v1863_v44  ;;  %v1955_v27 = vadd.f32 %v1894_v12, %v1867_v52 }
 0x3bb   :  { %v1959_v33 = vadd.f32 %v1894_v12, %v1871_v30  ;;  %v1963_v21 = vmax.f32 %v1899_v40, 0.0  ;;  %v1967_v25 = vmax.f32 %v1903_v31, 0.0  ;;  %v1971_v5 = vmax.f32 %v1907_v57, 0.0 }
 0x3bc   :  { %v1975_v23 = vmax.f32 %v1911_v20, 0.0  ;;  %v1979_v9 = vmax.f32 %v1915_v37, 0.0  ;;  %v1983_v0 = vmax.f32 %v1919_v18, 0.0  ;;  %v1987_v47 = vmax.f32 %v1923_v63, 0.0 }
 0x3bd   :  { %v1991_v43 = vmax.f32 %v1927_v48, 0.0  ;;  %v1995_v60 = vmax.f32 %v1931_v53, 0.0  ;;  %v1999_v4 = vmax.f32 %v1935_v39, 0.0  ;;  %v2003_v59 = vmax.f32 %v1939_v45, 0.0 }
 0x3be   :  { %v2007_v49 = vmax.f32 %v1943_v17, 0.0  ;;  %v2011_v41 = vmax.f32 %v1947_v38, 0.0  ;;  %v2015_v14 = vmax.f32 %v1951_v11, 0.0  ;;  %v2019_v29 = vmax.f32 %v1955_v27, 0.0 }
 0x3bf   :  { %v2023_v42 = vmax.f32 %v1959_v33, 0.0  ;;  %v2481_v35 = vpack.c.bf16 %v1963_v21, %v1963_v21  ;;  %v2485_v7 = vpack.c.bf16 %v1967_v25, %v1967_v25  ;;  %v2489_v19 = vpack.c.bf16 %v1971_v5, %v1971_v5 }
 0x3c0   :  { %v2493_v3 = vpack.c.bf16 %v1975_v23, %v1975_v23  ;;  %v2497_v56 = vpack.c.bf16 %v1979_v9, %v1979_v9  ;;  %v2501_v22 = vpack.c.bf16 %v1983_v0, %v1983_v0  ;;  %v2505_v32 = vpack.c.bf16 %v1987_v47, %v1987_v47 }
 0x3c1   :  { %v2509_v61 = vpack.c.bf16 %v1991_v43, %v1991_v43  ;;  %v2513_v51 = vpack.c.bf16 %v1995_v60, %v1995_v60  ;;  %v2517_v50 = vpack.c.bf16 %v1999_v4, %v1999_v4  ;;  %v2521_v28 = vpack.c.bf16 %v2003_v59, %v2003_v59  ;;  %2284 = vst.msk [vmem:[%s4071_s4 + $0xc] sm:$0xf] %vm2280_vm2, %v2481_v35 }
 0x3c2   :  { %v2525_v2 = vpack.c.bf16 %v2007_v49, %v2007_v49  ;;  %2288 = vst.msk [vmem:[%s4071_s4 + $0x1c] sm:$0xf] %vm2280_vm2, %v2485_v7  ;;  %2292 = vst.msk [vmem:[%s4071_s4 + $0x2c] sm:$0xf] %vm2280_vm2, %v2489_v19  ;;  %v2529_v24 = vpack.c.bf16 %v2011_v41, %v2011_v41  ;;  %v2533_v34 = vpack.c.bf16 %v2015_v14, %v2015_v14 }
 0x3c3   :  { %2296 = vst.msk [vmem:[%s4071_s4 + $0x3c] sm:$0xf] %vm2280_vm2, %v2493_v3  ;;  %v2537_v10 = vpack.c.bf16 %v2019_v29, %v2019_v29  ;;  %v2541_v12 = vpack.c.bf16 %v2023_v42, %v2023_v42  ;;  %2300 = vst.msk [vmem:[%s4071_s4 + $0x4c] sm:$0xf] %vm2280_vm2, %v2497_v56 }
 0x3c4   :  { %2304 = vst.msk [vmem:[%s4071_s4 + $0x5c] sm:$0xf] %vm2280_vm2, %v2501_v22  ;;  %2308 = vst.msk [vmem:[%s4071_s4 + $0x6c] sm:$0xf] %vm2280_vm2, %v2505_v32 }
 0x3c5   :  { %2312 = vst.msk [vmem:[%s4071_s4 + $0x7c] sm:$0xf] %vm2280_vm2, %v2509_v61  ;;  %2316 = vst.msk [vmem:[%s4071_s4 + $0x8c] sm:$0xf] %vm2280_vm2, %v2513_v51 }
 0x3c6   :  { %2320 = vst.msk [vmem:[%s4071_s4 + $0x9c] sm:$0xf] %vm2280_vm2, %v2517_v50  ;;  %2324 = vst.msk [vmem:[%s4071_s4 + $0xac] sm:$0xf] %vm2280_vm2, %v2521_v28 }
 0x3c7   :  { %2328 = vst.msk [vmem:[%s4071_s4 + $0xbc] sm:$0xf] %vm2280_vm2, %v2525_v2  ;;  %2332 = vst.msk [vmem:[%s4071_s4 + $0xcc] sm:$0xf] %vm2280_vm2, %v2529_v24 }
 0x3c8   :  { %2336 = vst.msk [vmem:[%s4071_s4 + $0xdc] sm:$0xf] %vm2280_vm2, %v2533_v34  ;;  %2340 = vst.msk [vmem:[%s4071_s4 + $0xec] sm:$0xf] %vm2280_vm2, %v2537_v10 }
 0x3c9   :  { %2344 = vst.msk [vmem:[%s4071_s4 + $0xfc] sm:$0xf] %vm2280_vm2, %v2541_v12 }

// kernel: generator_forward.5
= control target key start
LH: loop header
LB: loop body
LE: loop exit
PB: predicated region body
PF: predicated region fallthrough
CT: control target
= control target key end

     0   :  { %v863_v0 = vmov 0.0   ;;  %vm864_vm0 = vmmov 0   ;;  %vm470_vm1 = vcmask 261120   ;;  %vm637_vm2 = vcmask 257024   ;;  %s1134_s0 = inlined_call_operand.vmem [shape: bf16[4,128,32], index: 0, kind: input, shape index: {}]   ;;  %s1135_s1 = inlined_call_operand.vmem [shape: bf16[4,16,128], index: 1, kind: input, shape index: {}]   ;;  %s1136_s3 = inlined_call_operand.vmem [shape: f32[1,16,1], index: 3, kind: input, shape index: {}]   ;;  %s1137_s2 = inlined_call_operand.vmem [shape: f32[1,16,1], index: 2, kind: input, shape index: {}]   ;;  %s1138_s4 = inlined_call_operand.vmem [shape: bf16[4,16,32], index: 4, kind: output, shape index: {}]  }
   0x1   :  { %738 = vmatprep.subr.bf16.mxu0 %v863_v0  ;;  %758 = vmatprep.subr.bf16.mxu1 %v863_v0  ;;  %v823_v1 = vld [vmem:[%s1134_s0] sm:$0xff]   ;;  %v825_v3 = vld [vmem:[%s1134_s0 + $0x8] sm:$0xff]   ;;  %v827_v5 = vld [vmem:[%s1134_s0 + $0x10] sm:$0xff]  }
   0x2   :  { %v824_v2 = vld [vmem:[%s1134_s0 + $0x40] sm:$0xff]   ;;  %754 = vmatprep.mubr.msk.bf16.mxu0 %vm864_vm0, %v863_v0  ;;  %774 = vmatprep.mubr.msk.bf16.mxu1 %vm864_vm0, %v863_v0  ;;  %v826_v4 = vld [vmem:[%s1134_s0 + $0x48] sm:$0xff]   ;;  %v828_v6 = vld [vmem:[%s1134_s0 + $0x50] sm:$0xff]  }
   0x3   :  { %739 = vmatpush3.bf16.msra.mxu0 %v823_v1  ;;  %759 = vmatpush3.bf16.msra.mxu1 %v824_v2  ;;  %v829_v7 = vld [vmem:[%s1134_s0 + $0x18] sm:$0xff]   ;;  %v831_v9 = vld [vmem:[%s1134_s0 + $0x20] sm:$0xff]   ;;  %v833_v11 = vld [vmem:[%s1134_s0 + $0x28] sm:$0xff]  }
   0x4   :  { %740 = vmatprep.subr.bf16.mxu0 %v863_v0  ;;  %760 = vmatprep.subr.bf16.mxu1 %v863_v0  ;;  %v830_v8 = vld [vmem:[%s1134_s0 + $0x58] sm:$0xff]   ;;  %v832_v10 = vld [vmem:[%s1134_s0 + $0x60] sm:$0xff]   ;;  %v834_v12 = vld [vmem:[%s1134_s0 + $0x68] sm:$0xff]  }
   0x5   :  { %v835_v13 = vld [vmem:[%s1134_s0 + $0x30] sm:$0xff]   ;;  %v837_v15 = vld [vmem:[%s1134_s0 + $0x38] sm:$0xff]   ;;  %v839_v17 = vld [vmem:[%s1135_s1] sm:$0xff]  }
   0x6   :  { %v836_v14 = vld [vmem:[%s1134_s0 + $0x70] sm:$0xff]   ;;  %v838_v16 = vld [vmem:[%s1134_s0 + $0x78] sm:$0xff]   ;;  %v840_v18 = vld [vmem:[%s1135_s1 + $0x8] sm:$0xff]  }
   0x7   :  { %741 = vmatpush3.bf16.msra.mxu0 %v825_v3  ;;  %761 = vmatpush3.bf16.msra.mxu1 %v826_v4  ;;  %v841_v19 = vld [vmem:[%s1134_s0 + $0x80] sm:$0xff]   ;;  %v843_v21 = vld [vmem:[%s1134_s0 + $0x88] sm:$0xff]   ;;  %v845_v23 = vld [vmem:[%s1134_s0 + $0x90] sm:$0xff]  }
   0x8   :  { %742 = vmatprep.subr.bf16.mxu0 %v863_v0  ;;  %762 = vmatprep.subr.bf16.mxu1 %v863_v0  ;;  %v842_v20 = vld [vmem:[%s1134_s0 + $0xc0] sm:$0xff]   ;;  %v844_v22 = vld [vmem:[%s1134_s0 + $0xc8] sm:$0xff]   ;;  %v846_v24 = vld [vmem:[%s1134_s0 + $0xd0] sm:$0xff]  }
   0x9   :  { %v847_v25 = vld [vmem:[%s1134_s0 + $0x98] sm:$0xff]   ;;  %v849_v27 = vld [vmem:[%s1134_s0 + $0xa0] sm:$0xff]   ;;  %v851_v29 = vld [vmem:[%s1134_s0 + $0xa8] sm:$0xff]  }
   0xa   :  { %v848_v26 = vld [vmem:[%s1134_s0 + $0xd8] sm:$0xff]   ;;  %v850_v28 = vld [vmem:[%s1134_s0 + $0xe0] sm:$0xff]   ;;  %v852_v30 = vld [vmem:[%s1134_s0 + $0xe8] sm:$0xff]  }
   0xb   :  { %743 = vmatpush3.bf16.msra.mxu0 %v827_v5  ;;  %763 = vmatpush3.bf16.msra.mxu1 %v828_v6  ;;  %v853_v31 = vld [vmem:[%s1134_s0 + $0xb0] sm:$0xff]   ;;  %v855_v33 = vld [vmem:[%s1134_s0 + $0xb8] sm:$0xff]  }
   0xc   :  { %744 = vmatprep.subr.bf16.mxu0 %v863_v0  ;;  %764 = vmatprep.subr.bf16.mxu1 %v863_v0  ;;  %v854_v32 = vld [vmem:[%s1134_s0 + $0xf0] sm:$0xff]   ;;  %v856_v34 = vld [vmem:[%s1134_s0 + $0xf8] sm:$0xff]  }
   0xd   :  { %v857_v35 = vld [vmem:[%s1135_s1 + $0x10] sm:$0xff]   ;;  %v858_v36 = vld [vmem:[%s1135_s1 + $0x18] sm:$0xff]  }
   0xf   :  { %745 = vmatpush3.bf16.msra.mxu0 %v829_v7  ;;  %765 = vmatpush3.bf16.msra.mxu1 %v830_v8 }
  0x10   :  { %746 = vmatprep.subr.bf16.mxu0 %v863_v0  ;;  %766 = vmatprep.subr.bf16.mxu1 %v863_v0 }
  0x13   :  { %747 = vmatpush3.bf16.msra.mxu0 %v831_v9  ;;  %767 = vmatpush3.bf16.msra.mxu1 %v832_v10 }
  0x14   :  { %748 = vmatprep.subr.bf16.mxu0 %v863_v0  ;;  %768 = vmatprep.subr.bf16.mxu1 %v863_v0 }
  0x17   :  { %749 = vmatpush3.bf16.msra.mxu0 %v833_v11  ;;  %769 = vmatpush3.bf16.msra.mxu1 %v834_v12 }
  0x18   :  { %750 = vmatprep.subr.bf16.mxu0 %v863_v0  ;;  %770 = vmatprep.subr.bf16.mxu1 %v863_v0 }
  0x1b   :  { %751 = vmatpush3.bf16.msra.mxu0 %v835_v13  ;;  %771 = vmatpush3.bf16.msra.mxu1 %v836_v14 }
  0x1c   :  { %752 = vmatprep.subr.bf16.mxu0 %v863_v0  ;;  %772 = vmatprep.subr.bf16.mxu1 %v863_v0 }
  0x1f   :  { %753 = vmatpush3.bf16.msra.mxu0 %v837_v15  ;;  %773 = vmatpush3.bf16.msra.mxu1 %v838_v16 }
  0x20   :  { %778 = vmatprep.subr.bf16.mxu0 %v863_v0  ;;  %798 = vmatprep.subr.bf16.mxu1 %v863_v0 }
  0x22   :  { %755 = vmatmul.mubr.bf16.vlgmr.msra.gmra.mrb[0].mxu0 %v839_v17  ;;  %775 = vmatmul.mubr.bf16.vlgmr.msra.gmra.mrb[0].mxu1 %v840_v18 }
  0x23   :  { %779 = vmatpush3.bf16.msra.mxu0 %v841_v19  ;;  %799 = vmatpush3.bf16.msra.mxu1 %v842_v20 }
  0x24   :  { %780 = vmatprep.subr.bf16.mxu0 %v863_v0  ;;  %800 = vmatprep.subr.bf16.mxu1 %v863_v0 }
  0x25   :  { %794 = vmatprep.mubr.msk.bf16.mxu0 %vm864_vm0, %v863_v0  ;;  %814 = vmatprep.mubr.msk.bf16.mxu1 %vm864_vm0, %v863_v0 }
  0x27   :  { %781 = vmatpush3.bf16.msra.mxu0 %v843_v21  ;;  %801 = vmatpush3.bf16.msra.mxu1 %v844_v22 }
  0x28   :  { %782 = vmatprep.subr.bf16.mxu0 %v863_v0  ;;  %802 = vmatprep.subr.bf16.mxu1 %v863_v0 }
  0x2b   :  { %783 = vmatpush3.bf16.msra.mxu0 %v845_v23  ;;  %803 = vmatpush3.bf16.msra.mxu1 %v846_v24 }
  0x2c   :  { %784 = vmatprep.subr.bf16.mxu0 %v863_v0  ;;  %804 = vmatprep.subr.bf16.mxu1 %v863_v0 }
  0x2f   :  { %785 = vmatpush3.bf16.msra.mxu0 %v847_v25  ;;  %805 = vmatpush3.bf16.msra.mxu1 %v848_v26 }
  0x30   :  { %786 = vmatprep.subr.bf16.mxu0 %v863_v0  ;;  %806 = vmatprep.subr.bf16.mxu1 %v863_v0 }
  0x33   :  { %787 = vmatpush3.bf16.msra.mxu0 %v849_v27  ;;  %807 = vmatpush3.bf16.msra.mxu1 %v850_v28 }
  0x34   :  { %788 = vmatprep.subr.bf16.mxu0 %v863_v0  ;;  %808 = vmatprep.subr.bf16.mxu1 %v863_v0 }
  0x37   :  { %789 = vmatpush3.bf16.msra.mxu0 %v851_v29  ;;  %809 = vmatpush3.bf16.msra.mxu1 %v852_v30 }
  0x38   :  { %790 = vmatprep.subr.bf16.mxu0 %v863_v0  ;;  %810 = vmatprep.subr.bf16.mxu1 %v863_v0 }
  0x3b   :  { %791 = vmatpush3.bf16.msra.mxu0 %v853_v31  ;;  %811 = vmatpush3.bf16.msra.mxu1 %v854_v32 }
  0x3c   :  { %792 = vmatprep.subr.bf16.mxu0 %v863_v0  ;;  %812 = vmatprep.subr.bf16.mxu1 %v863_v0 }
  0x3f   :  { %793 = vmatpush3.bf16.msra.mxu0 %v855_v33  ;;  %813 = vmatpush3.bf16.msra.mxu1 %v856_v34 }
  0x42   :  { %795 = vmatmul.mubr.bf16.vlgmr.msra.gmra.mrb[4].mxu0 %v857_v35  ;;  %815 = vmatmul.mubr.bf16.vlgmr.msra.gmra.mrb[4].mxu1 %v858_v36 }
  0xf5   :  { %v178_v37 = vpop.f32.mrb[0].mxu0  ;;  %v273_v38 = vpop.f32.mrb[0].mxu1 }
  0xf6   :  { %v756_v39 = vpop.f32.mrb[1].mxu0  ;;  %v471_v40 = vsel %vm470_vm1, %v178_v37, 0.0  ;;  %v477_v41 = vsel %vm470_vm1, %v273_v38, 0.0  ;;  %v776_v43 = vpop.f32.mrb[1].mxu1 }
  0xf7   :  { %472 = vadd.xlane.f32.xlu0 %v471_v40  ;;  %v181_v42 = vpop.f32.mrb[2].mxu0  ;;  %478 = vadd.xlane.f32.xlu1 %v477_v41  ;;  %v276_v45 = vpop.f32.mrb[2].mxu1 }
  0xf8   :  { %v757_v44 = vpop.f32.mrb[3].mxu0  ;;  %v777_v46 = vpop.f32.mrb[3].mxu1  ;;  %v480_v47 = vsel %vm470_vm1, %v276_v45, 0.0  ;;  %v474_v48 = vsel %vm470_vm1, %v181_v42, 0.0 }
  0xfb   :  { %475 = vadd.xlane.f32.xlu0 %v474_v48  ;;  %481 = vadd.xlane.f32.xlu1 %v480_v47 }
 0x115   :  { %v368_v49 = vpop.f32.mrb[4].mxu0  ;;  %v463_v51 = vpop.f32.mrb[4].mxu1 }
 0x116   :  { %v796_v50 = vpop.f32.mrb[5].mxu0  ;;  %v483_v52 = vsel %vm470_vm1, %v368_v49, 0.0  ;;  %v816_v53 = vpop.f32.mrb[5].mxu1  ;;  %v489_v58 = vsel %vm470_vm1, %v463_v51, 0.0 }
 0x117   :  { %484 = vadd.xlane.f32.xlu0 %v483_v52  ;;  %v371_v54 = vpop.f32.mrb[6].mxu0  ;;  %v466_v56 = vpop.f32.mrb[6].mxu1 }
 0x118   :  { %v797_v55 = vpop.f32.mrb[7].mxu0  ;;  %v486_v57 = vsel %vm470_vm1, %v371_v54, 0.0  ;;  %v817_v59 = vpop.f32.mrb[7].mxu1  ;;  %v492_v60 = vsel %vm470_vm1, %v466_v56, 0.0 }
 0x119   :  { %487 = vadd.xlane.f32.xlu1 %v486_v57  ;;  %v555_v57 = vld [vmem:[%s1137_s2] sm:$0xff]  ;;  %v556_v59 = vld [vmem:[%s1137_s2 + $0x8] sm:$0xff] }
 0x11b   :  { %490 = vadd.xlane.f32.xlu0 %v489_v58 }
 0x11d   :  { %493 = vadd.xlane.f32.xlu1 %v492_v60 }
 0x184   :  { %v473_v61 = vpop.xlane.xlu0 %472  ;;  %v479_v62 = vpop.xlane.xlu1 %478 }
 0x185   :  { %v495_v2 = vadd.f32 %v479_v62, %v473_v61 }
 0x188   :  { %v476_v63 = vpop.xlane.xlu0 %475  ;;  %v482_v0 = vpop.xlane.xlu1 %481 }
 0x189   :  { %v498_v4 = vadd.f32 %v482_v0, %v476_v63  ;;  %v578_v63 = vld [vmem:[%s1136_s3 + $0x8] sm:$0xff] }
 0x1a4   :  { %v485_v1 = vpop.xlane.xlu0 %484 }
 0x1a5   :  { %v496_v5 = vadd.f32 %v495_v2, %v485_v1 }
 0x1a6   :  { %v488_v3 = vpop.xlane.xlu1 %487 }
 0x1a7   :  { %v499_v7 = vadd.f32 %v498_v4, %v488_v3 }
 0x1a8   :  { %v491_v6 = vpop.xlane.xlu0 %490 }
 0x1a9   :  { %v497_v8 = vadd.f32 %v496_v5, %v491_v6 }
 0x1aa   :  { %v494_v9 = vpop.xlane.xlu1 %493 }
 0x1ab   :  { %v501_v10 = vmul.f32 0.0078125, %v497_v8  ;;  %v500_v11 = vadd.f32 %v499_v7, %v494_v9 }
 0x1ad   :  { %v502_v12 = vmul.f32 0.0078125, %v500_v11  ;;  %v1047_v13 = vsub.f32 %v178_v37, %v501_v10  ;;  %v1049_v14 = vsub.f32 %v273_v38, %v501_v10  ;;  %v1062_v21 = vsub.f32 %v368_v49, %v501_v10  ;;  %v577_v38 = vld [vmem:[%s1136_s3] sm:$0xff] }
 0x1ae   :  { %v509_v27 = vsub.f32 %v463_v51, %v501_v10  ;;  %v865_v37 = vmov 0  }
 0x1af   :  { %v511_v15 = vmul.f32 %v1047_v13, %v1047_v13  ;;  %v1053_v16 = vsub.f32 %v181_v42, %v502_v12  ;;  %v1055_v17 = vsub.f32 %v276_v45, %v502_v12  ;;  %v513_v20 = vmul.f32 %v1049_v14, %v1049_v14  ;;  %822 = vset.pattern.permute.xlu1 %v865_v37 }
 0x1b0   :  { %v1067_v24 = vsub.f32 %v371_v54, %v502_v12  ;;  %v515_v26 = vmul.f32 %v1062_v21, %v1062_v21  ;;  %v1075_v30 = vsub.f32 %v466_v56, %v502_v12  ;;  %v517_v32 = vmul.f32 %v509_v27, %v509_v27  ;;  %821 = vset.pattern.permute.xlu0 %v865_v37 }
 0x1b1   :  { %v519_v18 = vsel %vm470_vm1, %v511_v15, 0.0  ;;  %v512_v19 = vmul.f32 %v1053_v16, %v1053_v16  ;;  %v514_v23 = vmul.f32 %v1055_v17, %v1055_v17  ;;  %v525_v25 = vsel %vm470_vm1, %v513_v20, 0.0 }
 0x1b2   :  { %520 = vadd.xlane.f32.xlu0 %v519_v18  ;;  %v516_v29 = vmul.f32 %v1067_v24, %v1067_v24  ;;  %v531_v31 = vsel %vm470_vm1, %v515_v26, 0.0  ;;  %v518_v34 = vmul.f32 %v1075_v30, %v1075_v30  ;;  %v537_v35 = vsel %vm470_vm1, %v517_v32, 0.0 }
 0x1b3   :  { %v522_v22 = vsel %vm470_vm1, %v512_v19, 0.0  ;;  %v528_v28 = vsel %vm470_vm1, %v514_v23, 0.0 }
 0x1b4   :  { %523 = vadd.xlane.f32.xlu1 %v522_v22  ;;  %v534_v33 = vsel %vm470_vm1, %v516_v29, 0.0  ;;  %v540_v36 = vsel %vm470_vm1, %v518_v34, 0.0 }
 0x1b6   :  { %526 = vadd.xlane.f32.xlu0 %v525_v25 }
 0x1b8   :  { %529 = vadd.xlane.f32.xlu1 %v528_v28 }
 0x1ba   :  { %532 = vadd.xlane.f32.xlu0 %v531_v31 }
 0x1bc   :  { %535 = vadd.xlane.f32.xlu1 %v534_v33 }
 0x1be   :  { %538 = vadd.xlane.f32.xlu0 %v537_v35 }
 0x1c0   :  { %541 = vadd.xlane.f32.xlu1 %v540_v36 }
 0x1d1   :  { %581 = vperm.xlu1 %822, %v577_v38  }
 0x23f   :  { %v521_v39 = vpop.xlane.xlu0 %520 }
 0x241   :  { %v524_v40 = vpop.xlane.xlu1 %523 }
 0x243   :  { %v527_v41 = vpop.xlane.xlu0 %526 }
 0x244   :  { %v543_v44 = vadd.f32 %v527_v41, %v521_v39 }
 0x245   :  { %v530_v42 = vpop.xlane.xlu1 %529 }
 0x246   :  { %v546_v46 = vadd.f32 %v530_v42, %v524_v40 }
 0x247   :  { %v533_v43 = vpop.xlane.xlu0 %532 }
 0x248   :  { %v544_v47 = vadd.f32 %v543_v44, %v533_v43 }
 0x249   :  { %v536_v45 = vpop.xlane.xlu1 %535 }
 0x24a   :  { %v547_v49 = vadd.f32 %v546_v46, %v536_v45 }
 0x24b   :  { %v539_v48 = vpop.xlane.xlu0 %538 }
 0x24c   :  { %v545_v50 = vadd.f32 %v544_v47, %v539_v48 }
 0x24d   :  { %v542_v51 = vpop.xlane.xlu1 %541 }
 0x24e   :  { %v549_v52 = vmul.f32 0.0078125, %v545_v50  ;;  %v548_v53 = vadd.f32 %v547_v49, %v542_v51 }
 0x250   :  { %v551_v54 = vadd.f32 1e-05, %v549_v52  ;;  %v550_v55 = vmul.f32 0.0078125, %v548_v53 }
 0x251   :  { %v582_v0 = vpop.permute.xlu1 %581 }
 0x252   :  { %859 = vrsqrt.f32 %v551_v54  ;;  %v552_v56 = vadd.f32 1e-05, %v550_v55 }
 0x254   :  { %861 = vrsqrt.f32 %v552_v56 }
 0x25c   :  { %v860_v58 = vpop.eup %859 }
 0x25d   :  { %v557_v60 = vmul.f32 %v860_v58, %v555_v57 }
 0x25e   :  { %v862_v61 = vpop.eup %861 }
 0x25f   :  { %561 = vperm.xlu0 %821, %v557_v60   ;;  %v558_v62 = vmul.f32 %v862_v61, %v556_v59 }
 0x261   :  { %566 = vperm.xlu1 %822, %v558_v62  }
 0x265   :  { %586 = vperm.xlu1 %822, %v578_v63  }
 0x2de   :  { %v562_v1 = vpop.permute.xlu0 %561 }
 0x2df   :  { %v569_v2 = vmul.f32 %v562_v1, %v1047_v13  ;;  %v571_v3 = vmul.f32 %v562_v1, %v1049_v14  ;;  %v573_v4 = vmul.f32 %v562_v1, %v1062_v21  ;;  %v575_v5 = vmul.f32 %v562_v1, %v509_v27 }
 0x2e0   :  { %v567_v6 = vpop.permute.xlu1 %566 }
 0x2e1   :  { %v589_v7 = vadd.f32 %v582_v0, %v569_v2  ;;  %v591_v8 = vadd.f32 %v582_v0, %v571_v3  ;;  %v593_v9 = vadd.f32 %v582_v0, %v573_v4  ;;  %v595_v10 = vadd.f32 %v582_v0, %v575_v5 }
 0x2e2   :  { %v570_v19 = vmul.f32 %v567_v6, %v1053_v16  ;;  %v572_v20 = vmul.f32 %v567_v6, %v1055_v17  ;;  %v574_v13 = vmul.f32 %v567_v6, %v1067_v24  ;;  %v576_v14 = vmul.f32 %v567_v6, %v1075_v30 }
 0x2e3   :  { %v597_v11 = vmax.f32 %v589_v7, 0.0  ;;  %v599_v12 = vmax.f32 %v591_v8, 0.0  ;;  %v601_v15 = vmax.f32 %v593_v9, 0.0  ;;  %v603_v18 = vmax.f32 %v595_v10, 0.0 }
 0x2e4   :  { %v587_v21 = vpop.permute.xlu1 %586 }
 0x2e5   :  { %v694_v22 = vpack.c.bf16 %v597_v11, %v597_v11  ;;  %v696_v23 = vpack.c.bf16 %v599_v12, %v599_v12  ;;  %v698_v25 = vpack.c.bf16 %v601_v15, %v601_v15  ;;  %v700_v26 = vpack.c.bf16 %v603_v18, %v603_v18 }
 0x2e6   :  { %v590_v27 = vadd.f32 %v587_v21, %v570_v19  ;;  %v592_v28 = vadd.f32 %v587_v21, %v572_v20  ;;  %v594_v29 = vadd.f32 %v587_v21, %v574_v13  ;;  %v596_v31 = vadd.f32 %v587_v21, %v576_v14 }
 0x2e7   :  { %638 = vst.msk [vmem:[%s1138_s4] sm:$0xf] %vm637_vm2, %v694_v22  ;;  %640 = vst.msk [vmem:[%s1138_s4 + $0x8] sm:$0xf] %vm637_vm2, %v696_v23 }
 0x2e8   :  { %642 = vst.msk [vmem:[%s1138_s4 + $0x10] sm:$0xf] %vm637_vm2, %v698_v25  ;;  %644 = vst.msk [vmem:[%s1138_s4 + $0x18] sm:$0xf] %vm637_vm2, %v700_v26  ;;  %v598_v16 = vmax.f32 %v590_v27, 0.0  ;;  %v600_v17 = vmax.f32 %v592_v28, 0.0 }
 0x2e9   :  { %v602_v24 = vmax.f32 %v594_v29, 0.0  ;;  %v604_v30 = vmax.f32 %v596_v31, 0.0 }
 0x2ea   :  { %v695_v32 = vpack.c.bf16 %v598_v16, %v598_v16  ;;  %v697_v33 = vpack.c.bf16 %v600_v17, %v600_v17 }
 0x2eb   :  { %v699_v34 = vpack.c.bf16 %v602_v24, %v602_v24  ;;  %v701_v35 = vpack.c.bf16 %v604_v30, %v604_v30 }
 0x2ec   :  { %639 = vst.msk [vmem:[%s1138_s4 + $0x4] sm:$0xf] %vm637_vm2, %v695_v32  ;;  %641 = vst.msk [vmem:[%s1138_s4 + $0xc] sm:$0xf] %vm637_vm2, %v697_v33 }
 0x2ed   :  { %643 = vst.msk [vmem:[%s1138_s4 + $0x14] sm:$0xf] %vm637_vm2, %v699_v34  ;;  %645 = vst.msk [vmem:[%s1138_s4 + $0x1c] sm:$0xf] %vm637_vm2, %v701_v35 }

// kernel: generator_forward.6
= control target key start
LH: loop header
LB: loop body
LE: loop exit
PB: predicated region body
PF: predicated region fallthrough
CT: control target
= control target key end

     0   :  { %v516_v0 = vmov 0.0   ;;  %vm517_vm0 = vmmov 0   ;;  %vm78_vm1 = vcmask 523264   ;;  %v518_v53 = vmov 0   ;;  %s624_s0 = inlined_call_operand.vmem [shape: bf16[4,64,128], index: 0, kind: input, shape index: {}]   ;;  %s625_s1 = inlined_call_operand.vmem [shape: bf16[4,8,64], index: 1, kind: input, shape index: {}]   ;;  %s626_s3 = inlined_call_operand.vmem [shape: f32[1,8,1], index: 3, kind: input, shape index: {}]   ;;  %s627_s2 = inlined_call_operand.vmem [shape: f32[1,8,1], index: 2, kind: input, shape index: {}]   ;;  %s628_s4 = inlined_call_operand.vmem [shape: bf16[4,8,128], index: 4, kind: output, shape index: {}]  }
   0x1   :  { %445 = vmatprep.subr.bf16.mxu0 %v516_v0  ;;  %v498_v1 = vld [vmem:[%s624_s0] sm:$0xff]   ;;  %457 = vmatprep.subr.bf16.mxu1 %v516_v0  ;;  %v500_v3 = vld [vmem:[%s624_s0 + $0x8] sm:$0xff]   ;;  %v502_v5 = vld [vmem:[%s624_s0 + $0x10] sm:$0xff]  }
   0x2   :  { %v499_v2 = vld [vmem:[%s624_s0 + $0x20] sm:$0xff]   ;;  %453 = vmatprep.mubr.msk.bf16.mxu0 %vm517_vm0, %v516_v0  ;;  %465 = vmatprep.mubr.msk.bf16.mxu1 %vm517_vm0, %v516_v0  ;;  %v501_v4 = vld [vmem:[%s624_s0 + $0x28] sm:$0xff]   ;;  %v503_v6 = vld [vmem:[%s624_s0 + $0x30] sm:$0xff]  }
   0x3   :  { %446 = vmatpush3.bf16.msra.mxu0 %v498_v1  ;;  %458 = vmatpush3.bf16.msra.mxu1 %v499_v2  ;;  %v504_v7 = vld [vmem:[%s624_s0 + $0x18] sm:$0xff]   ;;  %v50_v9 = vld [vmem:[%s625_s1] sm:$0xf]  ;;  %v51_v11 = vld [vmem:[%s625_s1 + $0x4] sm:$0xf] }
   0x4   :  { %447 = vmatprep.subr.bf16.mxu0 %v516_v0  ;;  %459 = vmatprep.subr.bf16.mxu1 %v516_v0  ;;  %v505_v8 = vld [vmem:[%s624_s0 + $0x38] sm:$0xff]   ;;  %v506_v10 = vld [vmem:[%s624_s0 + $0x40] sm:$0xff]   ;;  %v508_v13 = vld [vmem:[%s624_s0 + $0x48] sm:$0xff]  }
   0x5   :  { %v507_v12 = vld [vmem:[%s624_s0 + $0x60] sm:$0xff]   ;;  %v509_v14 = vld [vmem:[%s624_s0 + $0x68] sm:$0xff]   ;;  %v510_v15 = vld [vmem:[%s624_s0 + $0x50] sm:$0xff]   ;;  %496 = vset.pattern.permute.xlu0 %v518_v53  ;;  %497 = vset.pattern.permute.xlu1 %v518_v53 }
   0x6   :  { %v511_v16 = vld [vmem:[%s624_s0 + $0x70] sm:$0xff]   ;;  %v512_v17 = vld [vmem:[%s624_s0 + $0x58] sm:$0xff]   ;;  %v52_v19 = vld [vmem:[%s625_s1 + $0x8] sm:$0xf] }
   0x7   :  { %448 = vmatpush3.bf16.msra.mxu0 %v500_v3  ;;  %460 = vmatpush3.bf16.msra.mxu1 %v501_v4  ;;  %v513_v18 = vld [vmem:[%s624_s0 + $0x78] sm:$0xff]   ;;  %v53_v20 = vld [vmem:[%s625_s1 + $0xc] sm:$0xf]  ;;  %v368_v54 = vld [vmem:[%s626_s3] sm:$0xff] }
   0x8   :  { %449 = vmatprep.subr.bf16.mxu0 %v516_v0  ;;  %461 = vmatprep.subr.bf16.mxu1 %v516_v0 }
   0xb   :  { %450 = vmatpush3.bf16.msra.mxu0 %v502_v5  ;;  %462 = vmatpush3.bf16.msra.mxu1 %v503_v6 }
   0xc   :  { %451 = vmatprep.subr.bf16.mxu0 %v516_v0  ;;  %463 = vmatprep.subr.bf16.mxu1 %v516_v0 }
   0xf   :  { %452 = vmatpush3.bf16.msra.mxu0 %v504_v7  ;;  %464 = vmatpush3.bf16.msra.mxu1 %v505_v8 }
  0x10   :  { %469 = vmatprep.subr.bf16.mxu0 %v516_v0  ;;  %481 = vmatprep.subr.bf16.mxu1 %v516_v0 }
  0x12   :  { %454 = vmatmul.mubr.msk.bf16.vlgmr.msra.gmra.mrb[0].mxu0 %vm78_vm1, %v50_v9  ;;  %466 = vmatmul.mubr.msk.bf16.vlgmr.msra.gmra.mrb[0].mxu1 %vm78_vm1, %v51_v11 }
  0x13   :  { %470 = vmatpush3.bf16.msra.mxu0 %v506_v10  ;;  %482 = vmatpush3.bf16.msra.mxu1 %v507_v12 }
  0x14   :  { %471 = vmatprep.subr.bf16.mxu0 %v516_v0  ;;  %483 = vmatprep.subr.bf16.mxu1 %v516_v0 }
  0x15   :  { %477 = vmatprep.mubr.msk.bf16.mxu0 %vm517_vm0, %v516_v0  ;;  %489 = vmatprep.mubr.msk.bf16.mxu1 %vm517_vm0, %v516_v0 }
  0x17   :  { %472 = vmatpush3.bf16.msra.mxu0 %v508_v13  ;;  %484 = vmatpush3.bf16.msra.mxu1 %v509_v14 }
  0x18   :  { %473 = vmatprep.subr.bf16.mxu0 %v516_v0  ;;  %485 = vmatprep.subr.bf16.mxu1 %v516_v0 }
  0x1b   :  { %474 = vmatpush3.bf16.msra.mxu0 %v510_v15  ;;  %486 = vmatpush3.bf16.msra.mxu1 %v511_v16 }
  0x1c   :  { %475 = vmatprep.subr.bf16.mxu0 %v516_v0  ;;  %487 = vmatprep.subr.bf16.mxu1 %v516_v0  ;;  %v357_v0 = vld [vmem:[%s627_s2] sm:$0xff] }
  0x1f   :  { %476 = vmatpush3.bf16.msra.mxu0 %v512_v17  ;;  %488 = vmatpush3.bf16.msra.mxu1 %v513_v18 }
  0x22   :  { %478 = vmatmul.mubr.msk.bf16.vlgmr.msra.gmra.mrb[4].mxu0 %vm78_vm1, %v52_v19  ;;  %490 = vmatmul.mubr.msk.bf16.vlgmr.msra.gmra.mrb[4].mxu1 %vm78_vm1, %v53_v20 }
  0xe5   :  { %v116_v21 = vpop.f32.mrb[0].mxu0  ;;  %v183_v23 = vpop.f32.mrb[0].mxu1 }
  0xe6   :  { %323 = vadd.xlane.f32.xlu0 %v116_v21  ;;  %v455_v22 = vpop.f32.mrb[1].mxu0  ;;  %v467_v25 = vpop.f32.mrb[1].mxu1 }
  0xe7   :  { %v119_v24 = vpop.f32.mrb[2].mxu0  ;;  %v186_v27 = vpop.f32.mrb[2].mxu1 }
  0xe8   :  { %v456_v26 = vpop.f32.mrb[3].mxu0  ;;  %v468_v28 = vpop.f32.mrb[3].mxu1 }
  0xea   :  { %325 = vadd.xlane.f32.xlu0 %v183_v23 }
  0xf5   :  { %v250_v29 = vpop.f32.mrb[4].mxu0  ;;  %v317_v30 = vpop.f32.mrb[4].mxu1 }
  0xf6   :  { %327 = vadd.xlane.f32.xlu1 %v250_v29  ;;  %v479_v31 = vpop.f32.mrb[5].mxu0  ;;  %v491_v33 = vpop.f32.mrb[5].mxu1 }
  0xf7   :  { %v253_v32 = vpop.f32.mrb[6].mxu0  ;;  %v320_v35 = vpop.f32.mrb[6].mxu1 }
  0xf8   :  { %v480_v34 = vpop.f32.mrb[7].mxu0  ;;  %v492_v36 = vpop.f32.mrb[7].mxu1 }
  0xfa   :  { %329 = vadd.xlane.f32.xlu1 %v317_v30 }
 0x173   :  { %v324_v37 = vpop.xlane.xlu0 %323 }
 0x177   :  { %v326_v38 = vpop.xlane.xlu0 %325 }
 0x178   :  { %v331_v40 = vadd.f32 %v326_v38, %v324_v37 }
 0x183   :  { %v328_v39 = vpop.xlane.xlu1 %327 }
 0x184   :  { %v332_v41 = vadd.f32 %v331_v40, %v328_v39 }
 0x187   :  { %v330_v42 = vpop.xlane.xlu1 %329 }
 0x188   :  { %v333_v43 = vadd.f32 %v332_v41, %v330_v42 }
 0x18a   :  { %v334_v44 = vmul.f32 0.001953125, %v333_v43 }
 0x18c   :  { %v336_v45 = vsub.f32 %v183_v23, %v334_v44  ;;  %v335_v46 = vsub.f32 %v116_v21, %v334_v44  ;;  %v338_v49 = vsub.f32 %v317_v30, %v334_v44  ;;  %v337_v50 = vsub.f32 %v250_v29, %v334_v44 }
 0x18e   :  { %v340_v47 = vmul.f32 %v336_v45, %v336_v45  ;;  %v339_v48 = vmul.f32 %v335_v46, %v335_v46  ;;  %v342_v51 = vmul.f32 %v338_v49, %v338_v49  ;;  %v341_v52 = vmul.f32 %v337_v50, %v337_v50 }
 0x190   :  { %345 = vadd.xlane.f32.xlu1 %v340_v47  ;;  %343 = vadd.xlane.f32.xlu0 %v339_v48 }
 0x194   :  { %349 = vadd.xlane.f32.xlu1 %v342_v51  ;;  %347 = vadd.xlane.f32.xlu0 %v341_v52 }
 0x1a5   :  { %371 = vperm.xlu1 %497, %v368_v54  }
 0x21d   :  { %v346_v55 = vpop.xlane.xlu1 %345  ;;  %v344_v56 = vpop.xlane.xlu0 %343 }
 0x21e   :  { %v351_v57 = vadd.f32 %v346_v55, %v344_v56 }
 0x221   :  { %v348_v58 = vpop.xlane.xlu0 %347  ;;  %v350_v60 = vpop.xlane.xlu1 %349 }
 0x222   :  { %v352_v59 = vadd.f32 %v351_v57, %v348_v58 }
 0x224   :  { %v353_v61 = vadd.f32 %v352_v59, %v350_v60 }
 0x225   :  { %v372_v4 = vpop.permute.xlu1 %371 }
 0x226   :  { %v354_v62 = vmul.f32 0.001953125, %v353_v61 }
 0x228   :  { %v355_v63 = vadd.f32 1e-05, %v354_v62 }
 0x22a   :  { %514 = vrsqrt.f32 %v355_v63 }
 0x234   :  { %v515_v1 = vpop.eup %514 }
 0x235   :  { %v358_v2 = vmul.f32 %v515_v1, %v357_v0 }
 0x237   :  { %361 = vperm.xlu0 %496, %v358_v2  }
 0x2b6   :  { %v362_v3 = vpop.permute.xlu0 %361 }
 0x2b7   :  { %v364_v5 = vmul.f32 %v362_v3, %v335_v46  ;;  %v365_v6 = vmul.f32 %v362_v3, %v336_v45  ;;  %v366_v7 = vmul.f32 %v362_v3, %v337_v50  ;;  %v367_v8 = vmul.f32 %v362_v3, %v338_v49 }
 0x2b9   :  { %v374_v9 = vadd.f32 %v372_v4, %v364_v5  ;;  %v375_v10 = vadd.f32 %v372_v4, %v365_v6  ;;  %v376_v11 = vadd.f32 %v372_v4, %v366_v7  ;;  %v377_v12 = vadd.f32 %v372_v4, %v367_v8 }
 0x2bb   :  { %v378_v13 = vmax.f32 %v374_v9, 0.0  ;;  %v379_v14 = vmax.f32 %v375_v10, 0.0  ;;  %v380_v15 = vmax.f32 %v376_v11, 0.0  ;;  %v381_v16 = vmax.f32 %v377_v12, 0.0 }
 0x2bd   :  { %v417_v17 = vpack.c.bf16 %v379_v14, %v378_v13  ;;  %v422_v18 = vpack.c.bf16 %v381_v16, %v380_v15 }
 0x2bf   :  { %418 = vst [vmem:[%s628_s4] sm:$0xff] %v417_v17   ;;  %424 = vst [vmem:[%s628_s4 + $0x8] sm:$0xff] %v422_v18  }

// kernel: generator_forward.7
= control target key start
LH: loop header
LB: loop body
LE: loop exit
PB: predicated region body
PF: predicated region fallthrough
CT: control target
= control target key end

     0   :  { %s793_s9 = smov 0   ;;  %s795_s10 = smov 0   ;;  %s909_s0 = inlined_call_operand.vmem [shape: bf16[4,32,512], index: 0, kind: input, shape index: {}]   ;;  %s910_s1 = inlined_call_operand.vmem [shape: bf16[4,3,32], index: 1, kind: input, shape index: {}]   ;;  %s911_s2 = inlined_call_operand.vmem [shape: f32[4,3,512], index: 2, kind: output, shape index: {}]  }
   0x1   :  { %s797_s11 = smov 0  }
   0x2 LB: > { %s651_s12 = sadd.s32 4294967295, %s775_s11   ;;  %s810_s13 = sadd.s32 1, %s775_s11   ;;  %s775_s11 = sphi %s797_s11, %s915_s11   ;;  %s771_s10 = sphi %s795_s10, %s914_s10   ;;  %s767_s9 = sphi %s793_s9, %s913_s9  }
   0x3   : > { %s16_s14 = ssub.s32 %s775_s11, %s810_s13  ;;  %s19_s15 = sadd.s32 1, %s771_s10 }
   0x4   : > { %p17_p0 = scmp.eq.s32.totalorder %s16_s14, 0  ;;  %p26_p1 = scmp.ne.s32.totalorder %s771_s10, %s767_s9 }
   0x5   : > { %p27_p2 = scmp.eq.s32.totalorder %s775_s11, 0  ;;  %p77_p3 = scmp.eq.s32.totalorder %s651_s12, 1 }
   0x6   : > { %s821_s16 = scalar_select %p17_p0, %s771_s10, %s19_s15  }
   0x7   : > { %p28_p4 = por %p27_p2, %p26_p1  ;;  %p823_p5 = por %p77_p3, %p26_p1 }
   0x8   : > { %p654_p6 = scmp.ge.s32.totalorder %s775_s11, 2 }
   0xa   : > { %102 = sbr.rel (%p654_p6) target bundleno = 29 (0x1d), region = 20 }
  0x11   : > { %105 = sbr.rel (!%p28_p4) target bundleno = 29 (0x1d), region = 24  ;;  %s107_s18 = sand.u32 (%p28_p4), 1, %s771_s10  }
  0x12   : > { %s686_s19 = sshll.u32 (%p28_p4), %s775_s11, 3  ;;  %s655_s20 = sshll.u32 (%p28_p4), %s107_s18, 7 }
  0x13   : > { %s833_s23 = scalar_lea.vmem (%p28_p4), %s909_s0, %s686_s19  ;;  %s109_s24 = scalar_lea.vmem (%p28_p4), [#allocation2], %s655_s20 }
  0x14   : > { %v170_v0 = vld [vmem:[%s833_s23] sm:$0xff] (%p28_p4)  ;;  %v172_v1 = vld [vmem:[%s833_s23 + $0x10] sm:$0xff] (%p28_p4) }
  0x15   : > { %v174_v2 = vld [vmem:[%s833_s23 + $0x20] sm:$0xff] (%p28_p4)  ;;  %171 = vst [vmem:[%s109_s24] sm:$0xff] (%p28_p4), %v170_v0  ;;  %173 = vst [vmem:[%s109_s24 + $0x8] sm:$0xff] (%p28_p4), %v172_v1  ;;  %v176_v3 = vld [vmem:[%s833_s23 + $0x30] sm:$0xff] (%p28_p4) }
  0x16   : > { %175 = vst [vmem:[%s109_s24 + $0x10] sm:$0xff] (%p28_p4), %v174_v2  ;;  %v178_v4 = vld [vmem:[%s833_s23 + $0x40] sm:$0xff] (%p28_p4)  ;;  %v180_v5 = vld [vmem:[%s833_s23 + $0x50] sm:$0xff] (%p28_p4)  ;;  %177 = vst [vmem:[%s109_s24 + $0x18] sm:$0xff] (%p28_p4), %v176_v3 }
  0x17   : > { %179 = vst [vmem:[%s109_s24 + $0x20] sm:$0xff] (%p28_p4), %v178_v4  ;;  %181 = vst [vmem:[%s109_s24 + $0x28] sm:$0xff] (%p28_p4), %v180_v5  ;;  %v182_v6 = vld [vmem:[%s833_s23 + $0x60] sm:$0xff] (%p28_p4)  ;;  %v184_v7 = vld [vmem:[%s833_s23 + $0x70] sm:$0xff] (%p28_p4) }
  0x18   : > { %v186_v8 = vld [vmem:[%s833_s23 + $0x80] sm:$0xff]  ;;  %183 = vst [vmem:[%s109_s24 + $0x30] sm:$0xff] %v182_v6  ;;  %185 = vst [vmem:[%s109_s24 + $0x38] sm:$0xff] %v184_v7  ;;  %v188_v9 = vld [vmem:[%s833_s23 + $0x90] sm:$0xff] }
  0x19   : > { %187 = vst [vmem:[%s109_s24 + $0x40] sm:$0xff] %v186_v8  ;;  %v190_v10 = vld [vmem:[%s833_s23 + $0xa0] sm:$0xff]  ;;  %v192_v11 = vld [vmem:[%s833_s23 + $0xb0] sm:$0xff]  ;;  %189 = vst [vmem:[%s109_s24 + $0x48] sm:$0xff] %v188_v9 }
  0x1a   : > { %191 = vst [vmem:[%s109_s24 + $0x50] sm:$0xff] %v190_v10  ;;  %193 = vst [vmem:[%s109_s24 + $0x58] sm:$0xff] %v192_v11  ;;  %v194_v12 = vld [vmem:[%s833_s23 + $0xc0] sm:$0xff]  ;;  %v196_v13 = vld [vmem:[%s833_s23 + $0xd0] sm:$0xff] }
  0x1b   : > { %v198_v14 = vld [vmem:[%s833_s23 + $0xe0] sm:$0xff]  ;;  %195 = vst [vmem:[%s109_s24 + $0x60] sm:$0xff] %v194_v12  ;;  %197 = vst [vmem:[%s109_s24 + $0x68] sm:$0xff] %v196_v13  ;;  %v200_v15 = vld [vmem:[%s833_s23 + $0xf0] sm:$0xff] }
  0x1c   : > { %199 = vst [vmem:[%s109_s24 + $0x70] sm:$0xff] %v198_v14  ;;  %201 = vst [vmem:[%s109_s24 + $0x78] sm:$0xff] %v200_v15 }
  0x1d PF: > { %p658_p7 = scmp.ge.s32.totalorder %s775_s11, 1  ;;  %p206_p8 = scmp.lt.s32.totalorder %s775_s11, 3 }
  0x1f   : > { %p207_p9 = pnand %p658_p7, %p206_p8 }
  0x20   : > { %s213_s25 = sand.u32 (!%p207_p9), 1, %s767_s9   ;;  %v777_v16 = vmov (!%p207_p9), 0   ;;  %v236_v25 = vld [vmem:[%s910_s1] sm:$0x3] (!%p207_p9)  ;;  %v237_v26 = vld [vmem:[%s910_s1 + $0x2] sm:$0x3] (!%p207_p9) }
  0x21   : > { %210 = sbr.rel (%p207_p9) target bundleno = 289 (0x121), region = 62  ;;  %s659_s26 = sshll.u32 (!%p207_p9), %s213_s25, 7  ;;  %312 = vmatprep.mubr.bf16.mxu0 (!%p207_p9), %v777_v16  ;;  %376 = vmatprep.mubr.bf16.mxu1 (!%p207_p9), %v777_v16  ;;  %vm276_vm0 = vcmask (!%p207_p9), 261120   ;;  %v238_v35 = vld [vmem:[%s910_s1 + $0x4] sm:$0x3] (!%p207_p9) }
  0x22   : > { %s856_s27 = scalar_lea.vmem (!%p207_p9), [#allocation2], %s659_s26  ;;  %v239_v36 = vld [vmem:[%s910_s1 + $0x6] sm:$0x3] (!%p207_p9)  ;;  %s660_s8 = sshll.u32 (!%p207_p9), %s213_s25, 5 }
  0x23   : > { %v713_v17 = vld [vmem:[%s856_s27 + $0x4] ss:$8 sps:$4 sm:$0xff] (!%p207_p9)   ;;  %v717_v19 = vld [vmem:[%s856_s27] ss:$8 sps:$4 sm:$0xff] (!%p207_p9)   ;;  %v719_v21 = vld [vmem:[%s856_s27 + $0x14] ss:$8 sps:$4 sm:$0xff] (!%p207_p9)  }
  0x24   : > { %v715_v18 = vld [vmem:[%s856_s27 + $0x24] ss:$8 sps:$4 sm:$0xff] (!%p207_p9)   ;;  %280 = vmatprep.subr.bf16.mxu0 (!%p207_p9), %v713_v17  ;;  %v718_v20 = vld [vmem:[%s856_s27 + $0x20] ss:$8 sps:$4 sm:$0xff] (!%p207_p9)   ;;  %v721_v22 = vld [vmem:[%s856_s27 + $0x34] ss:$8 sps:$4 sm:$0xff] (!%p207_p9)  }
  0x25   : > { %344 = vmatprep.subr.bf16.mxu1 (!%p207_p9), %v715_v18  ;;  %281 = vmatpush1.bf16.msra.mxu0 (!%p207_p9), %v717_v19  ;;  %v723_v23 = vld [vmem:[%s856_s27 + $0x10] ss:$8 sps:$4 sm:$0xff] (!%p207_p9)   ;;  %v727_v27 = vld [vmem:[%s856_s27 + $0x44] ss:$8 sps:$4 sm:$0xff] (!%p207_p9)   ;;  %v725_v28 = vld [vmem:[%s856_s27 + $0x40] ss:$8 sps:$4 sm:$0xff] (!%p207_p9)  }
  0x26   : > { %345 = vmatpush1.bf16.msra.mxu1 (!%p207_p9), %v718_v20  ;;  %282 = vmatprep.subr.bf16.mxu0 (!%p207_p9), %v719_v21  ;;  %v724_v24 = vld [vmem:[%s856_s27 + $0x30] ss:$8 sps:$4 sm:$0xff] (!%p207_p9)   ;;  %v730_v29 = vld [vmem:[%s856_s27 + $0x64] ss:$8 sps:$4 sm:$0xff] (!%p207_p9)   ;;  %v728_v30 = vld [vmem:[%s856_s27 + $0x60] ss:$8 sps:$4 sm:$0xff] (!%p207_p9)  }
  0x27   : > { %346 = vmatprep.subr.bf16.mxu1 (!%p207_p9), %v721_v22  ;;  %v733_v31 = vld [vmem:[%s856_s27 + $0x54] ss:$8 sps:$4 sm:$0xff] (!%p207_p9)   ;;  %v731_v33 = vld [vmem:[%s856_s27 + $0x50] ss:$8 sps:$4 sm:$0xff] (!%p207_p9)   ;;  %s232_s14 = scalar_lea.vmem (!%p207_p9), [#allocation3], %s660_s8 }
  0x28   : > { %v736_v32 = vld [vmem:[%s856_s27 + $0x74] ss:$8 sps:$4 sm:$0xff]   ;;  %v734_v34 = vld [vmem:[%s856_s27 + $0x70] ss:$8 sps:$4 sm:$0xff]   ;;  %s687_s9 = sshll.u32 (%p823_p5), %s651_s12, 3 }
  0x29   : > { %283 = vmatpush1.bf16.msra.mxu0 %v723_v23  ;;  %s550_s19 = scalar_lea.vmem (%p823_p5), %s911_s2, %s687_s9 }
  0x2a   : > { %347 = vmatpush1.bf16.msra.mxu1 %v724_v24  ;;  %408 = vmatprep.subr.bf16.mxu0 %v727_v27 }
  0x2b   : > { %472 = vmatprep.subr.bf16.mxu1 %v730_v29 }
  0x2c   : > { %665 = vmatmul.mubr.msk.bf16.vlgmr.msra.gmra.mrb[0].mxu0 %vm276_vm0, %v236_v25 }
  0x2d   : > { %670 = vmatmul.mubr.msk.bf16.vlgmr.msra.gmra.mrb[0].mxu1 %vm276_vm0, %v237_v26  ;;  %409 = vmatpush1.bf16.msra.mxu0 %v725_v28 }
  0x2e   : > { %473 = vmatpush1.bf16.msra.mxu1 %v728_v30  ;;  %410 = vmatprep.subr.bf16.mxu0 %v733_v31 }
  0x2f   : > { %474 = vmatprep.subr.bf16.mxu1 %v736_v32  ;;  %440 = vmatprep.mubr.bf16.mxu0 %v777_v16 }
  0x30   : > { %504 = vmatprep.mubr.bf16.mxu1 %v777_v16 }
  0x31   : > { %411 = vmatpush1.bf16.msra.mxu0 %v731_v33 }
  0x32   : > { %475 = vmatpush1.bf16.msra.mxu1 %v734_v34 }
  0x34   : > { %675 = vmatmul.mubr.msk.bf16.vlgmr.msra.gmra.mrb[4].mxu0 %vm276_vm0, %v238_v35 }
  0x35   : > { %680 = vmatmul.mubr.msk.bf16.vlgmr.msra.gmra.mrb[4].mxu1 %vm276_vm0, %v239_v36 }
  0xff   : > { %v314_v37 = vpop.f32.mrb[0].mxu0 }
 0x100   : > { %v378_v38 = vpop.f32.mrb[0].mxu1  ;;  %737 = vtanh.f32 %v314_v37  ;;  %v316_v39 = vpop.f32.mrb[1].mxu0 }
 0x101   : > { %v380_v40 = vpop.f32.mrb[1].mxu1  ;;  %739 = vtanh.f32 %v378_v38  ;;  %v318_v41 = vpop.f32.mrb[2].mxu0 }
 0x102   : > { %v382_v42 = vpop.f32.mrb[2].mxu1  ;;  %741 = vtanh.f32 %v316_v39  ;;  %v319_v43 = vpop.f32.mrb[3].mxu0 }
 0x103   : > { %v383_v44 = vpop.f32.mrb[3].mxu1  ;;  %743 = vtanh.f32 %v380_v40 }
 0x107   : > { %v442_v45 = vpop.f32.mrb[4].mxu0 }
 0x108   : > { %v506_v46 = vpop.f32.mrb[4].mxu1  ;;  %745 = vtanh.f32 %v442_v45  ;;  %v444_v47 = vpop.f32.mrb[5].mxu0 }
 0x109   : > { %v508_v48 = vpop.f32.mrb[5].mxu1  ;;  %747 = vtanh.f32 %v506_v46  ;;  %v446_v49 = vpop.f32.mrb[6].mxu0 }
 0x10a   : > { %v510_v50 = vpop.f32.mrb[6].mxu1  ;;  %v738_v51 = vpop.eup %737  ;;  %749 = vtanh.f32 %v444_v47 }
 0x10b   : > { %v447_v52 = vpop.f32.mrb[7].mxu0  ;;  %v511_v53 = vpop.f32.mrb[7].mxu1  ;;  %751 = vtanh.f32 %v508_v48 }
 0x10c   : > { %v740_v54 = vpop.eup %739 }
 0x10d   : > { %v742_v55 = vpop.eup %741 }
 0x10e   : > { %v744_v56 = vpop.eup %743  ;;  %v529_v57 = vcombine.low %v738_v51, %v742_v55 }
 0x10f   : > { %v530_v58 = vcombine.low %v740_v54, %v744_v56 }
 0x110   : > { %537 = vst [vmem:[%s232_s14] sm:$0x77] %v529_v57 }
 0x111   : > { %538 = vst [vmem:[%s232_s14 + $0x8] sm:$0x77] %v530_v58 }
 0x112   : > { %v746_v59 = vpop.eup %745  ;;  %547 = sbr.rel (!%p823_p5) target bundleno = 289 (0x121), region = 70 }
 0x113   : > { %v748_v60 = vpop.eup %747 }
 0x114   : > { %v750_v61 = vpop.eup %749 }
 0x115   : > { %v752_v62 = vpop.eup %751  ;;  %v531_v63 = vcombine.low %v746_v59, %v750_v61 }
 0x116   : > { %v532_v0 = vcombine.low %v748_v60, %v752_v62 }
 0x117   : > { %539 = vst [vmem:[%s232_s14 + $0x10] sm:$0x77] %v531_v63  ;;  %v584_v1 = vld [vmem:[%s232_s14] sm:$0xff] (%p823_p5) }
 0x118   : > { %540 = vst [vmem:[%s232_s14 + $0x18] sm:$0x77] %v532_v0  ;;  %v586_v2 = vld [vmem:[%s232_s14 + $0x8] sm:$0xff] (%p823_p5)  ;;  %585 = vst [vmem:[%s550_s19] sm:$0xff] (%p823_p5), %v584_v1 }
 0x119   : > { %587 = vst [vmem:[%s550_s19 + $0x10] sm:$0xff] %v586_v2 }
 0x11e   : > { %v588_v3 = vld [vmem:[%s232_s14 + $0x10] sm:$0xff] }
 0x11f   : > { %v590_v4 = vld [vmem:[%s232_s14 + $0x18] sm:$0xff]  ;;  %589 = vst [vmem:[%s550_s19 + $0x20] sm:$0xff] %v588_v3 }
 0x120   : > { %591 = vst [vmem:[%s550_s19 + $0x30] sm:$0xff] %v590_v4 }
 0x121 PF: > { %p9_p10 = scmp.ge.s32.totalorder %s810_s13, 4   ;;  %s913_s9 = smov %s771_s10 }
 0x122   : > { %s914_s10 = smov %s821_s16  ;;  %s915_s11 = smov %s810_s13 }
 0x123   :  { %11 = sbr.rel (!%p9_p10) target bundleno = 2 (0x2), region = 139 }

</bundles_post_ra>
